<compile_context>
chip_gen: v7x
topology: tpu7x:2x2x1
jax: 0.10.0
libtpu: 0.0.40
codegen_flags: <defaults>
</compile_context>

<pallas_src>
import jax
import jax.numpy as jnp
from jax.scipy.linalg import block_diag
from jax.experimental import pallas as pl
from jax.experimental.pallas import tpu as pltpu

# ----------------------------- model config ---------------------------------
LAYERS_WIDTH = 32
BACKBONE_LAYERS = 3
SKIP_LAYER_IDX = 1
STYLE_FEATURES = 8
OUTPUT_FEATURES = 4
OCTAVES = 4
APPEND_ORIGINAL = True
EMPTY_SPACE_ALPHA = -10.0
# BoundingBox.dimensions: (3, 2) [min, max] per axis — baked as Python consts.
BBOX = ((-1.0, 1.0), (-1.0, 1.0), (-1.0, 1.0))

# TODO(synk): SKIP_LAYER_IDX == 0 (skip at the first layer) is not handled by
# the fused layer-0 path; the reference config uses 1.
assert 1 <= SKIP_LAYER_IDX < BACKBONE_LAYERS


def _align(x, m):
    return ((x + m - 1) // m) * m


# --------------------------- packed lane layout ------------------------------
P = 4                                                    # points packed per row
ENC_SIZE = 3 * 2 * OCTAVES + (3 if APPEND_ORIGINAL else 0)   # 27 per point
ENC_GROUPS = 2 * OCTAVES + (1 if APPEND_ORIGINAL else 0)     # [p | s0..s3 | c0..c3]
ENC_PACKED = ENC_GROUPS * 3 * P                              # 108
ENC_PACKED_PAD = _align(ENC_PACKED, 16)                      # 112 (bf16 sublane tile)
WP = LAYERS_WIDTH * P                                        # 128
HWP = (LAYERS_WIDTH // 2) * P                                # 64
N_L0 = 2 * WP                                                # [layer0 | skip-enc] = 256
N_HEAD = WP + P                                              # [f0 | alpha] = 132
N_STYLE = 2 * WP + 2 * HWP                                   # [s1|b1|s2|b2] = 384
OUT_FEATS = OUTPUT_FEATURES * P                              # 16
OUT_COLS = OUT_FEATS + P                                     # 20 (feats | alpha)
SLAB_COLS = max(N_L0, N_HEAD, N_STYLE)                       # 384

MAX_TILE_ROWS = 2048                                         # 8192 points per tile


def build_slab_layout():
    """Row layout of the packed bf16 weight slab (all lane slices start at 0)."""
    layout = {}
    row = 0

    def add(name, rows, cols, align=16):
        nonlocal row
        layout[name] = (row, rows, cols)
        row = _align(row + rows, align)

    add("w0_fused", ENC_PACKED_PAD, N_L0)        # enc -> [layer0 | skip enc branch]
    for li in range(1, BACKBONE_LAYERS):
        add(f"w{li}", WP, WP)                    # (skip layer stores only its h rows)
    add("w_head", WP, N_HEAD)                    # [f0 (128) | alpha (4)]
    add("w_style", STYLE_FEATURES * P, N_STYLE)  # [scale1 | bias1 | scale2 | bias2]
    add("w_f1", WP, HWP)
    add("w_f2", HWP, OUT_FEATS)
    for li in range(BACKBONE_LAYERS):
        add(f"b{li}", 1, WP, align=1)
    add("b_head", 1, N_HEAD, align=1)
    add("b_style", 1, N_STYLE, align=1)
    add("b_f2", 1, OUT_FEATS, align=1)
    return layout, _align(row, 16)


SLAB_LAYOUT, SLAB_ROWS = build_slab_layout()


def _enc_row_perm():
    """Map packed-enc lane f -> row of the point-major block-diag weight (j*ENC_SIZE+k)."""
    perm = []
    for g in range(ENC_GROUPS):
        for j in range(P):
            for a in range(3):
                if APPEND_ORIGINAL:
                    if g == 0:
                        k = a
                    elif g <= OCTAVES:
                        k = 3 + (g - 1) * 3 + a
                    else:
                        k = 3 + 3 * OCTAVES + (g - 1 - OCTAVES) * 3 + a
                else:
                    if g < OCTAVES:
                        k = g * 3 + a
                    else:
                        k = 3 * OCTAVES + (g - OCTAVES) * 3 + a
                perm.append(j * ENC_SIZE + k)
    return perm


# ------------------------------- kernel -------------------------------------
def make_kernel(layout):
    lo = tuple(float(b[0]) for b in BBOX)
    hi = tuple(float(b[1]) for b in BBOX)
    inv = tuple(1.0 / (float(b[1]) - float(b[0])) for b in BBOX)
    uniform_scale = inv[0] == inv[1] == inv[2]
    uniform_box = (lo[0] == lo[1] == lo[2]) and (hi[0] == hi[1] == hi[2])
    enc_zero_pad = ENC_PACKED_PAD - ENC_PACKED

    def wslice(ref, name):
        r0, rr, cc = layout[name]
        return ref[r0:r0 + rr, 0:cc]                 # static slice of the VMEM slab

    def kernel(pos_ref, sty_ref, w_ref, out_ref):
        pos = pos_ref[...]                                    # (T, 12) f32, 4 pts/row
        sty = sty_ref[...].astype(jnp.bfloat16)               # (T, 32) bf16 for MXU

        def bias(name):
            return wslice(w_ref, name).astype(jnp.float32)    # (1, cc)

        # --- positional encoding: base sin/cos + double-angle recurrences ----
        # TODO(synk): PositionalEncoder source unavailable; standard
        # [x, sin(2^o x), cos(2^o x)] encoding (no pi factor) assumed.
        if uniform_scale:
            p = pos * inv[0]
        else:
            p = jnp.concatenate(
                [pos[:, 3 * j + a:3 * j + a + 1] * inv[a]
                 for j in range(P) for a in range(3)], axis=-1)
        s = [jnp.sin(p)]
        c = [jnp.cos(p)]
        for _ in range(1, OCTAVES):
            s_prev, c_prev = s[-1], c[-1]
            s.append(2.0 * s_prev * c_prev)                   # sin(2x)
            c.append(1.0 - 2.0 * s_prev * s_prev)             # cos(2x)
        parts = ([p] if APPEND_ORIGINAL else []) + s + c      # group layout
        if enc_zero_pad:
            parts.append(jnp.zeros((pos.shape[0], enc_zero_pad), jnp.float32))
        enc_bf = jnp.concatenate(parts, axis=-1).astype(jnp.bfloat16)  # (T, 112)

        # --- layer 0 fused with the skip-layer enc branch (N = 256) ----------
        big = jnp.dot(enc_bf, wslice(w_ref, "w0_fused"),
                      preferred_element_type=jnp.float32)     # (T, 256)
        h = jnp.maximum(big[:, 0:WP] + bias("b0"), 0.0)       # (T, 128)
        skip_pre = big[:, WP:2 * WP]                          # enc @ w_skip_enc

        for li in range(1, BACKBONE_LAYERS):
            acc = jnp.dot(h.astype(jnp.bfloat16), wslice(w_ref, f"w{li}"),
                          preferred_element_type=jnp.float32)
            if li == SKIP_LAYER_IDX:
                acc = acc + skip_pre
            h = jnp.maximum(acc + bias(f"b{li}"), 0.0)

        h_bf = h.astype(jnp.bfloat16)

        # --- fused [f0 | alpha] head ------------------------------------------
        hd = jnp.dot(h_bf, wslice(w_ref, "w_head"),
                     preferred_element_type=jnp.float32) + bias("b_head")   # (T, 132)
        f = hd[:, 0:WP]
        alpha = hd[:, WP:WP + P]                              # (T, 4) one lane / point

        # --- fused AdaIn style projection (4 matmuls -> 1) --------------------
        # TODO(synk): AffineTransformAdaIn source unavailable; assumed
        # out = x * (style @ Ws + bs) + (style @ Wb + bb).
        st = jnp.dot(sty, wslice(w_ref, "w_style"),
                     preferred_element_type=jnp.float32) + bias("b_style")  # (T, 384)
        f = jnp.maximum(f * st[:, 0:WP] + st[:, WP:2 * WP], 0.0)
        f = jnp.dot(f.astype(jnp.bfloat16), wslice(w_ref, "w_f1"),
                    preferred_element_type=jnp.float32)       # (T, 64)
        f = jnp.maximum(f * st[:, 2 * WP:2 * WP + HWP]
                        + st[:, 2 * WP + HWP:2 * WP + 2 * HWP], 0.0)
        feats = jnp.dot(f.astype(jnp.bfloat16), wslice(w_ref, "w_f2"),
                        preferred_element_type=jnp.float32) + bias("b_f2")  # (T, 16)

        # --- bounding-box mask + masked slice stores (no pad concat) ----------
        if uniform_box:
            inb = jnp.logical_and(pos >= lo[0], pos <= hi[0])  # (T, 12) bool
        f_pieces, a_pieces = [], []
        for j in range(P):
            if uniform_box:
                mj = jnp.logical_and(
                    jnp.logical_and(inb[:, 3 * j:3 * j + 1], inb[:, 3 * j + 1:3 * j + 2]),
                    inb[:, 3 * j + 2:3 * j + 3])
            else:
                mj = None
                for a in range(3):
                    col = pos[:, 3 * j + a:3 * j + a + 1]
                    ca = jnp.logical_and(col >= lo[a], col <= hi[a])
                    mj = ca if mj is None else jnp.logical_and(mj, ca)
            f_pieces.append(jnp.where(
                mj, feats[:, OUTPUT_FEATURES * j:OUTPUT_FEATURES * (j + 1)], 0.0))
            a_pieces.append(jnp.where(mj, alpha[:, j:j + 1], EMPTY_SPACE_ALPHA))
        out_ref[:, 0:OUT_FEATS] = jnp.concatenate(f_pieces, axis=-1)
        out_ref[:, OUT_FEATS:OUT_COLS] = jnp.concatenate(a_pieces, axis=-1)

    return kernel


# ----------------------------- parameters -----------------------------------
def init_params(key):
    keys = iter(jax.random.split(key, 64))

    def lin(fan_in, fan_out, bias=True):
        bound = 1.0 / (fan_in ** 0.5)
        w = jax.random.uniform(next(keys), (fan_in, fan_out), jnp.float32, -bound, bound)
        b = (jax.random.uniform(next(keys), (1, fan_out), jnp.float32, -bound, bound)
             if bias else None)
        return w, b

    p = {"backbone": []}
    in_size = ENC_SIZE
    for li in range(BACKBONE_LAYERS):
        if li == SKIP_LAYER_IDX:
            in_size += ENC_SIZE
        p["backbone"].append(lin(in_size, LAYERS_WIDTH))
        in_size = LAYERS_WIDTH
    p["alpha"] = lin(LAYERS_WIDTH, 1)
    p["f0"] = lin(LAYERS_WIDTH, LAYERS_WIDTH, bias=False)[0]
    p["adain1"] = (lin(STYLE_FEATURES, LAYERS_WIDTH),          # scale branch
                   lin(STYLE_FEATURES, LAYERS_WIDTH))          # bias branch
    p["f1"] = lin(LAYERS_WIDTH, LAYERS_WIDTH // 2, bias=False)[0]
    p["adain2"] = (lin(STYLE_FEATURES, LAYERS_WIDTH // 2),
                   lin(STYLE_FEATURES, LAYERS_WIDTH // 2))
    p["f2"] = lin(LAYERS_WIDTH // 2, OUTPUT_FEATURES)
    return p


def pack_params(params):
    """Pack every weight/bias, replicated block-diagonally for P points, into one
    bf16 (SLAB_ROWS, SLAB_COLS) slab."""
    def bd(w):
        w = jnp.asarray(w, jnp.float32)
        return block_diag(*([w] * P))                       # (P*k, P*n)

    def tile_b(b):
        return jnp.tile(jnp.asarray(b, jnp.float32).reshape(1, -1), (1, P))

    slab = jnp.zeros((SLAB_ROWS, SLAB_COLS), jnp.float32)

    def put(s, name, mat):
        r0, rr, cc = SLAB_LAYOUT[name]
        mat = jnp.asarray(mat, jnp.float32)
        if mat.shape[0] < rr:                               # K pad to multiple of 16
            mat = jnp.pad(mat, ((0, rr - mat.shape[0]), (0, 0)))
        assert mat.shape == (rr, cc), (name, mat.shape, (rr, cc))
        return s.at[r0:r0 + rr, 0:cc].set(mat)

    perm = jnp.asarray(_enc_row_perm(), jnp.int32)

    # layer 0 fused with the skip layer's enc-fed rows (torch concat order: [h, enc])
    w0, b0 = params["backbone"][0]
    w_skip, _ = params["backbone"][SKIP_LAYER_IDX]
    w_skip_enc = w_skip[LAYERS_WIDTH:]
    slab = put(slab, "w0_fused",
               jnp.concatenate([bd(w0)[perm], bd(w_skip_enc)[perm]], axis=1))
    slab = put(slab, "b0", tile_b(b0))

    for li in range(1, BACKBONE_LAYERS):
        w, b = params["backbone"][li]
        if li == SKIP_LAYER_IDX:
            w = w[:LAYERS_WIDTH]                            # h-fed rows only
        slab = put(slab, f"w{li}", bd(w))
        slab = put(slab, f"b{li}", tile_b(b))

    wa, ba = params["alpha"]
    slab = put(slab, "w_head", jnp.concatenate([bd(params["f0"]), bd(wa)], axis=1))
    slab = put(slab, "b_head", jnp.concatenate(
        [jnp.zeros((1, WP), jnp.float32), tile_b(ba)], axis=1))

    (s1w, s1b), (b1w, b1b) = params["adain1"]
    (s2w, s2b), (b2w, b2b) = params["adain2"]
    slab = put(slab, "w_style",
               jnp.concatenate([bd(s1w), bd(b1w), bd(s2w), bd(b2w)], axis=1))
    slab = put(slab, "b_style",
               jnp.concatenate([tile_b(s1b), tile_b(b1b), tile_b(s2b), tile_b(b2b)],
                               axis=1))

    slab = put(slab, "w_f1", bd(params["f1"]))
    f2w, f2b = params["f2"]
    slab = put(slab, "w_f2", bd(f2w))
    slab = put(slab, "b_f2", tile_b(f2b))
    return slab.astype(jnp.bfloat16)


# ------------------------------ wrapper --------------------------------------
def adain_style_nerf_forward(params, ray_positions, ray_origins, ray_directions, style):
    """Mirrors AdaInStyleNerfModel.forward.

    ray_origins / ray_directions are accepted for interface fidelity but (as in
    the PyTorch module) never enter the network computation.
    """
    del ray_origins, ray_directions
    leading = ray_positions.shape[:-1]
    pos = ray_positions.reshape(-1, 3).astype(jnp.float32)
    sty = style.reshape(-1, STYLE_FEATURES).astype(jnp.float32)
    n = pos.shape[0]

    # Pad points to a multiple of P and lane-pack P points per row.
    n_pts = _align(max(n, P), P)
    if n_pts != n:
        pos = jnp.pad(pos, ((0, n_pts - n), (0, 0)))
        sty = jnp.pad(sty, ((0, n_pts - n), (0, 0)))
    n_rows = n_pts // P
    pos_p = pos.reshape(n_rows, 3 * P)
    sty_p = sty.reshape(n_rows, STYLE_FEATURES * P)

    # Tile selection: large tiles; even grid (>= 2 blocks) when possible for v7x.
    tile_rows = min(MAX_TILE_ROWS, _align(n_rows, 8))
    grid = pl.cdiv(n_rows, tile_rows)
    if grid > 1:
        grid = 2 * ((grid + 1) // 2)
        tile_rows = _align(pl.cdiv(n_rows, grid), 8)
    n_rows_pad = grid * tile_rows
    if n_rows_pad != n_rows:
        pos_p = jnp.pad(pos_p, ((0, n_rows_pad - n_rows), (0, 0)))
        sty_p = jnp.pad(sty_p, ((0, n_rows_pad - n_rows), (0, 0)))

    slab = pack_params(params)
    kernel = make_kernel(SLAB_LAYOUT)

    out = pl.pallas_call(
        kernel,
        out_shape=jax.ShapeDtypeStruct((n_rows_pad, OUT_COLS), jnp.float32),
        grid_spec=pltpu.PrefetchScalarGridSpec(
            num_scalar_prefetch=0,
            grid=(grid,),
            in_specs=[
                pl.BlockSpec((tile_rows, 3 * P), lambda i: (i, 0)),              # pos
                pl.BlockSpec((tile_rows, STYLE_FEATURES * P), lambda i: (i, 0)),  # style
                pl.BlockSpec((SLAB_ROWS, SLAB_COLS), lambda i: (0, 0)),           # weights
            ],
            out_specs=pl.BlockSpec((tile_rows, OUT_COLS), lambda i: (i, 0)),
        ),
        compiler_params=pltpu.CompilerParams(
            dimension_semantics=("parallel",),
            vmem_limit_bytes=48 * 1024 * 1024),
    )(pos_p, sty_p, slab)

    feats = out[:, 0:OUT_FEATS].reshape(-1, OUTPUT_FEATURES)[:n]
    alphas = out[:, OUT_FEATS:OUT_COLS].reshape(-1)[:n]
    output_features = feats.reshape(leading + (OUTPUT_FEATURES,))
    output_alphas = alphas.reshape(leading)                    # squeeze(-1)
    extra_outputs = {}
    return output_features, output_alphas, extra_outputs


# -------------------------- pure-JAX reference -------------------------------
def reference_forward(params, ray_positions, style):
    def q(a):   # same bf16 weight rounding the kernel applies
        return jnp.asarray(a, jnp.float32).astype(jnp.bfloat16).astype(jnp.float32)

    pos = ray_positions.reshape(-1, 3).astype(jnp.float32)
    sty = style.reshape(-1, STYLE_FEATURES).astype(jnp.float32)
    lo = jnp.array([b[0] for b in BBOX], jnp.float32)[None, :]
    hi = jnp.array([b[1] for b in BBOX], jnp.float32)[None, :]
    inv = 1.0 / (hi - lo)

    mask = jnp.all(jnp.logical_and(pos >= lo, pos <= hi), axis=-1, keepdims=True)

    p = pos * inv
    p_rep = jnp.concatenate([p * (2.0 ** o) for o in range(OCTAVES)], axis=-1)
    parts = ([p] if APPEND_ORIGINAL else []) + [jnp.sin(p_rep), jnp.cos(p_rep)]
    enc = jnp.concatenate(parts, axis=-1)

    h = enc
    for li, (w, b) in enumerate(params["backbone"]):
        if li == SKIP_LAYER_IDX:
            h = jnp.concatenate([h, enc], axis=-1)
        h = jnp.maximum(h @ q(w) + q(b), 0.0)

    wa, ba = params["alpha"]
    alpha = h @ q(wa) + q(ba)

    (s1w, s1b), (b1w, b1b) = params["adain1"]
    (s2w, s2b), (b2w, b2b) = params["adain2"]
    f = h @ q(params["f0"])
    f = jnp.maximum(f * (sty @ q(s1w) + q(s1b)) + (sty @ q(b1w) + q(b1b)), 0.0)
    f = f @ q(params["f1"])
    f = jnp.maximum(f * (sty @ q(s2w) + q(s2b)) + (sty @ q(b2w) + q(b2b)), 0.0)
    f2w, f2b = params["f2"]
    feats = f @ q(f2w) + q(f2b)

    feats = jnp.where(mask, feats, 0.0)
    alpha = jnp.where(mask, alpha, EMPTY_SPACE_ALPHA)
    leading = ray_positions.shape[:-1]
    return feats.reshape(leading + (OUTPUT_FEATURES,)), alpha.reshape(leading)


# --------------------------------- main --------------------------------------
if __name__ == "__main__":
    key = jax.random.PRNGKey(0)
    k_par, k_pos, k_org, k_dir, k_sty = jax.random.split(key, 5)

    params = init_params(k_par)

    B, S = 2, 128   # leading shape (2, 128) -> 256 flattened elements
    ray_positions = jax.random.uniform(k_pos, (B, S, 3), jnp.float32, -1.5, 1.5)
    ray_origins = jax.random.uniform(k_org, (B, S, 3), jnp.float32, -1.0, 1.0)
    ray_directions = jax.random.uniform(k_dir, (B, S, 3), jnp.float32, -1.0, 1.0)
    style = jax.random.normal(k_sty, (B, S, STYLE_FEATURES), jnp.float32)

    feats, alphas, extras = adain_style_nerf_forward(
        params, ray_positions, ray_origins, ray_directions, style)
    feats = jax.block_until_ready(feats)
    alphas = jax.block_until_ready(alphas)

    ref_feats, ref_alphas = reference_forward(params, ray_positions, style)
    if not (jnp.allclose(feats, ref_feats, rtol=2e-2, atol=2e-2)
            and jnp.allclose(alphas, ref_alphas, rtol=2e-2, atol=2e-2)):
        raise AssertionError("Pallas kernel output mismatch vs JAX reference")

    print("KERNEL_OK")
</pallas_src>

<mosaic_0001>
module attributes {stable_mosaic.version = 11 : i64} {
  func.func @kernel(%arg0: i32, %arg1: memref<64x12xf32, #tpu.memory_space<vmem>>, %arg2: memref<64x32xf32, #tpu.memory_space<vmem>>, %arg3: memref<736x384xbf16, #tpu.memory_space<vmem>>, %arg4: memref<64x20xf32, #tpu.memory_space<vmem>>) attributes {dimension_semantics = [#tpu.dimension_semantics<parallel>], iteration_bounds = array<i64: 1>, scalar_prefetch = 0 : i64, scratch_operands = 0 : i64, tpu.core_type = #tpu.core_type<tc>, window_params = [{transform_indices = @transform_0, window_bounds = array<i64: 64, 12>}, {transform_indices = @transform_1, window_bounds = array<i64: 64, 32>}, {pipeline_mode = #tpu.pipeline_mode<synchronous>, transform_indices = @transform_2, window_bounds = array<i64: 736, 384>}, {transform_indices = @transform_3, window_bounds = array<i64: 64, 20>}]} {
    %c0 = arith.constant 0 : index
    %c0_0 = arith.constant 0 : index
    %0 = vector.load %arg1[%c0, %c0_0] : memref<64x12xf32, #tpu.memory_space<vmem>>, vector<64x12xf32>
    %c0_1 = arith.constant 0 : index
    %c0_2 = arith.constant 0 : index
    %1 = vector.load %arg2[%c0_1, %c0_2] : memref<64x32xf32, #tpu.memory_space<vmem>>, vector<64x32xf32>
    %2 = arith.truncf %1 : vector<64x32xf32> to vector<64x32xbf16>
    %cst = arith.constant 5.000000e-01 : f32
    %3 = vector.broadcast %cst : f32 to vector<64x12xf32>
    %4 = arith.mulf %0, %3 : vector<64x12xf32>
    %5 = math.sin %4 : vector<64x12xf32>
    %6 = math.cos %4 : vector<64x12xf32>
    %cst_3 = arith.constant 2.000000e+00 : f32
    %7 = vector.broadcast %cst_3 : f32 to vector<64x12xf32>
    %8 = arith.mulf %7, %5 : vector<64x12xf32>
    %9 = arith.mulf %8, %6 : vector<64x12xf32>
    %cst_4 = arith.constant 2.000000e+00 : f32
    %10 = vector.broadcast %cst_4 : f32 to vector<64x12xf32>
    %11 = arith.mulf %10, %5 : vector<64x12xf32>
    %12 = arith.mulf %11, %5 : vector<64x12xf32>
    %cst_5 = arith.constant 1.000000e+00 : f32
    %13 = vector.broadcast %cst_5 : f32 to vector<64x12xf32>
    %14 = arith.subf %13, %12 : vector<64x12xf32>
    %cst_6 = arith.constant 2.000000e+00 : f32
    %15 = vector.broadcast %cst_6 : f32 to vector<64x12xf32>
    %16 = arith.mulf %15, %9 : vector<64x12xf32>
    %17 = arith.mulf %16, %14 : vector<64x12xf32>
    %cst_7 = arith.constant 2.000000e+00 : f32
    %18 = vector.broadcast %cst_7 : f32 to vector<64x12xf32>
    %19 = arith.mulf %18, %9 : vector<64x12xf32>
    %20 = arith.mulf %19, %9 : vector<64x12xf32>
    %cst_8 = arith.constant 1.000000e+00 : f32
    %21 = vector.broadcast %cst_8 : f32 to vector<64x12xf32>
    %22 = arith.subf %21, %20 : vector<64x12xf32>
    %cst_9 = arith.constant 2.000000e+00 : f32
    %23 = vector.broadcast %cst_9 : f32 to vector<64x12xf32>
    %24 = arith.mulf %23, %17 : vector<64x12xf32>
    %25 = arith.mulf %24, %22 : vector<64x12xf32>
    %cst_10 = arith.constant 2.000000e+00 : f32
    %26 = vector.broadcast %cst_10 : f32 to vector<64x12xf32>
    %27 = arith.mulf %26, %17 : vector<64x12xf32>
    %28 = arith.mulf %27, %17 : vector<64x12xf32>
    %cst_11 = arith.constant 1.000000e+00 : f32
    %29 = vector.broadcast %cst_11 : f32 to vector<64x12xf32>
    %30 = arith.subf %29, %28 : vector<64x12xf32>
    %cst_12 = arith.constant 0.000000e+00 : f32
    %31 = vector.broadcast %cst_12 : f32 to vector<64x4xf32>
    %32 = tpu.concatenate %4, %5, %9, %17, %25, %6, %14, %22, %30, %31 in 1 : vector<64x12xf32>, vector<64x12xf32>, vector<64x12xf32>, vector<64x12xf32>, vector<64x12xf32>, vector<64x12xf32>, vector<64x12xf32>, vector<64x12xf32>, vector<64x12xf32>, vector<64x4xf32> -> vector<64x112xf32>
    %33 = arith.truncf %32 : vector<64x112xf32> to vector<64x112xbf16>
    %c0_13 = arith.constant 0 : index
    %c0_14 = arith.constant 0 : index
    %34 = vector.load %arg3[%c0_13, %c0_14] : memref<736x384xbf16, #tpu.memory_space<vmem>>, vector<112x256xbf16>
    %cst_15 = arith.constant dense<0.000000e+00> : vector<64x256xf32>
    %35 = tpu.matmul %33, %34, %cst_15 {dimension_numbers = #tpu.dot_dimension_numbers<[1], [0], [0], [1], [0, 0, 1, 1], [], []>} : vector<64x112xbf16>, vector<112x256xbf16>, vector<64x256xf32> -> vector<64x256xf32>
    %36 = vector.extract_strided_slice %35 {offsets = [0, 0], sizes = [64, 128], strides = [1, 1]} : vector<64x256xf32> to vector<64x128xf32>
    %c720 = arith.constant 720 : index
    %c0_16 = arith.constant 0 : index
    %37 = vector.load %arg3[%c720, %c0_16] : memref<736x384xbf16, #tpu.memory_space<vmem>>, vector<1x128xbf16>
    %38 = arith.extf %37 : vector<1x128xbf16> to vector<1x128xf32>
    %39 = vector.broadcast %38 : vector<1x128xf32> to vector<64x128xf32>
    %40 = arith.addf %36, %39 : vector<64x128xf32>
    %cst_17 = arith.constant 0.000000e+00 : f32
    %41 = vector.broadcast %cst_17 : f32 to vector<64x128xf32>
    %42 = arith.maximumf %40, %41 : vector<64x128xf32>
    %43 = vector.extract_strided_slice %35 {offsets = [0, 128], sizes = [64, 128], strides = [1, 1]} : vector<64x256xf32> to vector<64x128xf32>
    %44 = arith.truncf %42 : vector<64x128xf32> to vector<64x128xbf16>
    %c112 = arith.constant 112 : index
    %c0_18 = arith.constant 0 : index
    %45 = vector.load %arg3[%c112, %c0_18] : memref<736x384xbf16, #tpu.memory_space<vmem>>, vector<128x128xbf16>
    %cst_19 = arith.constant dense<0.000000e+00> : vector<64x128xf32>
    %46 = tpu.matmul %44, %45, %cst_19 {dimension_numbers = #tpu.dot_dimension_numbers<[1], [0], [0], [1], [0, 0, 1, 1], [], []>} : vector<64x128xbf16>, vector<128x128xbf16>, vector<64x128xf32> -> vector<64x128xf32>
    %47 = arith.addf %46, %43 : vector<64x128xf32>
    %c721 = arith.constant 721 : index
    %c0_20 = arith.constant 0 : index
    %48 = vector.load %arg3[%c721, %c0_20] : memref<736x384xbf16, #tpu.memory_space<vmem>>, vector<1x128xbf16>
    %49 = arith.extf %48 : vector<1x128xbf16> to vector<1x128xf32>
    %50 = vector.broadcast %49 : vector<1x128xf32> to vector<64x128xf32>
    %51 = arith.addf %47, %50 : vector<64x128xf32>
    %cst_21 = arith.constant 0.000000e+00 : f32
    %52 = vector.broadcast %cst_21 : f32 to vector<64x128xf32>
    %53 = arith.maximumf %51, %52 : vector<64x128xf32>
    %54 = arith.truncf %53 : vector<64x128xf32> to vector<64x128xbf16>
    %c240 = arith.constant 240 : index
    %c0_22 = arith.constant 0 : index
    %55 = vector.load %arg3[%c240, %c0_22] : memref<736x384xbf16, #tpu.memory_space<vmem>>, vector<128x128xbf16>
    %cst_23 = arith.constant dense<0.000000e+00> : vector<64x128xf32>
    %56 = tpu.matmul %54, %55, %cst_23 {dimension_numbers = #tpu.dot_dimension_numbers<[1], [0], [0], [1], [0, 0, 1, 1], [], []>} : vector<64x128xbf16>, vector<128x128xbf16>, vector<64x128xf32> -> vector<64x128xf32>
    %c722 = arith.constant 722 : index
    %c0_24 = arith.constant 0 : index
    %57 = vector.load %arg3[%c722, %c0_24] : memref<736x384xbf16, #tpu.memory_space<vmem>>, vector<1x128xbf16>
    %58 = arith.extf %57 : vector<1x128xbf16> to vector<1x128xf32>
    %59 = vector.broadcast %58 : vector<1x128xf32> to vector<64x128xf32>
    %60 = arith.addf %56, %59 : vector<64x128xf32>
    %cst_25 = arith.constant 0.000000e+00 : f32
    %61 = vector.broadcast %cst_25 : f32 to vector<64x128xf32>
    %62 = arith.maximumf %60, %61 : vector<64x128xf32>
    %63 = arith.truncf %62 : vector<64x128xf32> to vector<64x128xbf16>
    %c368 = arith.constant 368 : index
    %c0_26 = arith.constant 0 : index
    %64 = vector.load %arg3[%c368, %c0_26] : memref<736x384xbf16, #tpu.memory_space<vmem>>, vector<128x132xbf16>
    %cst_27 = arith.constant dense<0.000000e+00> : vector<64x132xf32>
    %65 = tpu.matmul %63, %64, %cst_27 {dimension_numbers = #tpu.dot_dimension_numbers<[1], [0], [0], [1], [0, 0, 1, 1], [], []>} : vector<64x128xbf16>, vector<128x132xbf16>, vector<64x132xf32> -> vector<64x132xf32>
    %c723 = arith.constant 723 : index
    %c0_28 = arith.constant 0 : index
    %66 = vector.load %arg3[%c723, %c0_28] : memref<736x384xbf16, #tpu.memory_space<vmem>>, vector<1x132xbf16>
    %67 = arith.extf %66 : vector<1x132xbf16> to vector<1x132xf32>
    %68 = vector.broadcast %67 : vector<1x132xf32> to vector<64x132xf32>
    %69 = arith.addf %65, %68 : vector<64x132xf32>
    %70 = vector.extract_strided_slice %69 {offsets = [0, 0], sizes = [64, 128], strides = [1, 1]} : vector<64x132xf32> to vector<64x128xf32>
    %71 = vector.extract_strided_slice %69 {offsets = [0, 128], sizes = [64, 4], strides = [1, 1]} : vector<64x132xf32> to vector<64x4xf32>
    %c496 = arith.constant 496 : index
    %c0_29 = arith.constant 0 : index
    %72 = vector.load %arg3[%c496, %c0_29] : memref<736x384xbf16, #tpu.memory_space<vmem>>, vector<32x384xbf16>
    %cst_30 = arith.constant dense<0.000000e+00> : vector<64x384xf32>
    %73 = tpu.matmul %2, %72, %cst_30 {dimension_numbers = #tpu.dot_dimension_numbers<[1], [0], [0], [1], [0, 0, 1, 1], [], []>} : vector<64x32xbf16>, vector<32x384xbf16>, vector<64x384xf32> -> vector<64x384xf32>
    %c724 = arith.constant 724 : index
    %c0_31 = arith.constant 0 : index
    %74 = vector.load %arg3[%c724, %c0_31] : memref<736x384xbf16, #tpu.memory_space<vmem>>, vector<1x384xbf16>
    %75 = arith.extf %74 : vector<1x384xbf16> to vector<1x384xf32>
    %76 = vector.broadcast %75 : vector<1x384xf32> to vector<64x384xf32>
    %77 = arith.addf %73, %76 : vector<64x384xf32>
    %78 = vector.extract_strided_slice %77 {offsets = [0, 0], sizes = [64, 128], strides = [1, 1]} : vector<64x384xf32> to vector<64x128xf32>
    %79 = arith.mulf %70, %78 : vector<64x128xf32>
    %80 = vector.extract_strided_slice %77 {offsets = [0, 128], sizes = [64, 128], strides = [1, 1]} : vector<64x384xf32> to vector<64x128xf32>
    %81 = arith.addf %79, %80 : vector<64x128xf32>
    %cst_32 = arith.constant 0.000000e+00 : f32
    %82 = vector.broadcast %cst_32 : f32 to vector<64x128xf32>
    %83 = arith.maximumf %81, %82 : vector<64x128xf32>
    %84 = arith.truncf %83 : vector<64x128xf32> to vector<64x128xbf16>
    %c528 = arith.constant 528 : index
    %c0_33 = arith.constant 0 : index
    %85 = vector.load %arg3[%c528, %c0_33] : memref<736x384xbf16, #tpu.memory_space<vmem>>, vector<128x64xbf16>
    %cst_34 = arith.constant dense<0.000000e+00> : vector<64x64xf32>
    %86 = tpu.matmul %84, %85, %cst_34 {dimension_numbers = #tpu.dot_dimension_numbers<[1], [0], [0], [1], [0, 0, 1, 1], [], []>} : vector<64x128xbf16>, vector<128x64xbf16>, vector<64x64xf32> -> vector<64x64xf32>
    %87 = vector.extract_strided_slice %77 {offsets = [0, 256], sizes = [64, 64], strides = [1, 1]} : vector<64x384xf32> to vector<64x64xf32>
    %88 = arith.mulf %86, %87 : vector<64x64xf32>
    %89 = vector.extract_strided_slice %77 {offsets = [0, 320], sizes = [64, 64], strides = [1, 1]} : vector<64x384xf32> to vector<64x64xf32>
    %90 = arith.addf %88, %89 : vector<64x64xf32>
    %cst_35 = arith.constant 0.000000e+00 : f32
    %91 = vector.broadcast %cst_35 : f32 to vector<64x64xf32>
    %92 = arith.maximumf %90, %91 : vector<64x64xf32>
    %93 = arith.truncf %92 : vector<64x64xf32> to vector<64x64xbf16>
    %c656 = arith.constant 656 : index
    %c0_36 = arith.constant 0 : index
    %94 = vector.load %arg3[%c656, %c0_36] : memref<736x384xbf16, #tpu.memory_space<vmem>>, vector<64x16xbf16>
    %cst_37 = arith.constant dense<0.000000e+00> : vector<64x16xf32>
    %95 = tpu.matmul %93, %94, %cst_37 {dimension_numbers = #tpu.dot_dimension_numbers<[1], [0], [0], [1], [0, 0, 1, 1], [], []>} : vector<64x64xbf16>, vector<64x16xbf16>, vector<64x16xf32> -> vector<64x16xf32>
    %c725 = arith.constant 725 : index
    %c0_38 = arith.constant 0 : index
    %96 = vector.load %arg3[%c725, %c0_38] : memref<736x384xbf16, #tpu.memory_space<vmem>>, vector<1x16xbf16>
    %97 = arith.extf %96 : vector<1x16xbf16> to vector<1x16xf32>
    %98 = vector.broadcast %97 : vector<1x16xf32> to vector<64x16xf32>
    %99 = arith.addf %95, %98 : vector<64x16xf32>
    %cst_39 = arith.constant -1.000000e+00 : f32
    %100 = vector.broadcast %cst_39 : f32 to vector<64x12xf32>
    %101 = arith.cmpf oge, %0, %100 : vector<64x12xf32>
    %cst_40 = arith.constant 1.000000e+00 : f32
    %102 = vector.broadcast %cst_40 : f32 to vector<64x12xf32>
    %103 = arith.cmpf ole, %0, %102 : vector<64x12xf32>
    %104 = arith.andi %101, %103 : vector<64x12xi1>
    %105 = vector.extract_strided_slice %104 {offsets = [0, 0], sizes = [64, 1], strides = [1, 1]} : vector<64x12xi1> to vector<64x1xi1>
    %106 = vector.extract_strided_slice %104 {offsets = [0, 1], sizes = [64, 1], strides = [1, 1]} : vector<64x12xi1> to vector<64x1xi1>
    %107 = arith.andi %105, %106 : vector<64x1xi1>
    %108 = vector.extract_strided_slice %104 {offsets = [0, 2], sizes = [64, 1], strides = [1, 1]} : vector<64x12xi1> to vector<64x1xi1>
    %109 = arith.andi %107, %108 : vector<64x1xi1>
    %110 = vector.extract_strided_slice %99 {offsets = [0, 0], sizes = [64, 4], strides = [1, 1]} : vector<64x16xf32> to vector<64x4xf32>
    %cst_41 = arith.constant 0.000000e+00 : f32
    %111 = vector.shape_cast %109 : vector<64x1xi1> to vector<64x1xi1>
    %112 = vector.broadcast %111 : vector<64x1xi1> to vector<64x4xi1>
    %113 = vector.broadcast %cst_41 : f32 to vector<64x4xf32>
    %114 = arith.select %112, %110, %113 : vector<64x4xi1>, vector<64x4xf32>
    %115 = vector.extract_strided_slice %71 {offsets = [0, 0], sizes = [64, 1], strides = [1, 1]} : vector<64x4xf32> to vector<64x1xf32>
    %cst_42 = arith.constant -1.000000e+01 : f32
    %116 = vector.broadcast %cst_42 : f32 to vector<64x1xf32>
    %117 = arith.select %109, %115, %116 : vector<64x1xi1>, vector<64x1xf32>
    %118 = vector.extract_strided_slice %104 {offsets = [0, 3], sizes = [64, 1], strides = [1, 1]} : vector<64x12xi1> to vector<64x1xi1>
    %119 = vector.extract_strided_slice %104 {offsets = [0, 4], sizes = [64, 1], strides = [1, 1]} : vector<64x12xi1> to vector<64x1xi1>
    %120 = arith.andi %118, %119 : vector<64x1xi1>
    %121 = vector.extract_strided_slice %104 {offsets = [0, 5], sizes = [64, 1], strides = [1, 1]} : vector<64x12xi1> to vector<64x1xi1>
    %122 = arith.andi %120, %121 : vector<64x1xi1>
    %123 = vector.extract_strided_slice %99 {offsets = [0, 4], sizes = [64, 4], strides = [1, 1]} : vector<64x16xf32> to vector<64x4xf32>
    %cst_43 = arith.constant 0.000000e+00 : f32
    %124 = vector.shape_cast %122 : vector<64x1xi1> to vector<64x1xi1>
    %125 = vector.broadcast %124 : vector<64x1xi1> to vector<64x4xi1>
    %126 = vector.broadcast %cst_43 : f32 to vector<64x4xf32>
    %127 = arith.select %125, %123, %126 : vector<64x4xi1>, vector<64x4xf32>
    %128 = vector.extract_strided_slice %71 {offsets = [0, 1], sizes = [64, 1], strides = [1, 1]} : vector<64x4xf32> to vector<64x1xf32>
    %cst_44 = arith.constant -1.000000e+01 : f32
    %129 = vector.broadcast %cst_44 : f32 to vector<64x1xf32>
    %130 = arith.select %122, %128, %129 : vector<64x1xi1>, vector<64x1xf32>
    %131 = vector.extract_strided_slice %104 {offsets = [0, 6], sizes = [64, 1], strides = [1, 1]} : vector<64x12xi1> to vector<64x1xi1>
    %132 = vector.extract_strided_slice %104 {offsets = [0, 7], sizes = [64, 1], strides = [1, 1]} : vector<64x12xi1> to vector<64x1xi1>
    %133 = arith.andi %131, %132 : vector<64x1xi1>
    %134 = vector.extract_strided_slice %104 {offsets = [0, 8], sizes = [64, 1], strides = [1, 1]} : vector<64x12xi1> to vector<64x1xi1>
    %135 = arith.andi %133, %134 : vector<64x1xi1>
    %136 = vector.extract_strided_slice %99 {offsets = [0, 8], sizes = [64, 4], strides = [1, 1]} : vector<64x16xf32> to vector<64x4xf32>
    %cst_45 = arith.constant 0.000000e+00 : f32
    %137 = vector.shape_cast %135 : vector<64x1xi1> to vector<64x1xi1>
    %138 = vector.broadcast %137 : vector<64x1xi1> to vector<64x4xi1>
    %139 = vector.broadcast %cst_45 : f32 to vector<64x4xf32>
    %140 = arith.select %138, %136, %139 : vector<64x4xi1>, vector<64x4xf32>
    %141 = vector.extract_strided_slice %71 {offsets = [0, 2], sizes = [64, 1], strides = [1, 1]} : vector<64x4xf32> to vector<64x1xf32>
    %cst_46 = arith.constant -1.000000e+01 : f32
    %142 = vector.broadcast %cst_46 : f32 to vector<64x1xf32>
    %143 = arith.select %135, %141, %142 : vector<64x1xi1>, vector<64x1xf32>
    %144 = vector.extract_strided_slice %104 {offsets = [0, 9], sizes = [64, 1], strides = [1, 1]} : vector<64x12xi1> to vector<64x1xi1>
    %145 = vector.extract_strided_slice %104 {offsets = [0, 10], sizes = [64, 1], strides = [1, 1]} : vector<64x12xi1> to vector<64x1xi1>
    %146 = arith.andi %144, %145 : vector<64x1xi1>
    %147 = vector.extract_strided_slice %104 {offsets = [0, 11], sizes = [64, 1], strides = [1, 1]} : vector<64x12xi1> to vector<64x1xi1>
    %148 = arith.andi %146, %147 : vector<64x1xi1>
    %149 = vector.extract_strided_slice %99 {offsets = [0, 12], sizes = [64, 4], strides = [1, 1]} : vector<64x16xf32> to vector<64x4xf32>
    %cst_47 = arith.constant 0.000000e+00 : f32
    %150 = vector.shape_cast %148 : vector<64x1xi1> to vector<64x1xi1>
    %151 = vector.broadcast %150 : vector<64x1xi1> to vector<64x4xi1>
    %152 = vector.broadcast %cst_47 : f32 to vector<64x4xf32>
    %153 = arith.select %151, %149, %152 : vector<64x4xi1>, vector<64x4xf32>
    %154 = vector.extract_strided_slice %71 {offsets = [0, 3], sizes = [64, 1], strides = [1, 1]} : vector<64x4xf32> to vector<64x1xf32>
    %cst_48 = arith.constant -1.000000e+01 : f32
    %155 = vector.broadcast %cst_48 : f32 to vector<64x1xf32>
    %156 = arith.select %148, %154, %155 : vector<64x1xi1>, vector<64x1xf32>
    %157 = tpu.concatenate %114, %127, %140, %153 in 1 : vector<64x4xf32>, vector<64x4xf32>, vector<64x4xf32>, vector<64x4xf32> -> vector<64x16xf32>
    %c0_49 = arith.constant 0 : index
    %c0_50 = arith.constant 0 : index
    %158 = vector.load %arg4[%c0_49, %c0_50] : memref<64x20xf32, #tpu.memory_space<vmem>>, vector<64x16xf32>
    tpu.vector_store %arg4[%c0_49, %c0_50], %157 {strides = array<i32>} : memref<64x20xf32, #tpu.memory_space<vmem>>, vector<64x16xf32>,
    %159 = tpu.concatenate %117, %130, %143, %156 in 1 : vector<64x1xf32>, vector<64x1xf32>, vector<64x1xf32>, vector<64x1xf32> -> vector<64x4xf32>
    %c0_51 = arith.constant 0 : index
    %c16 = arith.constant 16 : index
    %160 = vector.load %arg4[%c0_51, %c16] : memref<64x20xf32, #tpu.memory_space<vmem>>, vector<64x4xf32>
    tpu.vector_store %arg4[%c0_51, %c16], %159 {strides = array<i32>} : memref<64x20xf32, #tpu.memory_space<vmem>>, vector<64x4xf32>,
    return
  }
  func.func @transform_0(%arg0: i32) -> (i32, i32) {
    %c0_i32 = arith.constant 0 : i32
    %c0_i32_0 = arith.constant 0 : i32
    return %arg0, %c0_i32 : i32, i32
  }
  func.func @transform_1(%arg0: i32) -> (i32, i32) {
    %c0_i32 = arith.constant 0 : i32
    %c0_i32_0 = arith.constant 0 : i32
    return %arg0, %c0_i32 : i32, i32
  }
  func.func @transform_2(%arg0: i32) -> (i32, i32) {
    %c0_i32 = arith.constant 0 : i32
    %c0_i32_0 = arith.constant 0 : i32
    %c0_i32_1 = arith.constant 0 : i32
    return %c0_i32, %c0_i32_0 : i32, i32
  }
  func.func @transform_3(%arg0: i32) -> (i32, i32) {
    %c0_i32 = arith.constant 0 : i32
    %c0_i32_0 = arith.constant 0 : i32
    return %arg0, %c0_i32 : i32, i32
  }
}

</mosaic_0001>

<bundles_post_ra>
// kernel: tpu_custom_call.1
= control target key start
LH: loop header
LB: loop body
LE: loop exit
PB: predicated region body
PF: predicated region fallthrough
CT: control target
= control target key end

     0   :  { %8 = vsyncpa [#allocation3], 0  ;;  %s4615_s12 = smov [#allocation2]   ;;  %s6742_s0 = inlined_call_operand.vmem [shape: f32[64,12], index: 0, kind: input, shape index: {}]   ;;  %s6743_s1 = inlined_call_operand.vmem [shape: f32[64,32], index: 1, kind: input, shape index: {}]   ;;  %s6744_s2 = inlined_call_operand.hbm [shape: bf16[736,384], index: 2, kind: input, shape index: {}]   ;;  %s6745_s3 = inlined_call_operand.vmem [shape: f32[64,20], index: 3, kind: output, shape index: {}]  }
   0x1   :  { %s18_s13 = sshll.u32 %s4615_s12, 4  ;;  %s4591_s16 = scalar_lea.hbm %s6744_s2, 17664  ;;  %s19_s13 = int_to_ptr.vmem [resolvable:$true] %s18_s13 }
   0x2   :  { %p4592_p0 = scmp.ne.s32.totalorder %s6744_s2, %s4591_s16  ;;  %p4595_p1 = scmp.lt.u32.totalorder %s4591_s16, %s6744_s2 }
   0x4   :  { %p4597_p2 = pnand %p4595_p1, %p4592_p0 }
   0x6   :  { %4600 = shalt.err (!%p4597_p2)
}
   0x7   :  { %s4601_s21 = scalar_lea.vmem %s19_s13, 17664  ;;  %p4606_p4 = scmp.lt.s32.totalorder %s19_s13, %s19_s13 }
   0x8   :  { %p4602_p3 = scmp.ne.s32.totalorder %s19_s13, %s4601_s21  ;;  %p4607_p5 = scmp.lt.s32.totalorder %s4601_s21, %s4601_s21 }
   0xa   :  { %p4608_p6 = por %p4607_p5, %p4606_p4 }
   0xc   :  { %p4609_p7 = pnand %p4608_p6, %p4602_p3 }
   0xe   :  { %4612 = shalt.err (!%p4609_p7)
}
   0xf   :  { %s4616_s22 = smov 192   ;;  %s4617_s23 = smov 12  }
  0x10   :  { %24 = dma.hbm_to_vmem [thread:$0]  %s6744_s2, 17664, %s19_s13, [#allocation3], %s4616_s22, %s4616_s22, %s4617_s23  }
  0x11   :  { %4613 = dma.done.wait [#allocation3], 17664  }
  0x12   :  { %4614 = vsyncadd [#allocation3], 4294949632  ;;  %v29_v0 = vld [vmem:[%s6742_s0] sm:$0xff]  ;;  %v30_v1 = vld [vmem:[%s6742_s0 + $0x8] sm:$0xff]  ;;  %v6760_v37 = vmov 683565275  }
  0x13   :  { %v31_v2 = vld [vmem:[%s6742_s0 + $0x10] sm:$0xff]  ;;  %v4686_v3 = vmul.f32 0.5, %v29_v0  ;;  %v4688_v4 = vmul.f32 0.5, %v30_v1  ;;  %v32_v16 = vld [vmem:[%s6742_s0 + $0x18] sm:$0xff]  ;;  %v6755_v39 = vmov 2475754826  }
  0x14   :  { %v4690_v5 = vmul.f32 0.5, %v31_v2  ;;  %v4705_v24 = vmul.f32 0.5, %v32_v16  ;;  %v6751_v41 = vmov 2131351028   ;;  %v6753_v43 = vmov 2102212464  }
  0x15   :  { %v57_v6 = vand.u32 2147483647, %v4686_v3  ;;  %v60_v7 = vand.u32 2139095040, %v4686_v3  ;;  %v161_v8 = vand.u32 2147483647, %v4688_v4  ;;  %v164_v9 = vand.u32 2139095040, %v4688_v4 }
  0x16   :  { %6770 = vst [vmem:[#allocation5_spill] sm:$0xff] %v4690_v5  ;;  %v268_v14 = vand.u32 2139095040, %v4690_v5  ;;  %v265_v18 = vand.u32 2147483647, %v4690_v5  ;;  %6771 = vst [vmem:[#allocation6_spill] sm:$0xff] %v4705_v24  ;;  %v372_v35 = vand.u32 2139095040, %v4705_v24 }
  0x17   :  { %v61_v10 = vshrl.u32 %v60_v7, 23  ;;  %v64_v11 = vand.u32 8388607, %v57_v6  ;;  %v165_v12 = vshrl.u32 %v164_v9, 23  ;;  %v168_v13 = vand.u32 8388607, %v161_v8 }
  0x18   :  { %v269_v19 = vshrl.u32 %v268_v14, 23  ;;  %v4709_v27 = vand.u32 8388607, %v265_v18  ;;  %v6758_v45 = vmov 920167782   ;;  %vm59_vm13 = vcmp.lt.s32.totalorder %v4686_v3, 0 }
  0x19   :  { %v3947_v15 = vadd.s32 4294967169, %v61_v10  ;;  %v3951_v17 = vadd.s32 4294967169, %v165_v12  ;;  %v65_v20 = vor.u32 8388608, %v64_v11  ;;  %v169_v22 = vor.u32 8388608, %v168_v13  ;;  %s4624_s8 = smov 60   ;;  %s4625_s11 = smov 24  }
  0x1a   :  { %v3955_v25 = vadd.s32 4294967169, %v269_v19  ;;  %v6757_v53 = vmov 1326507024   ;;  %vm4819_vm14 = vcmp.le.f32.partialorder %v57_v6, 0.7853982  ;;  %s4626_s16 = smov 72  }
  0x1b   :  { %v67_v21 = vadd.s32 1, %v3947_v15  ;;  %v171_v23 = vadd.s32 1, %v3951_v17  ;;  %v4711_v30 = vshll.u32 %v65_v20, 8  ;;  %v4713_v33 = vshll.u32 %v169_v22, 8  ;;  %s4627_s17 = smov 36   ;;  %s4628_s18 = smov 84  }
  0x1c   :  { %v4715_v34 = vadd.s32 1, %v3955_v25  ;;  %s4629_s19 = smov 48   ;;  %s4630_s20 = smov 96  }
  0x1d   :  { %vm68_vm0 = vcmp.gt.s32.totalorder %v67_v21, 0  ;;  %vm172_vm1 = vcmp.gt.s32.totalorder %v171_v23, 0  ;;  %s4632_s12 = smov 127   ;;  %s4633_s13 = smov 64  }
  0x1e   :  { %v69_v26 = vsel %vm68_vm0, %v67_v21, 0  ;;  %v173_v31 = vsel %vm172_vm1, %v171_v23, 0  ;;  %vm276_vm6 = vcmp.gt.s32.totalorder %v4715_v34, 0  ;;  %vm163_vm0 = vcmp.lt.s32.totalorder %v4688_v4, 0  ;;  %s4636_s26 = smov 2   ;;  %s4638_s27 = smov 4  }
  0x1f   :  { %v70_v28 = vshrl.u32 %v69_v26, 5  ;;  %v71_v29 = vand.u32 31, %v69_v26  ;;  %v175_v32 = vand.u32 31, %v173_v31  ;;  %v4723_v47 = vshrl.u32 %v173_v31, 5  ;;  %s4639_s28 = smov 6   ;;  %s4640_s29 = smov 124  }
  0x20   :  { %s4641_s30 = smov 122   ;;  %s4643_s4 = smov 16  }
  0x21   :  { %v72_v36 = vsub.s32 32, %v71_v29  ;;  %v74_v38 = vshll.u32 %v6760_v37, %v71_v29  ;;  %v77_v40 = vshll.u32 %v6755_v39, %v71_v29  ;;  %v80_v42 = vshll.u32 %v6751_v41, %v71_v29 }
  0x22   :  { %v83_v44 = vshll.u32 %v6753_v43, %v71_v29  ;;  %v86_v46 = vshll.u32 %v6758_v45, %v71_v29  ;;  %vm89_vm2 = vcmp.lt.s32.totalorder %v70_v28, 1  ;;  %vm90_vm3 = vcmp.lt.s32.totalorder %v70_v28, 2 }
  0x23   :  { %v73_v48 = vshrl.u32 %v6760_v37, %v72_v36  ;;  %v75_v49 = vshrl.u32 %v6755_v39, %v72_v36  ;;  %v78_v50 = vshrl.u32 %v6751_v41, %v72_v36  ;;  %v81_v51 = vshrl.u32 %v6753_v43, %v72_v36 }
  0x24   :  { %v84_v52 = vshrl.u32 %v6758_v45, %v72_v36  ;;  %v87_v54 = vshrl.u32 %v6757_v53, %v72_v36  ;;  %vm92_vm4 = vcmp.lt.s32.totalorder %v70_v28, 4  ;;  %v176_v58 = vsub.s32 32, %v175_v32 }
  0x25   :  { %v76_v55 = vor.u32 %v75_v49, %v74_v38  ;;  %v79_v56 = vor.u32 %v78_v50, %v77_v40  ;;  %v82_v57 = vor.u32 %v81_v51, %v80_v42  ;;  %vm91_vm5 = vcmp.lt.s32.totalorder %v70_v28, 3 }
  0x26   :  { %v85_v59 = vor.u32 %v84_v52, %v83_v44  ;;  %v88_v60 = vor.u32 %v87_v54, %v86_v46  ;;  %v178_v61 = vshll.u32 %v6760_v37, %v175_v32  ;;  %v181_v10 = vshll.u32 %v6755_v39, %v175_v32 }
  0x27   :  { %v93_v62 = vsel %vm89_vm2, %v73_v48, %v76_v55  ;;  %v94_v63 = vsel %vm92_vm4, %v82_v57, 2102212464  ;;  %v97_v0 = vsel %vm89_vm2, %v76_v55, %v79_v56  ;;  %v101_v1 = vsel %vm89_vm2, %v79_v56, %v82_v57 }
  0x28   :  { %v95_v2 = vsel %vm91_vm5, %v79_v56, %v94_v63  ;;  %v98_v7 = vsel %vm92_vm4, %v85_v59, 920167782  ;;  %v102_v9 = vsel %vm92_vm4, %v88_v60, 1326507024  ;;  %v177_v13 = vshrl.u32 %v6760_v37, %v176_v58 }
  0x29   :  { %v99_v11 = vsel %vm91_vm5, %v82_v57, %v98_v7  ;;  %v103_v12 = vsel %vm91_vm5, %v85_v59, %v102_v9  ;;  %v179_v14 = vshrl.u32 %v6755_v39, %v176_v58  ;;  %v96_v15 = vsel %vm90_vm3, %v93_v62, %v95_v2  ;;  %v33_v59 = vld [vmem:[%s6742_s0 + $0x20] sm:$0xff] }
  0x2a   :  { %v100_v16 = vsel %vm90_vm3, %v97_v0, %v99_v11  ;;  %v104_v17 = vsel %vm90_vm3, %v101_v1, %v103_v12  ;;  %v182_v19 = vshrl.u32 %v6751_v41, %v176_v58  ;;  %v184_v29 = vshll.u32 %v6751_v41, %v175_v32 }
  0x2b   :  { %v4744_v20 = vmul.u32.u64.low %v4711_v30, %v104_v17  ;;  %v4745_v21 = vmul.u32.u64.high %v4711_v30, %v104_v17, %v4744_v20  ;;  %v4748_v22 = vmul.u32.u64.low %v4711_v30, %v100_v16  ;;  %v4749_v23 = vmul.u32.u64.high %v4711_v30, %v100_v16, %v4748_v22 }
  0x2c   :  { %v180_v25 = vor.u32 %v179_v14, %v178_v61  ;;  %v183_v26 = vor.u32 %v182_v19, %v181_v10  ;;  %v185_v31 = vshrl.u32 %v6753_v43, %v176_v58  ;;  %v187_v28 = vshll.u32 %v6753_v43, %v175_v32 }
  0x2d   :  { %v188_v36 = vshrl.u32 %v6758_v45, %v176_v58  ;;  %v190_v38 = vshll.u32 %v6758_v45, %v175_v32  ;;  %v191_v40 = vshrl.u32 %v6757_v53, %v176_v58  ;;  %v112_v42 = vmul.u32 %v4711_v30, %v96_v15 }
  0x2e   :  { %v186_v44 = vor.u32 %v185_v31, %v184_v29  ;;  %vm193_vm7 = vcmp.lt.s32.totalorder %v4723_v47, 1  ;;  %vm194_vm8 = vcmp.lt.s32.totalorder %v4723_v47, 2  ;;  %vm114_vm9 = vc.u32 %v4745_v21, %v4748_v22 }
  0x2f   :  { %v115_v46 = vadd.s32 1, %v4749_v23  ;;  %v189_v48 = vor.u32 %v188_v36, %v187_v28  ;;  %vm195_vm10 = vcmp.lt.s32.totalorder %v4723_v47, 3  ;;  %v192_v49 = vor.u32 %v191_v40, %v190_v38 }
  0x30   :  { %vm196_vm11 = vcmp.lt.s32.totalorder %v4723_v47, 4  ;;  %v197_v32 = vsel %vm193_vm7, %v177_v13, %v180_v25  ;;  %v201_v50 = vsel %vm193_vm7, %v180_v25, %v183_v26  ;;  %v205_v54 = vsel %vm193_vm7, %v183_v26, %v186_v44 }
  0x31   :  { %v116_v30 = vsel %vm114_vm9, %v115_v46, %v4749_v23  ;;  %v198_v51 = vsel %vm196_vm11, %v186_v44, 2102212464  ;;  %v202_v52 = vsel %vm196_vm11, %v189_v48, 920167782  ;;  %v206_v58 = vsel %vm196_vm11, %v192_v49, 1326507024 }
  0x32   :  { %v117_v55 = vadd.s32 %v116_v30, %v112_v42  ;;  %v199_v56 = vsel %vm195_vm10, %v183_v26, %v198_v51  ;;  %v203_v57 = vsel %vm195_vm10, %v186_v44, %v202_v52  ;;  %v207_v62 = vsel %vm195_vm10, %v189_v48, %v206_v58 }
  0x33   :  { %v200_v60 = vsel %vm194_vm8, %v197_v32, %v199_v56  ;;  %v204_v61 = vsel %vm194_vm8, %v201_v50, %v203_v57  ;;  %v277_v63 = vsel %vm276_vm6, %v4715_v34, 0  ;;  %v208_v1 = vsel %vm194_vm8, %v205_v54, %v207_v62 }
  0x34   :  { %v118_v0 = vadd.s32 536870912, %v117_v55  ;;  %v4786_v2 = vmul.u32.u64.low %v4713_v33, %v204_v61  ;;  %v4787_v7 = vmul.u32.u64.high %v4713_v33, %v204_v61, %v4786_v2  ;;  %v279_v12 = vand.u32 31, %v277_v63 }
  0x35   :  { %v4791_v9 = vmul.u32.u64.low %v4713_v33, %v208_v1  ;;  %v4792_v10 = vmul.u32.u64.high %v4713_v33, %v208_v1, %v4791_v9  ;;  %v216_v13 = vmul.u32 %v4713_v33, %v200_v60  ;;  %v273_v14 = vor.u32 8388608, %v4709_v27 }
  0x36   :  { %v119_v11 = vshrl.u32 %v118_v0, 30  ;;  %v369_v34 = vand.u32 2147483647, %v4705_v24  ;;  %v4797_v15 = vmul.f32 0.5, %v33_v59  ;;  %v219_v16 = vadd.s32 1, %v4787_v7 }
  0x37   :  { %v280_v17 = vsub.s32 32, %v279_v12  ;;  %v373_v19 = vshrl.u32 %v372_v35, 23  ;;  %vm218_vm12 = vc.u32 %v4792_v10, %v4786_v2  ;;  %v4808_v23 = vshrl.u32 %v277_v63, 5 }
  0x38   :  { %6772 = vst [vmem:[#allocation7_spill] sm:$0xff] %v4797_v15  ;;  %v120_v47 = vshll.u32 %v119_v11, 30  ;;  %v220_v33 = vsel %vm218_vm12, %v219_v16, %v4787_v7  ;;  %v4811_v26 = vshll.u32 %v273_v14, 8  ;;  %v4815_v29 = vand.u32 8388607, %v369_v34 }
  0x39   :  { %v221_v27 = vadd.s32 %v220_v33, %v216_v13  ;;  %v4823_v28 = vadd.s32 4294967169, %v373_v19  ;;  %v143_v38 = vsub.s32 4, %v119_v11  ;;  %v288_v40 = vshll.u32 %v6751_v41, %v279_v12 }
  0x3a   :  { %v4804_v20 = vsub.s32 %v117_v55, %v120_v47  ;;  %v289_v42 = vshrl.u32 %v6753_v43, %v280_v17  ;;  %v282_v46 = vshll.u32 %v6760_v37, %v279_v12  ;;  %v283_v48 = vshrl.u32 %v6755_v39, %v280_v17 }
  0x3b   :  { %v222_v31 = vadd.s32 536870912, %v221_v27  ;;  %vm297_vm15 = vcmp.lt.s32.totalorder %v4808_v23, 1  ;;  %v285_v49 = vshll.u32 %v6755_v39, %v279_v12  ;;  %v286_v32 = vshrl.u32 %v6751_v41, %v280_v17 }
  0x3c   :  { %v123_v25 = vsub.s32 0, %v4804_v20  ;;  %v291_v50 = vshll.u32 %v6753_v43, %v279_v12  ;;  %vm298_vm1 = vcmp.lt.s32.totalorder %v4808_v23, 2  ;;  %v113_v30 = vadd.s32 %v4748_v22, %v4745_v21 }
  0x3d   :  { %v223_v44 = vshrl.u32 %v222_v31, 30  ;;  %v292_v52 = vshrl.u32 %v6758_v45, %v280_v17  ;;  %vm300_vm2 = vcmp.lt.s32.totalorder %v4808_v23, 4  ;;  %v144_v55 = vsel %vm59_vm13, %v143_v38, %v119_v11 }
  0x3e   :  { %v3948_v36 = vmin.u32 %v123_v25, %v4804_v20  ;;  %v281_v56 = vshrl.u32 %v6760_v37, %v280_v17  ;;  %v290_v57 = vor.u32 %v289_v42, %v288_v40  ;;  %v284_v59 = vor.u32 %v283_v48, %v282_v46 }
  0x3f   :  { %v224_v51 = vshll.u32 %v223_v44, 30  ;;  %v294_v60 = vshll.u32 %v6758_v45, %v279_v12  ;;  %v295_v61 = vshrl.u32 %v6757_v53, %v280_v17  ;;  %v287_v21 = vor.u32 %v286_v32, %v285_v49 }
  0x40   :  { %v125_v6 = vclz %v3948_v36  ;;  %v293_v22 = vor.u32 %v292_v52, %v291_v50  ;;  %v302_v62 = vsel %vm300_vm2, %v290_v57, 2102212464  ;;  %v247_v1 = vsub.s32 4, %v223_v44 }
  0x41   :  { %v4843_v58 = vsub.s32 %v221_v27, %v224_v51  ;;  %vm299_vm4 = vcmp.lt.s32.totalorder %v4808_v23, 3  ;;  %v146_v12 = vsel %vm4819_vm14, 0, %v144_v55  ;;  %v296_v14 = vor.u32 %v295_v61, %v294_v60 }
  0x42   :  { %v3949_v54 = vadd.s32 4294967294, %v125_v6  ;;  %v301_v47 = vsel %vm297_vm15, %v281_v56, %v284_v59  ;;  %v303_v16 = vsel %vm299_vm4, %v287_v21, %v302_v62  ;;  %vm4861_vm5 = vcmp.le.f32.partialorder %v161_v8, 0.7853982 }
  0x43   :  { %v227_v0 = vsub.s32 0, %v4843_v58  ;;  %v306_v27 = vsel %vm300_vm2, %v293_v22, 920167782  ;;  %v150_v25 = vadd.s32 3, %v146_v12  ;;  %v217_v31 = vadd.s32 %v4786_v2, %v4792_v10 }
  0x44   :  { %vm3950_vm3 = vcmp.lt.s32.totalorder %v3949_v54, 0  ;;  %v248_v38 = vsel %vm163_vm0, %v247_v1, %v223_v44  ;;  %v307_v8 = vsel %vm299_vm4, %v290_v57, %v306_v27  ;;  %v309_v46 = vsel %vm297_vm15, %v287_v21, %v290_v57 }
  0x45   :  { %v128_v63 = vsel %vm3950_vm3, 0, %v3949_v54  ;;  %v3952_v13 = vmin.u32 %v227_v0, %v4843_v58  ;;  %v304_v6 = vsel %vm298_vm1, %v301_v47, %v303_v16  ;;  %v310_v2 = vsel %vm300_vm2, %v296_v14, 1326507024 }
  0x46   :  { %v129_v7 = vsub.s32 32, %v128_v63  ;;  %v130_v9 = vshll.u32 %v4804_v20, %v128_v63  ;;  %v133_v11 = vsub.s32 4294967266, %v128_v63  ;;  %v305_v20 = vsel %vm297_vm15, %v284_v59, %v287_v21 }
  0x47   :  { %v229_v36 = vclz %v3952_v13  ;;  %v308_v49 = vsel %vm298_vm1, %v305_v20, %v307_v8  ;;  %v311_v32 = vsel %vm299_vm4, %v293_v22, %v310_v2  ;;  %v379_v50 = vadd.s32 1, %v4823_v28 }
  0x48   :  { %v131_v17 = vshrl.u32 %v113_v30, %v129_v7  ;;  %v134_v19 = vadd.s32 127, %v133_v11  ;;  %v312_v30 = vsel %vm298_vm1, %v309_v46, %v311_v32  ;;  %v320_v23 = vmul.u32 %v4811_v26, %v304_v6 }
  0x49   :  { %v3953_v48 = vadd.s32 4294967294, %v229_v36  ;;  %v4889_v51 = vmul.u32.u64.low %v4811_v26, %v308_v49  ;;  %v4890_v52 = vmul.u32.u64.high %v4811_v26, %v308_v49, %v4889_v51  ;;  %vm380_vm7 = vcmp.gt.s32.totalorder %v379_v50, 0 }
  0x4a   :  { %v132_v40 = vor.u32 %v131_v17, %v130_v9  ;;  %v135_v42 = vshll.u32 %v134_v19, 23  ;;  %v4894_v56 = vmul.u32.u64.low %v4811_v26, %v312_v30  ;;  %v4895_v57 = vmul.u32.u64.high %v4811_v26, %v312_v30, %v4894_v56 }
  0x4b   :  { %vm3954_vm6 = vcmp.lt.s32.totalorder %v3953_v48, 0  ;;  %v377_v21 = vor.u32 8388608, %v4815_v29  ;;  %v381_v22 = vsel %vm380_vm7, %v379_v50, 0  ;;  %v250_v0 = vsel %vm4861_vm5, 0, %v248_v38 }
  0x4c   :  { %v136_v10 = vor.u32 4788187, %v135_v42  ;;  %v139_v44 = vcvt.s32.f32 %v132_v40  ;;  %v232_v55 = vsel %vm3954_vm6, 0, %v3953_v48  ;;  %v323_v1 = vadd.s32 1, %v4890_v52 }
  0x4d   :  { %v233_v59 = vsub.s32 32, %v232_v55  ;;  %v234_v60 = vshll.u32 %v4843_v58, %v232_v55  ;;  %v237_v61 = vsub.s32 4294967266, %v232_v55  ;;  %v4903_v9 = vand.u32 3, %v146_v12 }
  0x4e   :  { %v137_v54 = vand.u32 2147483647, %v136_v10  ;;  %vm322_vm8 = vc.u32 %v4895_v57, %v4889_v51  ;;  %v383_v58 = vand.u32 31, %v381_v22  ;;  %v4907_v11 = vand.u32 3, %v150_v25 }
  0x4f   :  { %v235_v62 = vshrl.u32 %v217_v31, %v233_v59  ;;  %v238_v63 = vadd.s32 127, %v237_v61  ;;  %v324_v29 = vsel %vm322_vm8, %v323_v1, %v4890_v52  ;;  %v254_v47 = vadd.s32 3, %v250_v0 }
  0x50   :  { %v140_v28 = vmul.f32 %v139_v44, %v137_v54  ;;  %v325_v16 = vadd.s32 %v324_v29, %v320_v23  ;;  %v384_v17 = vsub.s32 32, %v383_v58  ;;  %v4915_v27 = vshrl.u32 %v381_v22, 5 }
  0x51   :  { %v236_v26 = vor.u32 %v235_v62, %v234_v60  ;;  %v239_v13 = vshll.u32 %v238_v63, 23  ;;  %v386_v31 = vshll.u32 %v6760_v37, %v383_v58  ;;  %v389_v36 = vshll.u32 %v6755_v39, %v383_v58 }
  0x52   :  { %v141_v7 = vxor.u32 2147483648, %v140_v28  ;;  %v326_v25 = vadd.s32 536870912, %v325_v16  ;;  %v387_v40 = vshrl.u32 %v6755_v39, %v384_v17  ;;  %v390_v42 = vshrl.u32 %v6751_v41, %v384_v17 }
  0x53   :  { %v240_v19 = vor.u32 4788187, %v239_v13  ;;  %v243_v20 = vcvt.s32.f32 %v236_v26  ;;  %vm987_vm9 = vcmp.eq.s32.totalorder %v4903_v9, 2  ;;  %v392_v8 = vshll.u32 %v6751_v41, %v383_v58 }
  0x54   :  { %v142_v14 = vsel %vm59_vm13, %v141_v7, %v140_v28  ;;  %v4922_v35 = vshrl.u32 %v326_v25, 30  ;;  %v393_v46 = vshrl.u32 %v6753_v43, %v384_v17  ;;  %v395_v48 = vshll.u32 %v6753_v43, %v383_v58 }
  0x55   :  { %v145_v12 = vsel %vm4819_vm14, %v4686_v3, %v142_v14  ;;  %v241_v38 = vand.u32 2147483647, %v240_v19  ;;  %vm153_vm10 = vcmp.eq.s32.totalorder %v4907_v11, 0  ;;  %vm984_vm11 = vcmp.eq.s32.totalorder %v4903_v9, 0 }
  0x56   :  { %4551 = vcosq.f32 %v145_v12  ;;  %v396_v49 = vshrl.u32 %v6758_v45, %v384_v17  ;;  %v398_v2 = vshll.u32 %v6758_v45, %v383_v58  ;;  %vm152_vm12 = vcmp.lt.s32.totalorder %v4907_v11, 2 }
  0x57   :  { %4553 = vsinq.f32 %v145_v12  ;;  %v244_v6 = vmul.f32 %v243_v20, %v241_v38  ;;  %vm156_vm13 = vcmp.eq.s32.totalorder %v4907_v11, 2  ;;  %vm983_vm14 = vcmp.lt.s32.totalorder %v4903_v9, 2 }
  0x58   :  { %v4934_v10 = vand.u32 3, %v250_v0  ;;  %v328_v44 = vshll.u32 %v4922_v35, 30  ;;  %v399_v32 = vshrl.u32 %v6757_v53, %v384_v17  ;;  %vm149_vm15 = vweird.f32 %v4686_v3 }
  0x59   :  { %v245_v50 = vxor.u32 2147483648, %v244_v6  ;;  %v4939_v30 = vand.u32 3, %v254_v47  ;;  %v388_v52 = vor.u32 %v387_v40, %v386_v31  ;;  %v397_v54 = vor.u32 %v396_v49, %v395_v48 }
  0x5a   :  { %v4941_v55 = vsub.s32 %v325_v16, %v328_v44  ;;  %v391_v56 = vor.u32 %v390_v42, %v389_v36  ;;  %v394_v59 = vor.u32 %v393_v46, %v392_v8  ;;  %vm404_vm1 = vcmp.lt.s32.totalorder %v4915_v27, 4 }
  0x5b   :  { %v246_v60 = vsel %vm163_vm0, %v245_v50, %v244_v6  ;;  %v400_v61 = vor.u32 %v399_v32, %v398_v2  ;;  %vm401_vm2 = vcmp.lt.s32.totalorder %v4915_v27, 1  ;;  %vm403_vm3 = vcmp.lt.s32.totalorder %v4915_v27, 3 }
  0x5c   :  { %v249_v28 = vsel %vm4861_vm5, %v4688_v4, %v246_v60  ;;  %v331_v23 = vsub.s32 0, %v4941_v55  ;;  %v385_v22 = vshrl.u32 %v6760_v37, %v384_v17  ;;  %v4953_v62 = vshll.u32 %v377_v21, 8 }
  0x5d   :  { %4555 = vcosq.f32 %v249_v28  ;;  %vm402_vm4 = vcmp.lt.s32.totalorder %v4915_v27, 2  ;;  %v406_v63 = vsel %vm404_vm1, %v394_v59, 2102212464  ;;  %v410_v0 = vsel %vm404_vm1, %v397_v54, 920167782 }
  0x5e   :  { %4557 = vsinq.f32 %v249_v28  ;;  %vm267_vm0 = vcmp.lt.s32.totalorder %v4690_v5, 0  ;;  %v3956_v33 = vmin.u32 %v331_v23, %v4941_v55  ;;  %v409_v7 = vsel %vm401_vm2, %v388_v52, %v391_v56 }
  0x5f   :  { %v411_v21 = vsel %vm403_vm3, %v394_v59, %v410_v0  ;;  %vm260_vm5 = vcmp.eq.s32.totalorder %v4939_v30, 2  ;;  %v351_v13 = vsub.s32 4, %v4922_v35  ;;  %v413_v29 = vsel %vm401_vm2, %v391_v56, %v394_v59 }
  0x60   :  { %v4552_v1 = vpop.eup %4551  ;;  %v414_v14 = vsel %vm404_vm1, %v400_v61, 1326507024  ;;  %vm257_vm7 = vcmp.eq.s32.totalorder %v4939_v30, 0  ;;  %vm1087_vm8 = vcmp.eq.s32.totalorder %v4934_v10, 0  ;;  %v333_v16 = vclz %v3956_v33 }
  0x61   :  { %v4554_v58 = vpop.eup %4553  ;;  %v157_v26 = vxor.u32 2147483648, %v4552_v1  ;;  %v405_v17 = vsel %vm401_vm2, %v385_v22, %v388_v52  ;;  %v407_v12 = vsel %vm403_vm3, %v391_v56, %v406_v63  ;;  %vm256_vm6 = vcmp.lt.s32.totalorder %v4939_v30, 2 }
  0x62   :  { %v154_v47 = vxor.u32 2147483648, %v4554_v58  ;;  %vm1086_vm1 = vcmp.lt.s32.totalorder %v4934_v10, 2  ;;  %v412_v25 = vsel %vm402_vm4, %v409_v7, %v411_v21  ;;  %v415_v31 = vsel %vm403_vm3, %v397_v54, %v414_v14 }
  0x63   :  { %v158_v19 = vsel %vm156_vm13, %v157_v26, %v4554_v58  ;;  %v989_v20 = vsel %vm987_vm9, %v157_v26, %v4554_v58  ;;  %vm253_vm2 = vweird.f32 %v4688_v4  ;;  %v3957_v40 = vadd.s32 4294967294, %v333_v16 }
  0x64   :  { %v155_v36 = vsel %vm153_vm10, %v4552_v1, %v154_v47  ;;  %v986_v38 = vsel %vm984_vm11, %v4552_v1, %v154_v47  ;;  %v416_v42 = vsel %vm402_vm4, %v413_v29, %v415_v31  ;;  %v321_v2 = vadd.s32 %v4889_v51, %v4895_v57 }
  0x65   :  { %v159_v8 = vsel %vm152_vm12, %v155_v36, %v158_v19  ;;  %v990_v46 = vsel %vm983_vm14, %v986_v38, %v989_v20  ;;  %v5001_v48 = vmul.u32.u64.low %v4953_v62, %v416_v42  ;;  %v5002_v6 = vmul.u32.u64.high %v4953_v62, %v416_v42, %v5001_v48 }
  0x66   :  { %v160_v49 = vsel %vm149_vm15, nan, %v159_v8  ;;  %vm3958_vm9 = vcmp.lt.s32.totalorder %v3957_v40, 0  ;;  %v408_v44 = vsel %vm402_vm4, %v405_v17, %v407_v12  ;;  %v991_v52 = vsel %vm149_vm15, nan, %v990_v46 }
  0x67   :  { %v1713_v32 = vmul.f32 2.0, %v160_v49  ;;  %v336_v11 = vsel %vm3958_vm9, 0, %v3957_v40  ;;  %v5011_v50 = vmul.u32.u64.low %v4953_v62, %v412_v25  ;;  %v5012_v9 = vmul.u32.u64.high %v4953_v62, %v412_v25, %v5011_v50  ;;  %v4556_v60 = vpop.eup %4555 }
  0x68   :  { %v337_v54 = vsub.s32 32, %v336_v11  ;;  %v338_v56 = vshll.u32 %v4941_v55, %v336_v11  ;;  %v341_v59 = vsub.s32 4294967266, %v336_v11  ;;  %v352_v27 = vsel %vm267_vm0, %v351_v13, %v4922_v35  ;;  %v4558_v28 = vpop.eup %4557 }
  0x69   :  { %v5018_v51 = vmul.f32 %v1713_v32, %v991_v52  ;;  %v5020_v57 = vmul.f32 %v1713_v32, %v160_v49  ;;  %v424_v61 = vmul.u32 %v4953_v62, %v408_v44  ;;  %v261_v23 = vxor.u32 2147483648, %v4556_v60 }
  0x6a   :  { %v339_v22 = vshrl.u32 %v321_v2, %v337_v54  ;;  %v342_v63 = vadd.s32 127, %v341_v59  ;;  %vm426_vm10 = vc.u32 %v5002_v6, %v5011_v50  ;;  %v258_v55 = vxor.u32 2147483648, %v4558_v28 }
  0x6b   :  { %v1737_v0 = vsub.f32 1.0, %v5020_v57  ;;  %v5030_v1 = vmul.f32 2.0, %v5018_v51  ;;  %v427_v33 = vadd.s32 1, %v5012_v9  ;;  %v262_v35 = vsel %vm260_vm5, %v261_v23, %v4558_v28 }
  0x6c   :  { %vm6777_vm11 = vcmp.eq.s32.totalorder %v4934_v10, 2  ;;  %v340_v7 = vor.u32 %v339_v22, %v338_v56  ;;  %v343_v21 = vshll.u32 %v342_v63, 23  ;;  %v259_v58 = vsel %vm257_vm7, %v4556_v60, %v258_v55 }
  0x6d   :  { %v1092_v62 = vsel %vm6777_vm11, %v261_v23, %v4558_v28  ;;  %v1089_v26 = vsel %vm1087_vm8, %v4556_v60, %v258_v55  ;;  %v5044_v13 = vmul.f32 %v5030_v1, %v1737_v0  ;;  %v428_v29 = vsel %vm426_vm10, %v427_v33, %v5012_v9  ;;  %v34_v60 = vld [vmem:[%s6742_s0 + $0x28] sm:$0xff] }
  0x6e   :  { %v263_v14 = vsel %vm256_vm6, %v259_v58, %v262_v35  ;;  %v1093_v47 = vsel %vm1086_vm1, %v1089_v26, %v1092_v62  ;;  %v344_v16 = vor.u32 4788187, %v343_v21  ;;  %v347_v17 = vcvt.s32.f32 %v340_v7 }
  0x6f   :  { %v264_v12 = vsel %vm253_vm2, nan, %v263_v14  ;;  %v1094_v19 = vsel %vm253_vm2, nan, %v1093_v47  ;;  %v429_v20 = vadd.s32 %v428_v29, %v424_v61  ;;  %vm5057_vm12 = vcmp.le.f32.partialorder %v265_v18, 0.7853982 }
  0x70   :  { %v1714_v25 = vmul.f32 2.0, %v264_v12  ;;  %v4302_v31 = vpack.i.bf16 %v264_v12, %v160_v49  ;;  %v345_v30 = vand.u32 2147483647, %v344_v16  ;;  %v354_v10 = vsel %vm5057_vm12, 0, %v352_v27 }
  0x71   :  { %v430_v38 = vadd.s32 536870912, %v429_v20  ;;  %v4307_v40 = vpack.i.bf16 %v1094_v19, %v991_v52  ;;  %v476_v48 = vand.u32 2139095040, %v4797_v15  ;;  %v473_v18 = vand.u32 2147483647, %v4797_v15 }
  0x72   :  { %v5063_v42 = vmul.f32 %v1714_v25, %v1094_v19  ;;  %v1730_v8 = vmul.f32 %v1714_v25, %v264_v12  ;;  %4303 = vrot.lane.b32.xlu0 %v4302_v31, %s4617_s23  ;;  %v348_v46 = vmul.f32 %v347_v17, %v345_v30  ;;  %v358_v9 = vadd.s32 3, %v354_v10 }
  0x73   :  { %v431_v49 = vshrl.u32 %v430_v38, 30  ;;  %v477_v11 = vshrl.u32 %v476_v48, 23  ;;  %v480_v23 = vand.u32 8388607, %v473_v18  ;;  %vm371_vm13 = vcmp.lt.s32.totalorder %v4705_v24, 0 }
  0x74   :  { %v1738_v2 = vsub.f32 1.0, %v1730_v8  ;;  %v5069_v44 = vmul.f32 2.0, %v5063_v42  ;;  %v349_v32 = vxor.u32 2147483648, %v348_v46  ;;  %v5086_v55 = vmul.f32 0.5, %v34_v60 }
  0x75   :  { %v432_v54 = vshll.u32 %v431_v49, 30  ;;  %v455_v59 = vsub.s32 4, %v431_v49  ;;  %v3963_v27 = vadd.s32 4294967169, %v477_v11  ;;  %v5088_v33 = vand.u32 3, %v358_v9 }
  0x76   :  { %v5072_v52 = vmul.f32 %v5069_v44, %v1738_v2  ;;  %v350_v56 = vsel %vm267_vm0, %v349_v32, %v348_v46  ;;  %4308 = vrot.lane.b32.xlu0 %v4307_v40, %s4624_s8  ;;  %vm5094_vm15 = vcmp.le.f32.partialorder %v369_v34, 0.7853982  ;;  %v5098_v21 = vand.u32 3, %v354_v10 }
  0x77   :  { %v353_v61 = vsel %vm5057_vm12, %v4690_v5, %v350_v56  ;;  %v433_v28 = vsub.s32 %v429_v20, %v432_v54  ;;  %v483_v22 = vadd.s32 1, %v3963_v27  ;;  %v456_v35 = vsel %vm371_vm13, %v455_v59, %v431_v49 }
  0x78   :  { %4559 = vcosq.f32 %v353_v61  ;;  %v481_v58 = vor.u32 8388608, %v480_v23  ;;  %v458_v14 = vsel %vm5094_vm15, 0, %v456_v35  ;;  %v577_v47 = vand.u32 2147483647, %v5086_v55 }
  0x79   :  { %v435_v63 = vsub.s32 0, %v433_v28  ;;  %vm484_vm14 = vcmp.gt.s32.totalorder %v483_v22, 0  ;;  %4561 = vsinq.f32 %v353_v61  ;;  %v580_v16 = vand.u32 2139095040, %v5086_v55 }
  0x7a   :  { %v485_v26 = vsel %vm484_vm14, %v483_v22, 0  ;;  %vm364_vm3 = vcmp.eq.s32.totalorder %v5088_v33, 2  ;;  %v425_v34 = vadd.s32 %v5011_v50, %v5002_v6  ;;  %v5109_v19 = vpack.i.bf16 %v1738_v2, %v1737_v0 }
  0x7b   :  { %v3960_v7 = vmin.u32 %v435_v63, %v433_v28  ;;  %v487_v17 = vand.u32 31, %v485_v26  ;;  %v5115_v31 = vadd.s32 3, %v458_v14  ;;  %vm1193_vm4 = vcmp.eq.s32.totalorder %v5098_v21, 2 }
  0x7c   :  { %v5118_v30 = vshll.u32 %v481_v58, 8  ;;  %v5120_v6 = vshrl.u32 %v485_v26, 5  ;;  %v581_v50 = vshrl.u32 %v580_v16, 23  ;;  %v5124_v57 = vand.u32 8388607, %v577_v47 }
  0x7d   :  { %v437_v29 = vclz %v3960_v7  ;;  %v488_v36 = vsub.s32 32, %v487_v17  ;;  %v490_v38 = vshll.u32 %v6760_v37, %v487_v17  ;;  %v493_v8 = vshll.u32 %v6755_v39, %v487_v17 }
  0x7e   :  { %vm361_vm5 = vcmp.eq.s32.totalorder %v5088_v33, 0  ;;  %vm1190_vm6 = vcmp.eq.s32.totalorder %v5098_v21, 0  ;;  %v5132_v32 = vand.u32 3, %v458_v14  ;;  %v496_v11 = vshll.u32 %v6751_v41, %v487_v17 }
  0x7f   :  { %v3961_v12 = vadd.s32 4294967294, %v437_v29  ;;  %v491_v40 = vshrl.u32 %v6755_v39, %v488_v36  ;;  %v494_v2 = vshrl.u32 %v6751_v41, %v488_v36  ;;  %v497_v9 = vshrl.u32 %v6753_v43, %v488_v36 }
  0x80   :  { %v499_v54 = vshll.u32 %v6753_v43, %v487_v17  ;;  %v585_v27 = vor.u32 8388608, %v5124_v57  ;;  %v502_v23 = vshll.u32 %v6758_v45, %v487_v17  ;;  %vm505_vm7 = vcmp.lt.s32.totalorder %v5120_v6, 1 }
  0x81   :  { %vm3962_vm0 = vcmp.lt.s32.totalorder %v3961_v12, 0  ;;  %v3967_v22 = vadd.s32 4294967169, %v581_v50  ;;  %vm360_vm8 = vcmp.lt.s32.totalorder %v5088_v33, 2  ;;  %vm1189_vm1 = vcmp.lt.s32.totalorder %v5098_v21, 2 }
  0x82   :  { %v4560_v0 = vpop.eup %4559  ;;  %v440_v10 = vsel %vm3962_vm0, 0, %v3961_v12  ;;  %v492_v7 = vor.u32 %v491_v40, %v490_v38  ;;  %v495_v58 = vor.u32 %v494_v2, %v493_v8  ;;  %v489_v26 = vshrl.u32 %v6760_v37, %v488_v36 }
  0x83   :  { %v441_v46 = vsub.s32 32, %v440_v10  ;;  %v442_v48 = vshll.u32 %v433_v28, %v440_v10  ;;  %v445_v49 = vsub.s32 4294967266, %v440_v10  ;;  %v365_v56 = vxor.u32 2147483648, %v4560_v0  ;;  %v4562_v61 = vpop.eup %4561 }
  0x84   :  { %v500_v28 = vshrl.u32 %v6758_v45, %v488_v36  ;;  %v498_v29 = vor.u32 %v497_v9, %v496_v11  ;;  %v503_v16 = vshrl.u32 %v6757_v53, %v488_v36  ;;  %vm507_vm2 = vcmp.lt.s32.totalorder %v5120_v6, 3 }
  0x85   :  { %v443_v59 = vshrl.u32 %v425_v34, %v441_v46  ;;  %v446_v60 = vadd.s32 127, %v445_v49  ;;  %v362_v34 = vxor.u32 2147483648, %v4562_v61  ;;  %v366_v17 = vsel %vm364_vm3, %v365_v56, %v4562_v61 }
  0x86   :  { %v501_v14 = vor.u32 %v500_v28, %v499_v54  ;;  %v1195_v57 = vsel %vm1193_vm4, %v365_v56, %v4562_v61  ;;  %v504_v10 = vor.u32 %v503_v16, %v502_v23  ;;  %vm508_vm9 = vcmp.lt.s32.totalorder %v5120_v6, 4 }
  0x87   :  { %v444_v63 = vor.u32 %v443_v59, %v442_v48  ;;  %v447_v35 = vshll.u32 %v446_v60, 23  ;;  %vm357_vm10 = vweird.f32 %v4690_v5  ;;  %vm506_vm11 = vcmp.lt.s32.totalorder %v5120_v6, 2 }
  0x88   :  { %v510_v36 = vsel %vm508_vm9, %v498_v29, 2102212464  ;;  %v513_v40 = vsel %vm505_vm7, %v492_v7, %v495_v58  ;;  %v509_v8 = vsel %vm505_vm7, %v489_v26, %v492_v7  ;;  %v514_v46 = vsel %vm508_vm9, %v501_v14, 920167782 }
  0x89   :  { %v448_v12 = vor.u32 4788187, %v447_v35  ;;  %v451_v50 = vcvt.s32.f32 %v444_v63  ;;  %v517_v48 = vsel %vm505_vm7, %v495_v58, %v498_v29  ;;  %v518_v49 = vsel %vm508_vm9, %v504_v10, 1326507024 }
  0x8a   :  { %v511_v11 = vsel %vm507_vm2, %v495_v58, %v510_v36  ;;  %v515_v9 = vsel %vm507_vm2, %v498_v29, %v514_v46  ;;  %v519_v54 = vsel %vm507_vm2, %v501_v14, %v518_v49  ;;  %v363_v56 = vsel %vm361_vm5, %v4560_v0, %v362_v34 }
  0x8b   :  { %v449_v38 = vand.u32 2147483647, %v448_v12  ;;  %v516_v59 = vsel %vm506_vm11, %v513_v40, %v515_v9  ;;  %v520_v60 = vsel %vm506_vm11, %v517_v48, %v519_v54  ;;  %v587_v61 = vadd.s32 1, %v3967_v22 }
  0x8c   :  { %v1192_v23 = vsel %vm1190_vm6, %v4560_v0, %v362_v34  ;;  %v5168_v63 = vmul.u32.u64.low %v5118_v30, %v520_v60  ;;  %v5169_v35 = vmul.u32.u64.high %v5118_v30, %v520_v60, %v5168_v63  ;;  %v512_v7 = vsel %vm506_vm11, %v509_v8, %v511_v11 }
  0x8d   :  { %v452_v2 = vmul.f32 %v451_v50, %v449_v38  ;;  %v5174_v58 = vmul.u32.u64.low %v5118_v30, %v516_v59  ;;  %v5175_v26 = vmul.u32.u64.high %v5118_v30, %v516_v59, %v5174_v58  ;;  %vm588_vm12 = vcmp.gt.s32.totalorder %v587_v61, 0 }
  0x8e   :  { %v5181_v29 = vand.u32 3, %v5115_v31  ;;  %v589_v0 = vsel %vm588_vm12, %v587_v61, 0  ;;  %v5183_v14 = vshll.u32 %v585_v27, 8  ;;  %v367_v16 = vsel %vm360_vm8, %v363_v56, %v366_v17 }
  0x8f   :  { %v453_v28 = vxor.u32 2147483648, %v452_v2  ;;  %v1196_v34 = vsel %vm1189_vm1, %v1192_v23, %v1195_v57  ;;  %v591_v12 = vand.u32 31, %v589_v0  ;;  %v528_v50 = vmul.u32 %v5118_v30, %v512_v7 }
  0x90   :  { %v5195_v31 = vshrl.u32 %v589_v0, 5  ;;  %v531_v33 = vadd.s32 1, %v5175_v26  ;;  %vm468_vm14 = vcmp.eq.s32.totalorder %v5181_v29, 2  ;;  %v5207_v10 = vsel %vm357_vm10, nan, %v367_v16 }
  0x91   :  { %v454_v22 = vsel %vm371_vm13, %v453_v28, %v452_v2  ;;  %vm530_vm13 = vc.u32 %v5169_v35, %v5174_v58  ;;  %v592_v27 = vsub.s32 32, %v591_v12  ;;  %v594_v17 = vshll.u32 %v6760_v37, %v591_v12 }
  0x92   :  { %v457_v6 = vsel %vm5094_vm15, %v4705_v24, %v454_v22  ;;  %vm1296_vm15 = vcmp.eq.s32.totalorder %v5132_v32, 2  ;;  %v597_v62 = vshll.u32 %v6755_v39, %v591_v12  ;;  %v600_v21 = vshll.u32 %v6751_v41, %v591_v12 }
  0x93   :  { %4563 = vcosq.f32 %v457_v6  ;;  %v603_v30 = vshll.u32 %v6753_v43, %v591_v12  ;;  %v606_v57 = vshll.u32 %v6758_v45, %v591_v12  ;;  %vm465_vm3 = vcmp.eq.s32.totalorder %v5181_v29, 0 }
  0x94   :  { %4565 = vsinq.f32 %v457_v6  ;;  %vm1293_vm4 = vcmp.eq.s32.totalorder %v5132_v32, 0  ;;  %v532_v38 = vsel %vm530_vm13, %v531_v33, %v5175_v26  ;;  %v595_v36 = vshrl.u32 %v6755_v39, %v592_v27 }
  0x95   :  { %v598_v40 = vshrl.u32 %v6751_v41, %v592_v27  ;;  %vm1292_vm0 = vcmp.lt.s32.totalorder %v5132_v32, 2  ;;  %v533_v8 = vadd.s32 %v532_v38, %v528_v50  ;;  %v601_v46 = vshrl.u32 %v6753_v43, %v592_v27 }
  0x96   :  { %v604_v48 = vshrl.u32 %v6758_v45, %v592_v27  ;;  %v607_v49 = vshrl.u32 %v6757_v53, %v592_v27  ;;  %vm461_vm5 = vweird.f32 %v4705_v24  ;;  %v593_v2 = vshrl.u32 %v6760_v37, %v592_v27 }
  0x97   :  { %v596_v11 = vor.u32 %v595_v36, %v594_v17  ;;  %v599_v9 = vor.u32 %v598_v40, %v597_v62  ;;  %vm609_vm6 = vcmp.lt.s32.totalorder %v5195_v31, 1  ;;  %v534_v54 = vadd.s32 536870912, %v533_v8 }
  0x98   :  { %v602_v56 = vor.u32 %v601_v46, %v600_v21  ;;  %v605_v59 = vor.u32 %v604_v48, %v603_v30  ;;  %v608_v60 = vor.u32 %v607_v49, %v606_v57  ;;  %vm610_vm7 = vcmp.lt.s32.totalorder %v5195_v31, 2 }
  0x99   :  { %vm611_vm8 = vcmp.lt.s32.totalorder %v5195_v31, 3  ;;  %vm612_vm1 = vcmp.lt.s32.totalorder %v5195_v31, 4  ;;  %v617_v61 = vsel %vm609_vm6, %v596_v11, %v599_v9  ;;  %v5228_v28 = vsel %vm357_vm10, nan, %v1196_v34 }
  0x9a   :  { %v5230_v23 = vshrl.u32 %v534_v54, 30  ;;  %v614_v63 = vsel %vm612_vm1, %v602_v56, 2102212464  ;;  %v618_v7 = vsel %vm612_vm1, %v605_v59, 920167782  ;;  %v1715_v26 = vmul.f32 2.0, %v5207_v10 }
  0x9b   :  { %v619_v22 = vsel %vm611_vm8, %v602_v56, %v618_v7  ;;  %v621_v0 = vsel %vm609_vm6, %v599_v9, %v602_v56  ;;  %v622_v16 = vsel %vm612_vm1, %v608_v60, 1326507024  ;;  %v613_v34 = vsel %vm609_vm6, %v593_v2, %v596_v11 }
  0x9c   :  { %v536_v12 = vshll.u32 %v5230_v23, 30  ;;  %v615_v50 = vsel %vm611_vm8, %v599_v9, %v614_v63  ;;  %v620_v33 = vsel %vm610_vm7, %v617_v61, %v619_v22  ;;  %v623_v62 = vsel %vm611_vm8, %v605_v59, %v622_v16 }
  0x9d   :  { %v4564_v6 = vpop.eup %4563  ;;  %v5247_v21 = vmul.u32.u64.low %v5183_v14, %v620_v33  ;;  %v5248_v30 = vmul.u32.u64.high %v5183_v14, %v620_v33, %v5247_v21  ;;  %vm464_vm2 = vcmp.lt.s32.totalorder %v5181_v29, 2  ;;  %v624_v36 = vsel %vm610_vm7, %v621_v0, %v623_v62 }
  0x9e   :  { %v4566_v27 = vpop.eup %4565  ;;  %v469_v17 = vxor.u32 2147483648, %v4564_v6  ;;  %v5252_v38 = vsub.s32 %v533_v8, %v536_v12  ;;  %v1723_v48 = vmul.f32 %v1715_v26, %v5228_v28  ;;  %v5262_v49 = vmul.f32 %v1715_v26, %v5207_v10 }
  0x9f   :  { %v466_v57 = vxor.u32 2147483648, %v4566_v27  ;;  %v616_v9 = vsel %vm610_vm7, %v613_v34, %v615_v50  ;;  %v5274_v59 = vmul.u32.u64.low %v5183_v14, %v624_v36  ;;  %v5275_v60 = vmul.u32.u64.high %v5183_v14, %v624_v36, %v5274_v59 }
  0xa0   :  { %v470_v40 = vsel %vm468_vm14, %v469_v17, %v4566_v27  ;;  %v1298_v46 = vsel %vm1296_vm15, %v469_v17, %v4566_v27  ;;  %v539_v11 = vsub.s32 0, %v5252_v38  ;;  %v1761_v31 = vmul.f32 %v5030_v1, %v5018_v51 }
  0xa1   :  { %v467_v2 = vsel %vm465_vm3, %v4564_v6, %v466_v57  ;;  %v1295_v8 = vsel %vm1293_vm4, %v4564_v6, %v466_v57  ;;  %v632_v26 = vmul.u32 %v5183_v14, %v616_v9  ;;  %v635_v32 = vadd.s32 1, %v5248_v30 }
  0xa2   :  { %v471_v54 = vsel %vm464_vm2, %v467_v2, %v470_v40  ;;  %v1299_v56 = vsel %vm1292_vm0, %v1295_v8, %v1298_v46  ;;  %v3964_v63 = vmin.u32 %v539_v11, %v5252_v38  ;;  %vm475_vm9 = vcmp.lt.s32.totalorder %v4797_v15, 0 }
  0xa3   :  { %v472_v29 = vsel %vm461_vm5, nan, %v471_v54  ;;  %v1300_v61 = vsel %vm461_vm5, nan, %v1299_v56  ;;  %v1747_v16 = vmul.f32 2.0, %v1723_v48  ;;  %v1762_v6 = vmul.f32 %v5069_v44, %v5063_v42 }
  0xa4   :  { %v1716_v7 = vmul.f32 2.0, %v472_v29  ;;  %v4312_v22 = vpack.i.bf16 %v472_v29, %v5207_v10  ;;  %v541_v0 = vclz %v3964_v63  ;;  %v529_v34 = vadd.s32 %v5174_v58, %v5169_v35 }
  0xa5   :  { %vm634_vm10 = vc.u32 %v5275_v60, %v5247_v21  ;;  %v6750_v1 = vsub.f32 1.0, %v5262_v49  ;;  %v559_v10 = vsub.s32 4, %v5230_v23  ;;  %v1769_v33 = vsub.f32 1.0, %v1761_v31 }
  0xa6   :  { %v1724_v12 = vmul.f32 %v1716_v7, %v1300_v61  ;;  %4313 = vrot.lane.b32.xlu0 %v4312_v22, %s4617_s23  ;;  %v3965_v14 = vadd.s32 4294967294, %v541_v0  ;;  %v636_v50 = vsel %vm634_vm10, %v635_v32, %v5248_v30  ;;  %v4317_v44 = vpack.i.bf16 %v1300_v61, %v5228_v28 }
  0xa7   :  { %v637_v17 = vadd.s32 %v636_v50, %v632_v26  ;;  %v5299_v62 = vmul.f32 %v1716_v7, %v472_v29  ;;  %v1770_v58 = vsub.f32 1.0, %v1762_v6  ;;  %v5302_v57 = vmul.f32 2.0, %v5044_v13 }
  0xa8   :  { %v4337_v27 = vpack.i.bf16 %v1724_v12, %v1723_v48  ;;  %vm3966_vm11 = vcmp.lt.s32.totalorder %v3965_v14, 0  ;;  %v1748_v35 = vmul.f32 2.0, %v1724_v12  ;;  %v5308_v46 = vmul.f32 2.0, %v5072_v52 }
  0xa9   :  { %v544_v36 = vsel %vm3966_vm11, 0, %v3965_v14  ;;  %v638_v40 = vadd.s32 536870912, %v637_v17  ;;  %v6749_v30 = vsub.f32 1.0, %v5299_v62  ;;  %v5312_v11 = vmul.f32 %v5302_v57, %v1769_v33 }
  0xaa   :  { %4338 = vrot.lane.b32.xlu1 %v4337_v27, %s4625_s11  ;;  %4318 = vrot.lane.b32.xlu0 %v4317_v44, %s4624_s8  ;;  %v545_v28 = vsub.s32 32, %v544_v36  ;;  %v546_v2 = vshll.u32 %v5252_v38, %v544_v36  ;;  %v549_v8 = vsub.s32 4294967266, %v544_v36  ;;  %v5320_v56 = vmul.f32 %v1747_v16, %v6750_v1  ;;  %v36_v44 = vld [vmem:[%s6742_s0 + $0x38] sm:$0xff] }
  0xab   :  { %v639_v9 = vshrl.u32 %v638_v40, 30  ;;  %v5316_v54 = vmul.f32 %v1748_v35, %v6749_v30  ;;  %v5323_v59 = vmul.f32 %v5308_v46, %v1770_v58  ;;  %v5325_v63 = vmul.f32 %v1747_v16, %v1723_v48 }
  0xac   :  { %v547_v29 = vshrl.u32 %v529_v34, %v545_v28  ;;  %v550_v61 = vadd.s32 127, %v549_v8  ;;  %v5327_v38 = vmul.f32 %v1748_v35, %v1724_v12  ;;  %v560_v31 = vsel %vm475_vm9, %v559_v10, %v5230_v23  ;;  %v35_v34 = vld [vmem:[%s6742_s0 + $0x30] sm:$0xff] }
  0xad   :  { %v640_v7 = vshll.u32 %v639_v9, 30  ;;  %v6748_v0 = vsub.f32 1.0, %v5325_v63  ;;  %vm5338_vm12 = vcmp.le.f32.partialorder %v473_v18, 0.7853982  ;;  %v5343_v12 = vmul.f32 2.0, %v5320_v56 }
  0xae   :  { %v548_v32 = vor.u32 %v547_v29, %v546_v2  ;;  %v551_v22 = vshll.u32 %v550_v61, 23  ;;  %v6747_v6 = vsub.f32 1.0, %v5327_v38  ;;  %v5346_v23 = vmul.f32 2.0, %v5316_v54 }
  0xaf   :  { %v641_v16 = vsub.s32 %v637_v17, %v640_v7  ;;  %v562_v50 = vsel %vm5338_vm12, 0, %v560_v31  ;;  %v5353_v18 = vpack.i.bf16 %v1770_v58, %v1769_v33  ;;  %v5358_v17 = vmul.f32 %v5343_v12, %v6748_v0 }
  0xb0   :  { %v552_v14 = vor.u32 4788187, %v551_v22  ;;  %v555_v10 = vcvt.s32.f32 %v548_v32  ;;  %v5366_v36 = vmul.f32 %v5346_v23, %v6747_v6  ;;  %v5368_v40 = vmul.f32 0.5, %v35_v34 }
  0xb1   :  { %v643_v27 = vsub.s32 0, %v641_v16  ;;  %v566_v33 = vadd.s32 3, %v562_v50  ;;  %v5372_v8 = vmul.f32 0.5, %v36_v44  ;;  %v663_v61 = vsub.s32 4, %v639_v9 }
  0xb2   :  { %v553_v35 = vand.u32 2147483647, %v552_v14  ;;  %v6746_v31 = vand.u32 2147483647, %v5368_v40  ;;  %v684_v32 = vand.u32 2139095040, %v5368_v40  ;;  %vm579_vm13 = vcmp.lt.s32.totalorder %v5086_v55, 0 }
  0xb3   :  { %v3968_v58 = vmin.u32 %v643_v27, %v641_v16  ;;  %v5376_v22 = vand.u32 3, %v566_v33  ;;  %v5379_v14 = vand.u32 3, %v562_v50  ;;  %v633_v27 = vadd.s32 %v5247_v21, %v5275_v60 }
  0xb4   :  { %v556_v28 = vmul.f32 %v555_v10, %v553_v35  ;;  %v685_v44 = vshrl.u32 %v684_v32, 23  ;;  %v788_v35 = vand.u32 2139095040, %v5372_v8  ;;  %v664_v33 = vsel %vm579_vm13, %v663_v61, %v639_v9 }
  0xb5   :  { %v645_v29 = vclz %v3968_v58  ;;  %v688_v50 = vand.u32 8388607, %v6746_v31  ;;  %vm5395_vm15 = vcmp.le.f32.partialorder %v577_v47, 0.7853982  ;;  %vm568_vm3 = vcmp.lt.s32.totalorder %v5376_v22, 2 }
  0xb6   :  { %v557_v7 = vxor.u32 2147483648, %v556_v28  ;;  %v666_v61 = vsel %vm5395_vm15, 0, %v664_v33  ;;  %vm569_vm4 = vcmp.eq.s32.totalorder %v5376_v22, 0  ;;  %vm572_vm0 = vcmp.eq.s32.totalorder %v5376_v22, 2 }
  0xb7   :  { %v3969_v34 = vadd.s32 4294967294, %v645_v29  ;;  %v689_v31 = vor.u32 8388608, %v688_v50  ;;  %vm565_vm6 = vweird.f32 %v4797_v15  ;;  %vm1396_vm7 = vcmp.eq.s32.totalorder %v5379_v14, 0 }
  0xb8   :  { %v558_v10 = vsel %vm475_vm9, %v557_v7, %v556_v28  ;;  %v3971_v28 = vadd.s32 4294967169, %v685_v44  ;;  %v789_v7 = vshrl.u32 %v788_v35, 23  ;;  %v670_v44 = vadd.s32 3, %v666_v61 }
  0xb9   :  { %v561_v58 = vsel %vm5338_vm12, %v4797_v15, %v558_v10  ;;  %vm3970_vm14 = vcmp.lt.s32.totalorder %v3969_v34, 0  ;;  %vm1399_vm8 = vcmp.eq.s32.totalorder %v5379_v14, 2  ;;  %v5407_v35 = vand.u32 3, %v666_v61 }
  0xba   :  { %4567 = vcosq.f32 %v561_v58  ;;  %v648_v29 = vsel %vm3970_vm14, 0, %v3969_v34  ;;  %v691_v10 = vadd.s32 1, %v3971_v28  ;;  %vm1395_vm1 = vcmp.lt.s32.totalorder %v5379_v14, 2 }
  0xbb   :  { %4569 = vsinq.f32 %v561_v58  ;;  %v649_v21 = vsub.s32 32, %v648_v29  ;;  %v650_v60 = vshll.u32 %v641_v16, %v648_v29  ;;  %v653_v32 = vsub.s32 4294967266, %v648_v29 }
  0xbc   :  { %vm692_vm5 = vcmp.gt.s32.totalorder %v691_v10, 0  ;;  %v3975_v16 = vadd.s32 4294967169, %v789_v7  ;;  %v5409_v29 = vshll.u32 %v689_v31, 8  ;;  %v6786_v14 = vand.u32 2147483647, %v5372_v8 }
  0xbd   :  { %v651_v2 = vshrl.u32 %v633_v27, %v649_v21  ;;  %v654_v9 = vadd.s32 127, %v653_v32  ;;  %v693_v27 = vsel %vm692_vm5, %v691_v10, 0  ;;  %vm669_vm14 = vweird.f32 %v5086_v55 }
  0xbe   :  { %v695_v58 = vand.u32 31, %v693_v27  ;;  %v5412_v7 = vshrl.u32 %v693_v27, 5  ;;  %v6792_v24 = vmov 1326507024  }
  0xbf   :  { %v652_v47 = vor.u32 %v651_v2, %v650_v60  ;;  %v655_v34 = vshll.u32 %v654_v9, 23  ;;  %v795_v60 = vadd.s32 1, %v3975_v16 }
  0xc0   :  { %v696_v21 = vsub.s32 32, %v695_v58  ;;  %v698_v2 = vshll.u32 %v6760_v37, %v695_v58  ;;  %v701_v10 = vshll.u32 %v6755_v39, %v695_v58  ;;  %v704_v9 = vshll.u32 %v6751_v41, %v695_v58 }
  0xc1   :  { %v656_v33 = vor.u32 4788187, %v655_v34  ;;  %v659_v50 = vcvt.s32.f32 %v652_v47  ;;  %v707_v61 = vshll.u32 %v6753_v43, %v695_v58  ;;  %v710_v26 = vshll.u32 %v6758_v45, %v695_v58 }
  0xc2   :  { %v699_v31 = vshrl.u32 %v6755_v39, %v696_v21  ;;  %v702_v34 = vshrl.u32 %v6751_v41, %v696_v21  ;;  %v705_v27 = vshrl.u32 %v6753_v43, %v696_v21  ;;  %v708_v6 = vshrl.u32 %v6758_v45, %v696_v21 }
  0xc3   :  { %v657_v32 = vand.u32 2147483647, %v656_v33  ;;  %v711_v0 = vshrl.u32 %v6757_v53, %v696_v21  ;;  %v697_v30 = vshrl.u32 %v6760_v37, %v696_v21  ;;  %vm713_vm2 = vcmp.lt.s32.totalorder %v5412_v7, 1 }
  0xc4   :  { %v4568_v47 = vpop.eup %4567  ;;  %vm796_vm9 = vcmp.gt.s32.totalorder %v795_v60, 0  ;;  %v700_v43 = vor.u32 %v699_v31, %v698_v2  ;;  %v703_v39 = vor.u32 %v702_v34, %v701_v10  ;;  %v709_v53 = vor.u32 %v708_v6, %v707_v61 }
  0xc5   :  { %v4570_v25 = vpop.eup %4569  ;;  %v573_v16 = vxor.u32 2147483648, %v4568_v47  ;;  %v660_v33 = vmul.f32 %v659_v50, %v657_v32  ;;  %v706_v32 = vor.u32 %v705_v27, %v704_v9  ;;  %v712_v28 = vor.u32 %v711_v0, %v710_v26 }
  0xc6   :  { %v570_v20 = vxor.u32 2147483648, %v4570_v25  ;;  %vm715_vm10 = vcmp.lt.s32.totalorder %v5412_v7, 3  ;;  %vm716_vm11 = vcmp.lt.s32.totalorder %v5412_v7, 4  ;;  %vm714_vm12 = vcmp.lt.s32.totalorder %v5412_v7, 2 }
  0xc7   :  { %v574_v1 = vsel %vm572_vm0, %v573_v16, %v4570_v25  ;;  %v661_v41 = vxor.u32 2147483648, %v660_v33  ;;  %v1401_v50 = vsel %vm1399_vm8, %v573_v16, %v4570_v25  ;;  %v722_v26 = vsel %vm716_vm11, %v709_v53, 920167782 }
  0xc8   :  { %v571_v58 = vsel %vm569_vm4, %v4568_v47, %v570_v20  ;;  %v1398_v37 = vsel %vm1396_vm7, %v4568_v47, %v570_v20  ;;  %v718_v20 = vsel %vm716_vm11, %v706_v32, 2102212464  ;;  %v671_v0 = vand.u32 3, %v670_v44 }
  0xc9   :  { %v575_v21 = vsel %vm568_vm3, %v571_v58, %v574_v1  ;;  %v662_v45 = vsel %vm579_vm13, %v661_v41, %v660_v33  ;;  %v717_v41 = vsel %vm713_vm2, %v697_v30, %v700_v43  ;;  %v719_v1 = vsel %vm715_vm10, %v703_v39, %v718_v20 }
  0xca   :  { %v5441_v2 = vsel %vm565_vm6, nan, %v575_v21  ;;  %v665_v25 = vsel %vm5395_vm15, %v5086_v55, %v662_v45  ;;  %v721_v45 = vsel %vm713_vm2, %v700_v43, %v703_v39  ;;  %v723_v22 = vsel %vm715_vm10, %v706_v32, %v722_v26 }
  0xcb   :  { %4571 = vcosq.f32 %v665_v25  ;;  %v1717_v6 = vmul.f32 2.0, %v5441_v2  ;;  %v797_v30 = vsel %vm796_vm9, %v795_v60, 0  ;;  %v1402_v48 = vsel %vm1395_vm1, %v1398_v37, %v1401_v50 }
  0xcc   :  { %4573 = vsinq.f32 %v665_v25  ;;  %v724_v10 = vsel %vm714_vm12, %v721_v45, %v723_v22  ;;  %v725_v43 = vsel %vm713_vm2, %v703_v39, %v706_v32  ;;  %v726_v9 = vsel %vm716_vm11, %v712_v28, 1326507024 }
  0xcd   :  { %vm1498_vm13 = vcmp.lt.s32.totalorder %v5407_v35, 2  ;;  %v5473_v44 = vmul.f32 %v1717_v6, %v5441_v2  ;;  %v720_v60 = vsel %vm714_vm12, %v717_v41, %v719_v1  ;;  %v727_v37 = vsel %vm715_vm10, %v709_v53, %v726_v9 }
  0xce   :  { %v5481_v61 = vand.u32 8388607, %v6786_v14  ;;  %v728_v39 = vsel %vm714_vm12, %v725_v43, %v727_v37  ;;  %v5487_v28 = vmul.u32.u64.low %v5409_v29, %v724_v10  ;;  %v5488_v47 = vmul.u32.u64.high %v5409_v29, %v724_v10, %v5487_v28 }
  0xcf   :  { %v799_v31 = vand.u32 31, %v797_v30  ;;  %v5493_v34 = vsel %vm565_vm6, nan, %v1402_v48  ;;  %vm1499_vm15 = vcmp.eq.s32.totalorder %v5407_v35, 0  ;;  %vm672_vm3 = vcmp.lt.s32.totalorder %v671_v0, 2 }
  0xd0   :  { %v5497_v53 = vmul.u32.u64.low %v5409_v29, %v728_v39  ;;  %v5498_v27 = vmul.u32.u64.high %v5409_v29, %v728_v39, %v5497_v53  ;;  %vm673_vm4 = vcmp.eq.s32.totalorder %v671_v0, 0  ;;  %vm1502_vm0 = vcmp.eq.s32.totalorder %v5407_v35, 2 }
  0xd1   :  { %v800_v7 = vsub.s32 32, %v799_v31  ;;  %vm676_vm5 = vcmp.eq.s32.totalorder %v671_v0, 2  ;;  %v736_v16 = vmul.u32 %v5409_v29, %v720_v60  ;;  %v5505_v58 = vmul.f32 %v5302_v57, %v5044_v13 }
  0xd2   :  { %v5508_v50 = vmul.f32 %v1717_v6, %v5493_v34  ;;  %v739_v21 = vadd.s32 1, %v5488_v47  ;;  %v5514_v25 = vmul.f32 %v5308_v46, %v5072_v52  ;;  %vm738_vm6 = vc.u32 %v5498_v27, %v5487_v28 }
  0xd3   :  { %v5518_v29 = vshrl.u32 %v797_v30, 5  ;;  %v6787_v20 = vmov 683565275   ;;  %v6788_v1 = vmov 2475754826   ;;  %vm683_vm11 = vcmp.lt.s32.totalorder %v5368_v40, 0 }
  0xd4   :  { %v802_v57 = vshll.u32 %v6787_v20, %v799_v31  ;;  %v805_v45 = vshll.u32 %v6788_v1, %v799_v31  ;;  %v740_v22 = vsel %vm738_vm6, %v739_v21, %v5488_v47  ;;  %v803_v48 = vshrl.u32 %v6788_v1, %v800_v7 }
  0xd5   :  { %v4572_v41 = vpop.eup %4571  ;;  %v6789_v10 = vmov 2131351028   ;;  %v741_v9 = vadd.s32 %v740_v22, %v736_v16  ;;  %v6790_v60 = vmov 2102212464   ;;  %v6791_v14 = vmov 920167782  }
  0xd6   :  { %v4574_v26 = vpop.eup %4573  ;;  %v677_v6 = vxor.u32 2147483648, %v4572_v41  ;;  %v808_v43 = vshll.u32 %v6789_v10, %v799_v31  ;;  %v811_v37 = vshll.u32 %v6790_v60, %v799_v31  ;;  %v812_v39 = vshrl.u32 %v6791_v14, %v800_v7 }
  0xd7   :  { %v674_v46 = vxor.u32 2147483648, %v4574_v26  ;;  %v806_v32 = vshrl.u32 %v6789_v10, %v800_v7  ;;  %v814_v33 = vshll.u32 %v6791_v14, %v799_v31  ;;  %v742_v1 = vadd.s32 536870912, %v741_v9 }
  0xd8   :  { %v678_v30 = vsel %vm676_vm5, %v677_v6, %v4574_v26  ;;  %v1504_v53 = vsel %vm1502_vm0, %v677_v6, %v4574_v26  ;;  %v809_v16 = vshrl.u32 %v6790_v60, %v800_v7  ;;  %v804_v5 = vor.u32 %v803_v48, %v802_v57  ;;  %v4470_v48 = vld [vmem:[#allocation2 + $0x4] ss:$12 sps:$4 sm:$0xff]  }
  0xd9   :  { %v675_v47 = vsel %vm673_vm4, %v4572_v41, %v674_v46  ;;  %v1501_v21 = vsel %vm1499_vm15, %v4572_v41, %v674_v46  ;;  %v815_v26 = vshrl.u32 %v6792_v24, %v800_v7  ;;  %v5544_v10 = vshrl.u32 %v742_v1, 30  ;;  %2247 = vmatprep.subr.bf16.mxu0 %v4470_v48 }
  0xda   :  { %v679_v22 = vsel %vm672_vm3, %v675_v47, %v678_v30  ;;  %v1505_v15 = vsel %vm1498_vm13, %v1501_v21, %v1504_v53  ;;  %v813_v41 = vor.u32 %v812_v39, %v811_v37  ;;  %v807_v0 = vor.u32 %v806_v32, %v805_v45  ;;  %v4473_v47 = vld [vmem:[#allocation2 + $0x1c] ss:$12 sps:$4 sm:$0xff]   ;;  %v4475_v21 = vld [vmem:[#allocation2 + $0x18] ss:$12 sps:$4 sm:$0xff]  }
  0xdb   :  { %v680_v6 = vsel %vm669_vm14, nan, %v679_v22  ;;  %v1506_v31 = vsel %vm669_vm14, nan, %v1505_v15  ;;  %vm820_vm7 = vcmp.lt.s32.totalorder %v5518_v29, 4  ;;  %v1749_v35 = vmul.f32 2.0, %v5508_v50 }
  0xdc   :  { %v1718_v46 = vmul.f32 2.0, %v680_v6  ;;  %v4322_v60 = vpack.i.bf16 %v680_v6, %v5441_v2  ;;  %v744_v57 = vshll.u32 %v5544_v10, 30  ;;  %v810_v24 = vor.u32 %v809_v16, %v808_v43  ;;  %v4472_v2 = vld [vmem:[#allocation2] ss:$12 sps:$4 sm:$0xff]  }
  0xdd   :  { %vm817_vm8 = vcmp.lt.s32.totalorder %v5518_v29, 1  ;;  %v4327_v15 = vpack.i.bf16 %v1506_v31, %v5493_v34  ;;  %v816_v37 = vor.u32 %v815_v26, %v814_v33  ;;  %vm819_vm1 = vcmp.lt.s32.totalorder %v5518_v29, 3  ;;  %2248 = vmatpush1.bf16.msra.mxu0 %v4472_v2 }
  0xde   :  { %v5551_v14 = vmul.f32 %v1718_v46, %v1506_v31  ;;  %4323 = vrot.lane.b32.xlu0 %v4322_v60, %s4617_s23  ;;  %v1734_v32 = vmul.f32 %v1718_v46, %v680_v6  ;;  %v5556_v45 = vsub.s32 %v741_v9, %v744_v57  ;;  %v801_v39 = vshrl.u32 %v6787_v20, %v800_v7 }
  0xdf   :  { %v826_v43 = vsel %vm820_vm7, %v813_v41, 920167782  ;;  %vm818_vm2 = vcmp.lt.s32.totalorder %v5518_v29, 2  ;;  %v822_v34 = vsel %vm820_vm7, %v810_v24, 2102212464  ;;  %v825_v33 = vsel %vm817_vm8, %v804_v5, %v807_v0  ;;  %2249 = vmatprep.subr.bf16.mxu0 %v4473_v47 }
  0xe0   :  { %v4342_v30 = vpack.i.bf16 %v5551_v14, %v5508_v50  ;;  %v5569_v9 = vmul.f32 2.0, %v5551_v14  ;;  %v747_v7 = vsub.s32 0, %v5556_v45  ;;  %v827_v20 = vsel %vm819_vm1, %v810_v24, %v826_v43 }
  0xe1   :  { %v829_v53 = vsel %vm817_vm8, %v807_v0, %v810_v24  ;;  %v830_v1 = vsel %vm820_vm7, %v816_v37, 1326507024  ;;  %v6793_v16 = vor.u32 8388608, %v5481_v61  ;;  %v1801_v26 = vsub.f32 1.0, %v5505_v58  ;;  %2250 = vmatpush1.bf16.msra.mxu0 %v4475_v21 }
  0xe2   :  { %4343 = vrot.lane.b32.xlu1 %v4342_v30, %s4625_s11  ;;  %4328 = vrot.lane.b32.xlu0 %v4327_v15, %s4624_s8  ;;  %v1802_v6 = vsub.f32 1.0, %v5514_v25  ;;  %v1742_v31 = vsub.f32 1.0, %v1734_v32  ;;  %v6794_v46 = vsub.f32 1.0, %v5473_v44  ;;  %v3972_v57 = vmin.u32 %v747_v7, %v5556_v45 }
  0xe3   :  { %v5582_v22 = vshll.u32 %v6793_v16, 8  ;;  %v831_v24 = vsel %vm819_vm1, %v813_v41, %v830_v1  ;;  %v821_v48 = vsel %vm817_vm8, %v801_v39, %v804_v5  ;;  %v823_v61 = vsel %vm819_vm1, %v807_v0, %v822_v34 }
  0xe4   :  { %v1757_v60 = vmul.f32 %v1749_v35, %v6794_v46  ;;  %v828_v58 = vsel %vm818_vm2, %v825_v33, %v827_v20  ;;  %v832_v25 = vsel %vm818_vm2, %v829_v53, %v831_v24  ;;  %v6795_v15 = vsub.f32 1.0, %v5262_v49  ;;  %v4481_v24 = vld [vmem:[#allocation2 + $0x48] ss:$12 sps:$4 sm:$0xff]  }
  0xe5   :  { %v6796_v37 = vsub.f32 1.0, %v5299_v62  ;;  %v1758_v41 = vmul.f32 %v5569_v9, %v1742_v31  ;;  %v749_v32 = vclz %v3972_v57  ;;  %v6797_v5 = vpack.i.bf16 %v5063_v42, %v5018_v51  ;;  %v4476_v51 = vld [vmem:[#allocation2 + $0x34] ss:$12 sps:$4 sm:$0xff]   ;;  %v4478_v42 = vld [vmem:[#allocation2 + $0x30] ss:$12 sps:$4 sm:$0xff]  }
  0xe6   :  { %4348 = vrot.lane.b32.xlu1 %v5109_v19, %s4626_s16  ;;  %v4367_v0 = vpack.i.bf16 %v5316_v54, %v5320_v56  ;;  %v5613_v49 = vmul.f32 %v1749_v35, %v5508_v50  ;;  %v5616_v62 = vmul.u32.u64.low %v5582_v22, %v832_v25  ;;  %v5617_v39 = vmul.u32.u64.high %v5582_v22, %v832_v25, %v5616_v62  ;;  %2251 = vmatprep.subr.bf16.mxu0 %v4476_v51  ;;  %v4479_v57 = vld [vmem:[#allocation2 + $0x4c] ss:$12 sps:$4 sm:$0xff]   ;;  %v4485_v51 = vld [vmem:[#allocation2 + $0x7c] ss:$12 sps:$4 sm:$0xff]  }
  0xe7   :  { %v4352_v2 = vpack.i.bf16 %v6796_v37, %v6795_v15  ;;  %4333 = vrot.lane.b32.xlu0 %v6797_v5, %s4625_s11  ;;  %v3973_v43 = vadd.s32 4294967294, %v749_v32  ;;  %v824_v30 = vsel %vm818_vm2, %v821_v48, %v823_v61  ;;  %v5626_v33 = vmul.f32 2.0, %v1757_v60  ;;  %2252 = vmatpush1.bf16.msra.mxu0 %v4478_v42  ;;  %v4482_v37 = vld [vmem:[#allocation2 + $0x64] ss:$12 sps:$4 sm:$0xff]  }
  0xe8   :  { %v5622_v19 = vmul.u32.u64.low %v5582_v22, %v828_v58  ;;  %v5623_v34 = vmul.u32.u64.high %v5582_v22, %v828_v58, %v5622_v19  ;;  %v737_v50 = vadd.s32 %v5487_v28, %v5498_v27  ;;  %v5630_v35 = vpack.i.bf16 %v1802_v6, %v1801_v26  ;;  %2253 = vmatprep.subr.bf16.mxu0 %v4479_v57 }
  0xe9   :  { %v6798_v7 = vsub.f32 1.0, %v5325_v63  ;;  %v6799_v20 = vsub.f32 1.0, %v5327_v38  ;;  %v6800_v53 = vmov %v6794_v46  ;;  %v4372_v21 = vpack.i.bf16 %v1758_v41, %v1757_v60 }
  0xea   :  { %v4357_v47 = vpack.i.bf16 %v1742_v31, %v6800_v53  ;;  %v1782_v1 = vmul.f32 2.0, %v1758_v41  ;;  %vm3974_vm9 = vcmp.lt.s32.totalorder %v3973_v43, 0  ;;  %4353 = vrot.lane.b32.xlu1 %v4352_v2, %s4626_s16  ;;  %v840_v27 = vmul.u32 %v5582_v22, %v824_v30  ;;  %v4484_v2 = vld [vmem:[#allocation2 + $0x60] ss:$12 sps:$4 sm:$0xff]  }
  0xeb   :  { %v5636_v29 = vpack.i.bf16 %v6799_v20, %v6798_v7  ;;  %4368 = vrot.lane.b32.xlu0 %v4367_v0, %s4627_s17  ;;  %v752_v28 = vsel %vm3974_vm9, 0, %v3973_v43  ;;  %vm842_vm10 = vc.u32 %v5617_v39, %v5622_v19  ;;  %v1795_v63 = vmul.f32 %v5343_v12, %v5320_v56  ;;  %2254 = vmatpush1.bf16.msra.mxu0 %v4481_v24 }
  0xec   :  { %v753_v38 = vsub.s32 32, %v752_v28  ;;  %v754_v44 = vshll.u32 %v5556_v45, %v752_v28  ;;  %v757_v16 = vsub.s32 4294967266, %v752_v28  ;;  %v843_v26 = vadd.s32 1, %v5623_v34  ;;  %2255 = vmatprep.subr.bf16.mxu0 %v4482_v37 }
  0xed   :  { %v1796_v6 = vmul.f32 %v5346_v23, %v5316_v54  ;;  %v1803_v31 = vsub.f32 1.0, %v1795_v63  ;;  %v1797_v46 = vmul.f32 %v5626_v33, %v1757_v60  ;;  %v1798_v22 = vmul.f32 %v1782_v1, %v1758_v41 }
  0xee   :  { %v5654_v48 = vmul.f32 %v5569_v9, %v5551_v14  ;;  %v755_v56 = vshrl.u32 %v737_v50, %v753_v38  ;;  %v758_v12 = vadd.s32 127, %v757_v16  ;;  %v844_v45 = vsel %vm842_vm10, %v843_v26, %v5623_v34  ;;  %4358 = vrot.lane.b32.xlu1 %v4357_v47, %s4626_s16  ;;  %v4487_v50 = vld [vmem:[#allocation2 + $0x78] ss:$12 sps:$4 sm:$0xff]  }
  0xef   :  { %4373 = vrot.lane.b32.xlu0 %v4372_v21, %s4627_s17  ;;  %v845_v54 = vadd.s32 %v844_v45, %v840_v27  ;;  %v1804_v23 = vsub.f32 1.0, %v1796_v6  ;;  %v1805_v60 = vsub.f32 1.0, %v1797_v46  ;;  %v1806_v61 = vsub.f32 1.0, %v1798_v22  ;;  %2256 = vmatpush1.bf16.msra.mxu0 %v4484_v2 }
  0xf0   :  { %v756_v58 = vor.u32 %v755_v56, %v754_v44  ;;  %v759_v25 = vshll.u32 %v758_v12, 23  ;;  %v6801_v5 = vpack.i.bf16 %v5072_v52, %v5044_v13  ;;  %v1773_v0 = vsub.f32 1.0, %v5613_v49  ;;  %2257 = vmatprep.subr.bf16.mxu0 %v4485_v51 }
  0xf1   :  { %v846_v14 = vadd.s32 536870912, %v845_v54  ;;  %v5662_v9 = vpack.i.bf16 %v1804_v23, %v1803_v31  ;;  %v5664_v15 = vpack.i.bf16 %v1806_v61, %v1805_v60  ;;  %v1774_v62 = vsub.f32 1.0, %v5654_v48 }
  0xf2   :  { %v760_v41 = vor.u32 4788187, %v759_v25  ;;  %v763_v32 = vcvt.s32.f32 %v756_v58  ;;  %4363 = vrot.lane.b32.xlu1 %v6801_v5, %s4627_s17  ;;  %v6802_v13 = vpack.i.bf16 %v5323_v59, %v5312_v11  ;;  %v1789_v52 = vmul.f32 %v5626_v33, %v1773_v0 }
  0xf3   :  { %4378 = vrot.lane.b32.xlu0 %v5353_v18, %s4628_s18  ;;  %v5674_v43 = vshrl.u32 %v846_v14, 30  ;;  %v1790_v18 = vmul.f32 %v1782_v1, %v1774_v62  ;;  %v6803_v20 = vand.u32 2147483647, %v5368_v40  ;;  %v767_v47 = vsub.s32 4, %v5544_v10  ;;  %2258 = vmatpush1.bf16.msra.mxu0 %v4487_v50 }
  0xf4   :  { %v761_v30 = vand.u32 2147483647, %v760_v41  ;;  %v6804_v59 = vpack.i.bf16 %v5366_v36, %v5358_v17  ;;  %v841_v16 = vadd.s32 %v5622_v19, %v5617_v39  ;;  %vm787_vm3 = vcmp.lt.s32.totalorder %v5372_v8, 0 }
  0xf5   :  { %v848_v34 = vshll.u32 %v5674_v43, 30  ;;  %vm682_vm12 = vcmp.le.f32.partialorder %v6803_v20, 0.7853982  ;;  %v4407_v33 = vpack.i.bf16 %v1790_v18, %v1789_v52  ;;  %v768_v27 = vsel %vm683_vm11, %v767_v47, %v5544_v10  ;;  %v4488_v20 = vld [vmem:[#allocation2 + $0x94] ss:$12 sps:$4 sm:$0xff]  }
  0xf6   :  { %v764_v42 = vmul.f32 %v763_v32, %v761_v30  ;;  %4398 = vrot.lane.b32.xlu1 %v6802_v13, %s4629_s19  ;;  %v770_v38 = vsel %vm682_vm12, 0, %v768_v27  ;;  %v871_v60 = vsub.s32 4, %v5674_v43  ;;  %v6805_v14 = vand.u32 2147483647, %v5372_v8  ;;  %2259 = vmatprep.subr.bf16.mxu0 %v4488_v20 }
  0xf7   :  { %v849_v7 = vsub.s32 %v845_v54, %v848_v34  ;;  %v774_v26 = vadd.s32 3, %v770_v38  ;;  %v1600_v61 = vand.u32 3, %v770_v38  ;;  %vm773_vm7 = vweird.f32 %v5368_v40 }
  0xf8   :  { %v765_v53 = vxor.u32 2147483648, %v764_v42  ;;  %vm786_vm0 = vcmp.le.f32.partialorder %v6805_v14, 0.7853982  ;;  %v872_v2 = vsel %vm787_vm3, %v871_v60, %v5674_v43  ;;  %v4631_v27 = vmov 0  }
  0xf9   :  { %v851_v21 = vsub.s32 0, %v849_v7  ;;  %v775_v57 = vand.u32 3, %v774_v26  ;;  %vm1602_vm5 = vcmp.eq.s32.totalorder %v1600_v61, 0  ;;  %vm1605_vm6 = vcmp.eq.s32.totalorder %v1600_v61, 2  ;;  %2279 = vmatprep.mubr.bf16.mxu0 %v4631_v27  ;;  %4462 = vset.pattern.permute.xlu0 %v4631_v27 }
  0xfa   :  { %v766_v11 = vsel %vm683_vm11, %v765_v53, %v764_v42  ;;  %4403 = vrot.lane.b32.xlu1 %v6804_v59, %s4629_s19  ;;  %vm1601_vm8 = vcmp.lt.s32.totalorder %v1600_v61, 2  ;;  %v874_v30 = vsel %vm786_vm0, 0, %v872_v2  ;;  %v4490_v53 = vld [vmem:[#allocation2 + $0x90] ss:$12 sps:$4 sm:$0xff]  }
  0xfb   :  { %v769_v1 = vsel %vm682_vm12, %v5368_v40, %v766_v11  ;;  %v3976_v28 = vmin.u32 %v851_v21, %v849_v7  ;;  %vm777_vm14 = vcmp.eq.s32.totalorder %v775_v57, 0  ;;  %vm780_vm15 = vcmp.eq.s32.totalorder %v775_v57, 2  ;;  %2260 = vmatpush1.bf16.msra.mxu0 %v4490_v53  ;;  %4463 = vset.pattern.permute.xlu1 %v4631_v27 }
  0xfc   :  { %4575 = vcosq.f32 %v769_v1  ;;  %vm776_vm4 = vcmp.lt.s32.totalorder %v775_v57, 2  ;;  %v878_v50 = vadd.s32 3, %v874_v30 }
  0xfd   :  { %4577 = vsinq.f32 %v769_v1  ;;  %v853_v63 = vclz %v3976_v28 }
  0xfe   :  { %4408 = vrot.lane.b32.xlu1 %v4407_v33, %s4629_s19  ;;  %v879_v43 = vand.u32 3, %v878_v50 }
  0xff   :  { %v3977_v44 = vadd.s32 4294967294, %v853_v63 }
 0x100   :  { %vm884_vm1 = vcmp.eq.s32.totalorder %v879_v43, 2  ;;  %vm881_vm9 = vcmp.eq.s32.totalorder %v879_v43, 0  ;;  %vm880_vm11 = vcmp.lt.s32.totalorder %v879_v43, 2 }
 0x101   :  { %vm3978_vm13 = vcmp.lt.s32.totalorder %v3977_v44, 0 }
 0x102   :  { %v856_v17 = vsel %vm3978_vm13, 0, %v3977_v44  ;;  %4413 = vrot.lane.b32.xlu1 %v5630_v35, %s4630_s20  ;;  %vm877_vm13 = vweird.f32 %v5372_v8 }
 0x103   :  { %v857_v36 = vsub.s32 32, %v856_v17  ;;  %v858_v6 = vshll.u32 %v849_v7, %v856_v17  ;;  %v861_v31 = vsub.s32 4294967266, %v856_v17  ;;  %v1703_v7 = vand.u32 3, %v874_v30 }
 0x105   :  { %v859_v10 = vshrl.u32 %v841_v16, %v857_v36  ;;  %v862_v46 = vadd.s32 127, %v861_v31  ;;  %vm1708_vm2 = vcmp.eq.s32.totalorder %v1703_v7, 2  ;;  %vm1705_vm10 = vcmp.eq.s32.totalorder %v1703_v7, 0 }
 0x106   :  { %v4576_v22 = vpop.eup %4575  ;;  %vm1704_vm12 = vcmp.lt.s32.totalorder %v1703_v7, 2 }
 0x107   :  { %v4578_v24 = vpop.eup %4577  ;;  %v860_v56 = vor.u32 %v859_v10, %v858_v6  ;;  %v863_v12 = vshll.u32 %v862_v46, 23  ;;  %v781_v19 = vxor.u32 2147483648, %v4576_v22 }
 0x108   :  { %v778_v39 = vxor.u32 2147483648, %v4578_v24 }
 0x109   :  { %v864_v45 = vor.u32 4788187, %v863_v12  ;;  %v867_v54 = vcvt.s32.f32 %v860_v56  ;;  %v782_v25 = vsel %vm780_vm15, %v781_v19, %v4578_v24  ;;  %v1607_v51 = vsel %vm1605_vm6, %v781_v19, %v4578_v24 }
 0x10a   :  { %v779_v58 = vsel %vm777_vm14, %v4576_v22, %v778_v39  ;;  %v1604_v34 = vsel %vm1602_vm5, %v4576_v22, %v778_v39  ;;  %vm6765_vm14 = vcmask 97280   ;;  %vm2074_vm15 = vcmask 195584  }
 0x10b   :  { %v865_v23 = vand.u32 2147483647, %v864_v45  ;;  %v783_v41 = vsel %vm776_vm4, %v779_v58, %v782_v25  ;;  %v1608_v13 = vsel %vm1601_vm8, %v1604_v34, %v1607_v51  ;;  %v4304_v34 = vpop.permute.xlu0 %4303  ;;  %v4493_v51 = vld [vmem:[#allocation2 + $0xd8] ss:$12 sps:$4 sm:$0xff]   ;;  %vm2092_vm4 = vcmask 392192  }
 0x10c   :  { %v784_v42 = vsel %vm773_vm7, nan, %v783_v41  ;;  %v5708_v18 = vsel %vm773_vm7, nan, %v1608_v13  ;;  %vm2110_vm5 = vcmask 588800   ;;  %vm2119_vm6 = vcmask 687104  }
 0x10d   :  { %v868_v35 = vmul.f32 %v867_v54, %v865_v23  ;;  %v1719_v52 = vmul.f32 2.0, %v784_v42  ;;  %v4392_v23 = vpack.i.bf16 %v1774_v62, %v1773_v0  ;;  %vm2128_vm7 = vcmask 785408  }
 0x10e   :  { %vm2137_vm8 = vcmask 883712  }
 0x10f   :  { %v869_v37 = vxor.u32 2147483648, %v868_v35  ;;  %v1727_v47 = vmul.f32 %v1719_v52, %v5708_v18  ;;  %v1735_v21 = vmul.f32 %v1719_v52, %v784_v42 }
 0x111   :  { %v870_v32 = vsel %vm787_vm3, %v869_v37, %v868_v35  ;;  %v1751_v28 = vmul.f32 2.0, %v1727_v47  ;;  %v1743_v44 = vsub.f32 1.0, %v1735_v21  ;;  %vm2083_vm3 = vcmask 293888  }
 0x112   :  { %v873_v5 = vsel %vm786_vm0, %v5372_v8, %v870_v32  ;;  %v4491_v32 = vld [vmem:[#allocation2 + $0xa8] ss:$12 sps:$4 sm:$0xff]   ;;  %vm2101_vm0 = vcmask 490496  }
 0x113   :  { %4579 = vcosq.f32 %v873_v5  ;;  %v1767_v10 = vmul.f32 %v1751_v28, %v1727_v47  ;;  %v1759_v57 = vmul.f32 %v1751_v28, %v1743_v44  ;;  %4141 = vmatprep.subr.bf16.mxu1 %v4491_v32 }
 0x114   :  { %4581 = vsinq.f32 %v873_v5  ;;  %v4492_v5 = vld [vmem:[#allocation2 + $0xc0] ss:$12 sps:$4 sm:$0xff]   ;;  %4142 = vmatpush3.bf16.msra.mxu1 %v4491_v32 }
 0x115   :  { %v1775_v12 = vsub.f32 1.0, %v1767_v10  ;;  %v1783_v19 = vmul.f32 2.0, %v1759_v57  ;;  %4143 = vmatprep.subr.bf16.mxu1 %v4492_v5 }
 0x117   :  { %v1791_v25 = vmul.f32 %v1783_v19, %v1775_v12  ;;  %v1799_v48 = vmul.f32 %v1783_v19, %v1759_v57 }
 0x118   :  { %4144 = vmatpush3.bf16.msra.mxu1 %v4492_v5 }
 0x119   :  { %v1807_v41 = vsub.f32 1.0, %v1799_v48  ;;  %4145 = vmatprep.subr.bf16.mxu1 %v4493_v51 }
 0x11c   :  { %4146 = vmatpush3.bf16.msra.mxu1 %v4493_v51  ;;  %v5739_v52 = vpop.permute.xlu1 %4338  ;;  %v6807_v51 = vld [vmem:[#allocation5_spill] sm:$0xff] }
 0x11d   :  { %v4580_v11 = vpop.eup %4579 }
 0x11e   :  { %v4582_v59 = vpop.eup %4581  ;;  %v885_v33 = vxor.u32 2147483648, %v4580_v11 }
 0x11f   :  { %v882_v1 = vxor.u32 2147483648, %v4582_v59 }
 0x120   :  { %v886_v63 = vsel %vm884_vm1, %v885_v33, %v4582_v59  ;;  %v1710_v38 = vsel %vm1708_vm2, %v885_v33, %v4582_v59  ;;  %v4306_v33 = vunpack.i.h.bf16 %v4304_v34  ;;  %vm2234_vm1 = vcmask 916480  }
 0x121   :  { %v883_v16 = vsel %vm881_vm9, %v4580_v11, %v882_v1  ;;  %v1707_v26 = vsel %vm1705_vm10, %v4580_v11, %v882_v1  ;;  %v4305_v1 = vunpack.i.l.bf16 %v4304_v34  ;;  %vm2883_vm2 = vcmask 261120  }
 0x122   :  { %v887_v17 = vsel %vm880_vm11, %v883_v16, %v886_v63  ;;  %v1711_v36 = vsel %vm1704_vm12, %v1707_v26, %v1710_v38 }
 0x123   :  { %v888_v6 = vsel %vm877_vm13, nan, %v887_v17  ;;  %v1712_v31 = vsel %vm877_vm13, nan, %v1711_v36  ;;  %v2066_v16 = vsel %vm6765_vm14, %v4686_v3, %v4305_v1 }
 0x124   :  { %v1720_v46 = vmul.f32 2.0, %v888_v6  ;;  %v4382_v22 = vpack.i.bf16 %v888_v6, %v784_v42  ;;  %v4437_v49 = vpack.i.bf16 %v1712_v31, %v5708_v18  ;;  %v4309_v42 = vpop.permute.xlu0 %4308 }
 0x126   :  { %v1728_v24 = vmul.f32 %v1720_v46, %v1712_v31  ;;  %v1736_v56 = vmul.f32 %v1720_v46, %v888_v6  ;;  %4383 = vrot.lane.b32.xlu0 %v4382_v22, %s4617_s23 }
 0x128   :  { %v1744_v45 = vsub.f32 1.0, %v1736_v56  ;;  %v4417_v54 = vpack.i.bf16 %v1728_v24, %v1727_v47  ;;  %v1752_v39 = vmul.f32 2.0, %v1728_v24  ;;  %v5735_v50 = vpop.permute.xlu0 %4313 }
 0x129   :  { %v4316_v32 = vunpack.i.h.bf16 %v5735_v50  ;;  %v4315_v5 = vunpack.i.l.bf16 %v5735_v50 }
 0x12a   :  { %4388 = vrot.lane.b32.xlu0 %v5636_v29, %s4628_s18  ;;  %4418 = vrot.lane.b32.xlu1 %v4417_v54, %s4625_s11  ;;  %v1760_v60 = vmul.f32 %v1752_v39, %v1744_v45  ;;  %v1768_v61 = vmul.f32 %v1752_v39, %v1728_v24  ;;  %v4447_v62 = vpack.i.bf16 %v1744_v45, %v1743_v44  ;;  %v4310_v45 = vunpack.i.l.bf16 %v4309_v42 }
 0x12b   :  { %v2067_v44 = vsel %vm6765_vm14, %v4688_v4, %v4306_v33 }
 0x12c   :  { %v1776_v35 = vsub.f32 1.0, %v1768_v61  ;;  %v1784_v58 = vmul.f32 2.0, %v1760_v60  ;;  %v4422_v14 = vpack.i.bf16 %v1760_v60, %v1759_v57  ;;  %v5737_v13 = vpop.permute.xlu0 %4318 }
 0x12e   :  { %4393 = vrot.lane.b32.xlu0 %v4392_v23, %s4628_s18  ;;  %4428 = vrot.lane.b32.xlu1 %v5662_v9, %s4630_s20  ;;  %v1792_v37 = vmul.f32 %v1784_v58, %v1776_v35  ;;  %v1800_v0 = vmul.f32 %v1784_v58, %v1760_v60  ;;  %v4452_v2 = vpack.i.bf16 %v1776_v35, %v1775_v12  ;;  %v4311_v12 = vunpack.i.h.bf16 %v4309_v42 }
 0x12f   :  { %v2068_v42 = vsel %vm6765_vm14, %v6807_v51, %v4315_v5 }
 0x130   :  { %v4432_v29 = vpack.i.bf16 %v1792_v37, %v1791_v25  ;;  %v1808_v9 = vsub.f32 1.0, %v1800_v0 }
 0x132   :  { %4423 = vrot.lane.b32.xlu0 %v4422_v14, %s4627_s17  ;;  %4433 = vrot.lane.b32.xlu1 %v4432_v29, %s4629_s19  ;;  %v4457_v30 = vpack.i.bf16 %v1808_v9, %v1807_v41 }
 0x136   :  { %4438 = vrot.lane.b32.xlu0 %v4437_v49, %s4624_s8  ;;  %4443 = vrot.lane.b32.xlu1 %v5664_v15, %s4630_s20  ;;  %v4494_v15 = vld [vmem:[#allocation2 + $0xf0] ss:$12 sps:$4 sm:$0xff]  }
 0x137   :  { %4147 = vmatprep.subr.bf16.mxu1 %v4494_v15 }
 0x138   :  { %4148 = vmatpush3.bf16.msra.mxu1 %v4494_v15  ;;  %v4341_v15 = vunpack.i.h.bf16 %v5739_v52 }
 0x13a   :  { %4448 = vrot.lane.b32.xlu1 %v4447_v62, %s4626_s16  ;;  %4453 = vrot.lane.b32.xlu0 %v4452_v2, %s4628_s18 }
 0x13e   :  { %4458 = vrot.lane.b32.xlu1 %v4457_v30, %s4630_s20  ;;  %v6806_v30 = vld [vmem:[#allocation6_spill] sm:$0xff] }
 0x13f   :  { %v2069_v34 = vsel %vm6765_vm14, %v6806_v30, %v4316_v32 }
 0x150   :  { %v5741_v18 = vpop.permute.xlu0 %4323 }
 0x151   :  { %v4326_v33 = vunpack.i.h.bf16 %v5741_v18  ;;  %v4325_v1 = vunpack.i.l.bf16 %v5741_v18 }
 0x154   :  { %v5743_v43 = vpop.permute.xlu1 %4343  ;;  %v5745_v7 = vpop.permute.xlu0 %4328 }
 0x158   :  { %v4349_v20 = vpop.permute.xlu1 %4348 }
 0x159   :  { %v4334_v47 = vpop.permute.xlu0 %4333  ;;  %v4351_v61 = vunpack.i.h.bf16 %v4349_v20  ;;  %v4350_v35 = vunpack.i.l.bf16 %v4349_v20  ;;  %v4340_v20 = vunpack.i.l.bf16 %v5739_v52 }
 0x15a   :  { %v4336_v28 = vunpack.i.h.bf16 %v4334_v47  ;;  %v4335_v63 = vunpack.i.l.bf16 %v4334_v47 }
 0x15c   :  { %v5747_v53 = vpop.permute.xlu1 %4353  ;;  %v2076_v6 = vsel %vm2074_vm15, %v2067_v44, %v4336_v28  ;;  %v2075_v31 = vsel %vm2074_vm15, %v2066_v16, %v4335_v63  ;;  %v2077_v63 = vsel %vm2074_vm15, %v2068_v42, %v4340_v20  ;;  %v4321_v16 = vunpack.i.h.bf16 %v5737_v13 }
 0x15d   :  { %v5751_v11 = vpop.permute.xlu0 %4368 }
 0x15e   :  { %v4371_v47 = vunpack.i.h.bf16 %v5751_v11 }
 0x160   :  { %v5749_v21 = vpop.permute.xlu1 %4358 }
 0x161   :  { %v5757_v26 = vpop.permute.xlu0 %4373 }
 0x164   :  { %v4364_v59 = vpop.permute.xlu1 %4363 }
 0x165   :  { %v4366_v17 = vunpack.i.h.bf16 %v4364_v59  ;;  %v4365_v36 = vunpack.i.l.bf16 %v4364_v59  ;;  %v4379_v56 = vpop.permute.xlu0 %4378  ;;  %v4370_v59 = vunpack.i.l.bf16 %v5751_v11  ;;  %v2071_v11 = vsel %vm6765_vm14, %v5086_v55, %v4326_v33 }
 0x166   :  { %v4381_v23 = vunpack.i.h.bf16 %v4379_v56  ;;  %v4380_v60 = vunpack.i.l.bf16 %v4379_v56 }
 0x167   :  { %v2085_v57 = vsel %vm2083_vm3, %v2076_v6, %v4366_v17  ;;  %v2084_v4 = vsel %vm2083_vm3, %v2075_v31, %v4365_v36  ;;  %v4320_v17 = vunpack.i.l.bf16 %v5737_v13  ;;  %v2086_v36 = vsel %vm2083_vm3, %v2077_v63, %v4370_v59  ;;  %v6808_v6 = vld [vmem:[#allocation7_spill] sm:$0xff] }
 0x168   :  { %v4399_v38 = vpop.permute.xlu1 %4398  ;;  %v2070_v18 = vsel %vm6765_vm14, %v6808_v6, %v4325_v1  ;;  %v4376_v13 = vunpack.i.h.bf16 %v5757_v26  ;;  %v4360_v59 = vunpack.i.l.bf16 %v5749_v21 }
 0x169   :  { %v4401_v10 = vunpack.i.h.bf16 %v4399_v38  ;;  %v4400_v46 = vunpack.i.l.bf16 %v4399_v38  ;;  %v2078_v38 = vsel %vm2074_vm15, %v2069_v34, %v4341_v15 }
 0x16a   :  { %v2087_v52 = vsel %vm2083_vm3, %v2078_v38, %v4371_v47 }
 0x16b   :  { %v2094_v3 = vsel %vm2092_vm4, %v2085_v57, %v4401_v10  ;;  %v2093_v24 = vsel %vm2092_vm4, %v2084_v4, %v4400_v46  ;;  %v4346_v46 = vunpack.i.h.bf16 %v5743_v43  ;;  %v4375_v57 = vunpack.i.l.bf16 %v5757_v26 }
 0x16c   :  { %v4404_v22 = vpop.permute.xlu1 %4403  ;;  %v2103_v39 = vsel %vm2101_vm0, %v2094_v3, %v4311_v12  ;;  %v2102_v19 = vsel %vm2101_vm0, %v2093_v24, %v4310_v45 }
 0x16d   :  { %v2111_v25 = vsel %vm2110_vm5, %v2102_v19, %v4350_v35  ;;  %v2112_v14 = vsel %vm2110_vm5, %v2103_v39, %v4351_v61  ;;  %v4406_v28 = vunpack.i.h.bf16 %v4404_v22  ;;  %v4405_v50 = vunpack.i.l.bf16 %v4404_v22 }
 0x16e   :  { %v2120_v49 = vsel %vm2119_vm6, %v2111_v25, %v4380_v60  ;;  %v2121_v48 = vsel %vm2119_vm6, %v2112_v14, %v4381_v23  ;;  %v4345_v22 = vunpack.i.l.bf16 %v5743_v43  ;;  %v2080_v12 = vsel %vm2074_vm15, %v2071_v11, %v4346_v46 }
 0x16f   :  { %v2096_v31 = vsel %vm2092_vm4, %v2087_v52, %v4406_v28  ;;  %v2095_v10 = vsel %vm2092_vm4, %v2086_v36, %v4405_v50  ;;  %v4356_v43 = vunpack.i.h.bf16 %v5747_v53  ;;  %v4355_v19 = vunpack.i.l.bf16 %v5747_v53 }
 0x170   :  { %v5765_v54 = vpop.permute.xlu1 %4408  ;;  %v2079_v56 = vsel %vm2074_vm15, %v2070_v18, %v4345_v22  ;;  %v2105_v45 = vsel %vm2101_vm0, %v2096_v31, %v4321_v16  ;;  %v2104_v39 = vsel %vm2101_vm0, %v2095_v10, %v4320_v17  ;;  %v4331_v60 = vunpack.i.h.bf16 %v5745_v7 }
 0x171   :  { %v4411_v4 = vunpack.i.h.bf16 %v5765_v54  ;;  %v4410_v3 = vunpack.i.l.bf16 %v5765_v54  ;;  %v4330_v54 = vunpack.i.l.bf16 %v5745_v7  ;;  %v2089_v61 = vsel %vm2083_vm3, %v2080_v12, %v4376_v13 }
 0x172   :  { %v2088_v35 = vsel %vm2083_vm3, %v2079_v56, %v4375_v57  ;;  %v2113_v14 = vsel %vm2110_vm5, %v2104_v39, %v4355_v19  ;;  %v4361_v7 = vunpack.i.h.bf16 %v5749_v21 }
 0x173   :  { %v2097_v25 = vsel %vm2092_vm4, %v2088_v35, %v4410_v3 }
 0x174   :  { %v4414_v58 = vpop.permute.xlu1 %4413  ;;  %v2106_v32 = vsel %vm2101_vm0, %v2097_v25, %v4330_v54 }
 0x175   :  { %v4416_v37 = vunpack.i.h.bf16 %v4414_v58  ;;  %v4415_v29 = vunpack.i.l.bf16 %v4414_v58  ;;  %v2098_v58 = vsel %vm2092_vm4, %v2089_v61, %v4411_v4  ;;  %v2115_v16 = vsel %vm2110_vm5, %v2106_v32, %v4360_v59  ;;  %v4498_v32 = vld [vmem:[#allocation2 + $0x150] ss:$12 sps:$4 sm:$0xff]  }
 0x177   :  { %v2129_v0 = vsel %vm2128_vm7, %v2120_v49, %v4415_v29  ;;  %v2130_v62 = vsel %vm2128_vm7, %v2121_v48, %v4416_v37  ;;  %v2114_v37 = vsel %vm2110_vm5, %v2105_v45, %v4356_v43 }
 0x178   :  { %v2138_v2 = vsel %vm2137_vm8, %v2129_v0, 0.0  ;;  %v2139_v41 = vsel %vm2137_vm8, %v2130_v62, 0.0 }
 0x179   :  { %v2146_v9 = vpack.c.bf16 %v2139_v41, %v2138_v2 }
 0x17b   :  { %4025 = vmatmul.mubr.msk.bf16.vlgmr.msra.gmra.mrb[0].mxu0 %vm2234_vm1, %v2146_v9  ;;  %v2107_v9 = vsel %vm2101_vm0, %v2098_v58, %v4331_v60 }
 0x17c   :  { %2289 = vmatprep.mubr.bf16.mxu0 %v4631_v27  ;;  %v2116_v17 = vsel %vm2110_vm5, %v2107_v9, %v4361_v7  ;;  %v4497_v9 = vld [vmem:[#allocation2 + $0x138] ss:$12 sps:$4 sm:$0xff]  }
 0x198   :  { %v4384_v44 = vpop.permute.xlu0 %4383 }
 0x199   :  { %v4386_v49 = vunpack.i.h.bf16 %v4384_v44  ;;  %v4385_v48 = vunpack.i.l.bf16 %v4384_v44 }
 0x19b   :  { %v2073_v33 = vsel %vm6765_vm14, %v5372_v8, %v4386_v49  ;;  %v2072_v1 = vsel %vm6765_vm14, %v5368_v40, %v4385_v48 }
 0x19c   :  { %v4389_v55 = vpop.permute.xlu0 %4388  ;;  %v4419_v24 = vpop.permute.xlu1 %4418 }
 0x19d   :  { %v4391_v23 = vunpack.i.h.bf16 %v4389_v55  ;;  %v4390_v26 = vunpack.i.l.bf16 %v4389_v55  ;;  %v4421_v34 = vunpack.i.h.bf16 %v4419_v24  ;;  %v4420_v51 = vunpack.i.l.bf16 %v4419_v24 }
 0x19f   :  { %v2122_v2 = vsel %vm2119_vm6, %v2113_v14, %v4390_v26  ;;  %v2123_v41 = vsel %vm2119_vm6, %v2114_v37, %v4391_v23  ;;  %v2082_v52 = vsel %vm2074_vm15, %v2073_v33, %v4421_v34  ;;  %v2081_v36 = vsel %vm2074_vm15, %v2072_v1, %v4420_v51  ;;  %v4501_v34 = vld [vmem:[#allocation2 + $0x198] ss:$12 sps:$4 sm:$0xff]   ;;  %v4502_v51 = vld [vmem:[#allocation2 + $0x1b0] ss:$12 sps:$4 sm:$0xff]  }
 0x1a0   :  { %v4394_v29 = vpop.permute.xlu0 %4393  ;;  %v4429_v53 = vpop.permute.xlu1 %4428 }
 0x1a1   :  { %v4431_v0 = vunpack.i.h.bf16 %v4429_v53  ;;  %v4430_v62 = vunpack.i.l.bf16 %v4429_v53  ;;  %v4396_v50 = vunpack.i.h.bf16 %v4394_v29  ;;  %v4395_v63 = vunpack.i.l.bf16 %v4394_v29 }
 0x1a3   :  { %v2131_v5 = vsel %vm2128_vm7, %v2122_v2, %v4430_v62  ;;  %v2132_v30 = vsel %vm2128_vm7, %v2123_v41, %v4431_v0  ;;  %v2124_v46 = vsel %vm2119_vm6, %v2115_v16, %v4395_v63  ;;  %v2125_v22 = vsel %vm2119_vm6, %v2116_v17, %v4396_v50  ;;  %v4495_v2 = vld [vmem:[#allocation2 + $0x108] ss:$12 sps:$4 sm:$0xff]   ;;  %v4496_v41 = vld [vmem:[#allocation2 + $0x120] ss:$12 sps:$4 sm:$0xff]  }
 0x1a4   :  { %v4424_v42 = vpop.permute.xlu0 %4423  ;;  %v4434_v15 = vpop.permute.xlu1 %4433  ;;  %v2140_v20 = vsel %vm2137_vm8, %v2131_v5, 0.0  ;;  %v2141_v47 = vsel %vm2137_vm8, %v2132_v30, 0.0  ;;  %4149 = vmatprep.subr.bf16.mxu1 %v4495_v2  ;;  %v4499_v5 = vld [vmem:[#allocation2 + $0x168] ss:$12 sps:$4 sm:$0xff]   ;;  %v4500_v30 = vld [vmem:[#allocation2 + $0x180] ss:$12 sps:$4 sm:$0xff]  }
 0x1a5   :  { %v4425_v28 = vunpack.i.l.bf16 %v4424_v42  ;;  %v4426_v38 = vunpack.i.h.bf16 %v4424_v42  ;;  %v2147_v44 = vpack.c.bf16 %v2141_v47, %v2140_v20  ;;  %v4436_v21 = vunpack.i.h.bf16 %v4434_v15  ;;  %4150 = vmatpush3.bf16.msra.mxu1 %v4495_v2  ;;  %4165 = vmatprep.subr.bf16.mxu0 %v4499_v5  ;;  %v4503_v42 = vld [vmem:[#allocation2 + $0x1c8] ss:$12 sps:$4 sm:$0xff]   ;;  %v5868_v47 = vld [vmem:[#allocation2 + $0x438] sm:$0x1] }
 0x1a6   :  { %v4435_v11 = vunpack.i.l.bf16 %v4434_v15  ;;  %4151 = vmatprep.subr.bf16.mxu1 %v4496_v41  ;;  %4166 = vmatpush3.bf16.msra.mxu0 %v4499_v5  ;;  %v2322_v15 = vlaneseq  ;;  %v2321_v59 = vunpack.c.l.bf16 %v5868_v47  ;;  %v4519_v2 = vld [vmem:[#allocation2 + $0x288] ss:$12 sps:$4 sm:$0xff]  }
 0x1a7   :  { %4026 = vmatmul.mubr.msk.bf16.gmra.mrb[4].mxu0 %vm2234_vm1, %v2147_v44  ;;  %v2090_v40 = vsel %vm2083_vm3, %v2081_v36, %v4425_v28  ;;  %v2091_v13 = vsel %vm2083_vm3, %v2082_v52, %v4426_v38  ;;  %4167 = vmatprep.subr.bf16.mxu0 %v4500_v30 }
 0x1a8   :  { %v4439_v8 = vpop.permute.xlu0 %4438  ;;  %v4444_v6 = vpop.permute.xlu1 %4443  ;;  %2299 = vmatprep.mubr.bf16.mxu0 %v4631_v27  ;;  %v2099_v55 = vsel %vm2092_vm4, %v2090_v40, %v4435_v11  ;;  %v2100_v39 = vsel %vm2092_vm4, %v2091_v13, %v4436_v21  ;;  %v5866_v20 = vshrl.u32 %v2322_v15, 7 }
 0x1a9   :  { %v4440_v18 = vunpack.i.l.bf16 %v4439_v8  ;;  %v4446_v31 = vunpack.i.h.bf16 %v4444_v6  ;;  %v4445_v10 = vunpack.i.l.bf16 %v4444_v6  ;;  %v4441_v57 = vunpack.i.h.bf16 %v4439_v8  ;;  %4152 = vmatpush3.bf16.msra.mxu1 %v4496_v41  ;;  %v4524_v41 = vld [vmem:[#allocation2 + $0x2a4] ss:$12 sps:$4 sm:$0xff]  }
 0x1aa   :  { %4153 = vmatprep.subr.bf16.mxu1 %v4497_v9  ;;  %4168 = vmatpush3.bf16.msra.mxu0 %v4500_v30  ;;  %v2324_v33 = vsub.s32 0, %v5866_v20 }
 0x1ab   :  { %v2133_v4 = vsel %vm2128_vm7, %v2124_v46, %v4445_v10  ;;  %v2134_v3 = vsel %vm2128_vm7, %v2125_v22, %v4446_v31  ;;  %v2108_v43 = vsel %vm2101_vm0, %v2099_v55, %v4440_v18  ;;  %v2109_v26 = vsel %vm2101_vm0, %v2100_v39, %v4441_v57  ;;  %4169 = vmatprep.subr.bf16.mxu0 %v4501_v34 }
 0x1ac   :  { %v4449_v24 = vpop.permute.xlu1 %4448  ;;  %v4454_v56 = vpop.permute.xlu0 %4453  ;;  %v2142_v12 = vsel %vm2137_vm8, %v2133_v4, 0.0  ;;  %v2143_v45 = vsel %vm2137_vm8, %v2134_v3, 0.0  ;;  %v2325_v1 = vrot.slane %v2321_v59, %v2324_v33 }
 0x1ad   :  { %v4451_v19 = vunpack.i.h.bf16 %v4449_v24  ;;  %v4450_v23 = vunpack.i.l.bf16 %v4449_v24  ;;  %v4456_v60 = vunpack.i.h.bf16 %v4454_v56  ;;  %v4455_v54 = vunpack.i.l.bf16 %v4454_v56  ;;  %4154 = vmatpush3.bf16.msra.mxu1 %v4497_v9  ;;  %v4522_v9 = vld [vmem:[#allocation2 + $0x2a0] ss:$12 sps:$4 sm:$0xff]  }
 0x1ae   :  { %v2148_v61 = vpack.c.bf16 %v2143_v45, %v2142_v12  ;;  %4155 = vmatprep.subr.bf16.mxu1 %v4498_v32  ;;  %4170 = vmatpush3.bf16.msra.mxu0 %v4501_v34 }
 0x1af   :  { %v2117_v35 = vsel %vm2110_vm5, %v2108_v43, %v4450_v23  ;;  %v2118_v58 = vsel %vm2110_vm5, %v2109_v26, %v4451_v19  ;;  %4171 = vmatprep.subr.bf16.mxu0 %v4502_v51 }
 0x1b0   :  { %4027 = vmatmul.mubr.msk.bf16.gmra.mrb[8].mxu0 %vm2234_vm1, %v2148_v61  ;;  %v4459_v25 = vpop.permute.xlu1 %4458  ;;  %v2126_v29 = vsel %vm2119_vm6, %v2117_v35, %v4455_v54  ;;  %v2127_v53 = vsel %vm2119_vm6, %v2118_v58, %v4456_v60  ;;  %v4504_v35 = vld [vmem:[#allocation2 + $0x1e0] ss:$12 sps:$4 sm:$0xff]   ;;  %v4505_v58 = vld [vmem:[#allocation2 + $0x1f8] ss:$12 sps:$4 sm:$0xff]  }
 0x1b1   :  { %v4461_v14 = vunpack.i.h.bf16 %v4459_v25  ;;  %v4460_v37 = vunpack.i.l.bf16 %v4459_v25  ;;  %2309 = vmatprep.mubr.bf16.mxu0 %v4631_v27  ;;  %4156 = vmatpush3.bf16.msra.mxu1 %v4498_v32  ;;  %v4506_v25 = vld [vmem:[#allocation2 + $0x210] ss:$12 sps:$4 sm:$0xff]   ;;  %v2477_v32 = vsub.s32 1, %v5866_v20 }
 0x1b2   :  { %4172 = vmatpush3.bf16.msra.mxu0 %v4502_v51 }
 0x1b3   :  { %v2135_v49 = vsel %vm2128_vm7, %v2126_v29, %v4460_v37  ;;  %v2136_v48 = vsel %vm2128_vm7, %v2127_v53, %v4461_v14  ;;  %4173 = vmatprep.subr.bf16.mxu0 %v4503_v42  ;;  %v4507_v14 = vld [vmem:[#allocation2 + $0x228] ss:$12 sps:$4 sm:$0xff]   ;;  %v4509_v37 = vld [vmem:[#allocation2 + $0x22c] ss:$12 sps:$4 sm:$0xff]   ;;  %v4512_v29 = vld [vmem:[#allocation2 + $0x244] ss:$12 sps:$4 sm:$0xff]   ;;  %v2478_v5 = vrot.slane %v2321_v59, %v2477_v32 }
 0x1b4   :  { %v2144_v0 = vsel %vm2137_vm8, %v2135_v49, 0.0  ;;  %v2145_v62 = vsel %vm2137_vm8, %v2136_v48, 0.0  ;;  %2753 = vmatprep.subr.bf16.mxu1 %v4509_v37  ;;  %v4510_v53 = vld [vmem:[#allocation2 + $0x240] ss:$12 sps:$4 sm:$0xff]   ;;  %v4515_v49 = vld [vmem:[#allocation2 + $0x25c] ss:$12 sps:$4 sm:$0xff]  }
 0x1b5   :  { %v2149_v7 = vpack.c.bf16 %v2145_v62, %v2144_v0  ;;  %v4513_v48 = vld [vmem:[#allocation2 + $0x258] ss:$12 sps:$4 sm:$0xff]   ;;  %v4518_v0 = vld [vmem:[#allocation2 + $0x274] ss:$12 sps:$4 sm:$0xff]   ;;  %v4516_v62 = vld [vmem:[#allocation2 + $0x270] ss:$12 sps:$4 sm:$0xff]  }
 0x1b6   :  { %4174 = vmatpush3.bf16.msra.mxu0 %v4503_v42  ;;  %v40_v37 = vld [vmem:[%s6743_s1 + $0x18] sm:$0xff] }
 0x1b7   :  { %4175 = vmatprep.subr.bf16.mxu0 %v4504_v35  ;;  %v2515_v32 = vld [vmem:[#allocation2 + $0x438] sm:$0x2] }
 0x1b8   :  { %4028 = vmatmul.mubr.msk.bf16.gmra.mrb[12].mxu0 %vm2234_vm1, %v2149_v7  ;;  %v4521_v7 = vld [vmem:[#allocation2 + $0x28c] ss:$12 sps:$4 sm:$0xff]  }
 0x1ba   :  { %4176 = vmatpush3.bf16.msra.mxu0 %v4504_v35  ;;  %v38_v35 = vld [vmem:[%s6743_s1 + $0x8] sm:$0xff] }
 0x1bb   :  { %4177 = vmatprep.subr.bf16.mxu0 %v4505_v58 }
 0x1be   :  { %4178 = vmatpush3.bf16.msra.mxu0 %v4505_v58  ;;  %v4537_v58 = vld [vmem:[#allocation2 + $0x2f0] ss:$12 sps:$4 sm:$0xff]  }
 0x1bf   :  { %4179 = vmatprep.subr.bf16.mxu0 %v4506_v25 }
 0x1c2   :  { %4180 = vmatpush3.bf16.msra.mxu0 %v4506_v25 }
 0x24e   :  { %v2281_v28 = vpop.f32.mrb[0].mxu0 }
 0x24f   :  { %v2326_v50 = vadd.f32 %v2325_v1, %v2281_v28  ;;  %v5874_v63 = vpop.f32.mrb[1].mxu0 }
 0x250   :  { %v2285_v38 = vpop.f32.mrb[2].mxu0 }
 0x251   :  { %v2327_v44 = vadd.f32 %v2325_v1, %v2285_v38  ;;  %v5876_v16 = vpop.f32.mrb[3].mxu0  ;;  %v2334_v17 = vmax.f32 %v2326_v50, 0.0 }
 0x253   :  { %v2335_v52 = vmax.f32 %v2327_v44, 0.0 }
 0x255   :  { %v2342_v36 = vpack.c.bf16 %v2335_v52, %v2334_v17 }
 0x257   :  { %4157 = vmatprep.mubr.bf16.mxu1 %v2342_v36 }
 0x27a   :  { %v2291_v21 = vpop.f32.mrb[4].mxu0 }
 0x27b   :  { %v2328_v11 = vadd.f32 %v2325_v1, %v2291_v21  ;;  %v5878_v8 = vpop.f32.mrb[5].mxu0 }
 0x27c   :  { %v2295_v6 = vpop.f32.mrb[6].mxu0 }
 0x27d   :  { %v2329_v40 = vadd.f32 %v2325_v1, %v2295_v6  ;;  %v5880_v18 = vpop.f32.mrb[7].mxu0  ;;  %v2336_v31 = vmax.f32 %v2328_v11, 0.0 }
 0x27f   :  { %v2337_v10 = vmax.f32 %v2329_v40, 0.0 }
 0x281   :  { %v2343_v46 = vpack.c.bf16 %v2337_v10, %v2336_v31 }
 0x283   :  { %v2301_v22 = vpop.f32.mrb[8].mxu0  ;;  %4158 = vmatmul.mubr.bf16.vlgmr.msra.gmra.mrb[0].mxu1 %v2343_v46 }
 0x284   :  { %v2330_v13 = vadd.f32 %v2325_v1, %v2301_v22  ;;  %v5882_v57 = vpop.f32.mrb[9].mxu0  ;;  %2754 = vmatpush1.bf16.msra.mxu1 %v4507_v14  ;;  %v39_v14 = vld [vmem:[%s6743_s1 + $0x10] sm:$0xff] }
 0x285   :  { %v2305_v4 = vpop.f32.mrb[10].mxu0  ;;  %2755 = vmatprep.subr.bf16.mxu1 %v4512_v29  ;;  %v5920_v29 = vpack.c.bf16 %v40_v37, %v39_v14 }
 0x286   :  { %v2331_v3 = vadd.f32 %v2325_v1, %v2305_v4  ;;  %v5884_v55 = vpop.f32.mrb[11].mxu0  ;;  %v2338_v24 = vmax.f32 %v2330_v13, 0.0 }
 0x288   :  { %v2339_v56 = vmax.f32 %v2331_v3, 0.0  ;;  %2756 = vmatpush1.bf16.msra.mxu1 %v4510_v53  ;;  %v41_v53 = vld [vmem:[%s6743_s1 + $0x20] sm:$0xff] }
 0x289   :  { %2757 = vmatprep.subr.bf16.mxu1 %v4515_v49  ;;  %v42_v49 = vld [vmem:[%s6743_s1 + $0x28] sm:$0xff] }
 0x28a   :  { %v2344_v12 = vpack.c.bf16 %v2339_v56, %v2338_v24 }
 0x28b   :  { %v2311_v45 = vpop.f32.mrb[12].mxu0 }
 0x28c   :  { %v2332_v39 = vadd.f32 %v2325_v1, %v2311_v45  ;;  %v5886_v43 = vpop.f32.mrb[13].mxu0  ;;  %4161 = vmatprep.mubr.bf16.mxu1 %v2344_v12  ;;  %2758 = vmatpush1.bf16.msra.mxu1 %v4513_v48  ;;  %v47_v48 = vpack.c.bf16 %v42_v49, %v41_v53  ;;  %v4583_v49 = vld [vmem:[%s6742_s0] sm:$0xff] }
 0x28d   :  { %v2315_v19 = vpop.f32.mrb[14].mxu0  ;;  %2759 = vmatprep.subr.bf16.mxu1 %v4518_v0  ;;  %v43_v0 = vld [vmem:[%s6743_s1 + $0x30] sm:$0xff]  ;;  %vm3367_vm9 = vcmp.ge.f32.partialorder %v4583_v49, -1.0  ;;  %vm3375_vm10 = vcmp.le.f32.partialorder %v4583_v49, 1.0 }
 0x28e   :  { %v2333_v23 = vadd.f32 %v2325_v1, %v2315_v19  ;;  %v5888_v26 = vpop.f32.mrb[15].mxu0  ;;  %v2340_v60 = vmax.f32 %v2332_v39, 0.0  ;;  %v4525_v19 = vld [vmem:[#allocation2 + $0x2b8] ss:$12 sps:$4 sm:$0xff]   ;;  %vm5971_vm11 = vmand %vm3367_vm9, %vm3375_vm10 }
 0x290   :  { %v2341_v54 = vmax.f32 %v2333_v23, 0.0  ;;  %2760 = vmatpush1.bf16.msra.mxu1 %v4516_v62  ;;  %v4528_v23 = vld [vmem:[#allocation2 + $0x2e8] ss:$12 sps:$4 sm:$0xff]   ;;  %v44_v62 = vld [vmem:[%s6743_s1 + $0x38] sm:$0xff] }
 0x291   :  { %2761 = vmatprep.subr.bf16.mxu1 %v4521_v7  ;;  %v48_v7 = vpack.c.bf16 %v44_v62, %v43_v0  ;;  %v5978_v0 = vsel %vm5971_vm11, 1, %v4631_v27  ;;  %v4584_v62 = vld [vmem:[%s6742_s0 + $0x8] sm:$0xff] }
 0x292   :  { %v2345_v61 = vpack.c.bf16 %v2341_v54, %v2340_v60  ;;  %v4531_v60 = vld [vmem:[#allocation2 + $0x2d0] ss:$12 sps:$4 sm:$0xff]   ;;  %v4534_v54 = vld [vmem:[#allocation2 + $0x300] ss:$12 sps:$4 sm:$0xff]   ;;  %vm3368_vm12 = vcmp.ge.f32.partialorder %v4584_v62, -1.0  ;;  %vm3376_vm13 = vcmp.le.f32.partialorder %v4584_v62, 1.0  ;;  %3399 = vrot.lane.b32.xlu0 %v5978_v0, %s4632_s12 }
 0x293   :  { %vm5985_vm15 = vmand %vm3368_vm12, %vm3376_vm13 }
 0x294   :  { %4162 = vmatmul.mubr.bf16.gmra.mrb[4].mxu1 %v2345_v61  ;;  %v37_v61 = vld [vmem:[%s6743_s1] sm:$0xff] }
 0x295   :  { %2785 = vmatprep.mubr.bf16.mxu1 %v4631_v27  ;;  %2762 = vmatpush1.bf16.msra.mxu1 %v4519_v2  ;;  %v5909_v25 = vpack.c.bf16 %v38_v35, %v37_v61  ;;  %v4539_v2 = vld [vmem:[#allocation2 + $0x318] ss:$12 sps:$4 sm:$0xff]  }
 0x296   :  { %2763 = vmatprep.subr.bf16.mxu1 %v4524_v41  ;;  %v4540_v41 = vld [vmem:[#allocation2 + $0x330] ss:$12 sps:$4 sm:$0xff]  }
 0x299   :  { %2764 = vmatpush1.bf16.msra.mxu1 %v4522_v9  ;;  %v4541_v9 = vld [vmem:[#allocation2 + $0x348] ss:$12 sps:$4 sm:$0xff]  }
 0x356   :  { %v4159_v30 = vpop.f32.mrb[0].mxu1 }
 0x357   :  { %v2453_v34 = vadd.f32 %v4159_v30, %v5878_v8  ;;  %v2444_v51 = vpop.f32.mrb[1].mxu1  ;;  %v2519_v30 = vsub.s32 2, %v5866_v20 }
 0x358   :  { %v2445_v42 = vadd.f32 %v2444_v51, %v5874_v63  ;;  %v4160_v15 = vpop.f32.mrb[2].mxu1 }
 0x359   :  { %v2481_v33 = vadd.f32 %v2478_v5, %v2453_v34  ;;  %v2456_v1 = vadd.f32 %v4160_v15, %v5880_v18  ;;  %v2447_v28 = vpop.f32.mrb[3].mxu1 }
 0x35a   :  { %v2479_v50 = vadd.f32 %v2478_v5, %v2445_v42  ;;  %v2448_v38 = vadd.f32 %v2447_v28, %v5876_v16 }
 0x35b   :  { %v2482_v44 = vadd.f32 %v2478_v5, %v2456_v1  ;;  %v2489_v52 = vmax.f32 %v2481_v33, 0.0 }
 0x35c   :  { %v2480_v17 = vadd.f32 %v2478_v5, %v2448_v38  ;;  %v2487_v47 = vmax.f32 %v2479_v50, 0.0 }
 0x35d   :  { %v2490_v36 = vmax.f32 %v2482_v44, 0.0 }
 0x35e   :  { %v2488_v59 = vmax.f32 %v2480_v17, 0.0 }
 0x35f   :  { %v2496_v21 = vpack.c.bf16 %v2490_v36, %v2489_v52 }
 0x360   :  { %v2495_v11 = vpack.c.bf16 %v2488_v59, %v2487_v47 }
 0x362   :  { %4181 = vmatprep.mubr.bf16.mxu0 %v2495_v11 }
 0x363   :  { %4182 = vmatmul.mubr.bf16.vlgmr.msra.gmra.mrb[16].mxu0 %v2496_v21  ;;  %v4538_v21 = vld [vmem:[#allocation2 + $0x308] ss:$12 sps:$4 sm:$0xff]  }
 0x367   :  { %v4163_v8 = vpop.f32.mrb[4].mxu1 }
 0x368   :  { %v2469_v63 = vadd.f32 %v4163_v8, %v5886_v43  ;;  %v2460_v6 = vpop.f32.mrb[5].mxu1  ;;  %v4530_v43 = vld [vmem:[#allocation2 + $0x2ec] ss:$12 sps:$4 sm:$0xff]  }
 0x369   :  { %v2461_v40 = vadd.f32 %v2460_v6, %v5882_v57  ;;  %v4164_v18 = vpop.f32.mrb[6].mxu1  ;;  %v4527_v57 = vld [vmem:[#allocation2 + $0x2bc] ss:$12 sps:$4 sm:$0xff]   ;;  %2896 = vmatprep.subr.bf16.mxu0 %v4530_v43 }
 0x36a   :  { %v2485_v31 = vadd.f32 %v2478_v5, %v2469_v63  ;;  %v2472_v16 = vadd.f32 %v4164_v18, %v5888_v26  ;;  %v2463_v10 = vpop.f32.mrb[7].mxu1  ;;  %2765 = vmatprep.subr.bf16.mxu1 %v4527_v57  ;;  %2897 = vmatpush1.bf16.msra.mxu0 %v4528_v23  ;;  %v4536_v26 = vld [vmem:[#allocation2 + $0x304] ss:$12 sps:$4 sm:$0xff]  }
 0x36b   :  { %v2483_v46 = vadd.f32 %v2478_v5, %v2461_v40  ;;  %v2464_v22 = vadd.f32 %v2463_v10, %v5884_v55  ;;  %2766 = vmatpush1.bf16.msra.mxu1 %v4525_v19  ;;  %v4533_v55 = vld [vmem:[#allocation2 + $0x2d4] ss:$12 sps:$4 sm:$0xff]   ;;  %2898 = vmatprep.subr.bf16.mxu0 %v4536_v26  ;;  %v4544_v43 = vld [vmem:[#allocation2 + $0x390] ss:$12 sps:$4 sm:$0xff]  }
 0x36c   :  { %v2486_v13 = vadd.f32 %v2478_v5, %v2472_v16  ;;  %v2493_v3 = vmax.f32 %v2485_v31, 0.0  ;;  %2767 = vmatprep.subr.bf16.mxu1 %v4533_v55  ;;  %v4545_v26 = vld [vmem:[#allocation2 + $0x3a8] ss:$12 sps:$4 sm:$0xff]  }
 0x36d   :  { %v2484_v4 = vadd.f32 %v2478_v5, %v2464_v22  ;;  %v2491_v56 = vmax.f32 %v2483_v46, 0.0  ;;  %v2516_v5 = vunpack.c.l.bf16 %v2515_v32 }
 0x36e   :  { %v2494_v24 = vmax.f32 %v2486_v13, 0.0  ;;  %2899 = vmatpush1.bf16.msra.mxu0 %v4534_v54  ;;  %v4546_v54 = vld [vmem:[#allocation2 + $0x3c0] ss:$12 sps:$4 sm:$0xff]  }
 0x36f   :  { %v2492_v12 = vmax.f32 %v2484_v4, 0.0  ;;  %2768 = vmatpush1.bf16.msra.mxu1 %v4531_v60  ;;  %4201 = vmatprep.subr.bf16.mxu0 %v4539_v2  ;;  %v2520_v34 = vrot.slane %v2516_v5, %v2519_v30  ;;  %v5999_v5 = vsub.s32 4, %v5866_v20 }
 0x370   :  { %v2498_v45 = vpack.c.bf16 %v2494_v24, %v2493_v3  ;;  %4189 = vmatprep.subr.bf16.mxu1 %v4537_v58  ;;  %v4542_v24 = vld [vmem:[#allocation2 + $0x360] ss:$12 sps:$4 sm:$0xff]  }
 0x371   :  { %v2497_v39 = vpack.c.bf16 %v2492_v12, %v2491_v56 }
 0x373   :  { %4185 = vmatprep.mubr.bf16.mxu0 %v2497_v39  ;;  %v4543_v39 = vld [vmem:[#allocation2 + $0x378] ss:$12 sps:$4 sm:$0xff]  }
 0x374   :  { %4186 = vmatmul.mubr.bf16.gmra.mrb[20].mxu0 %v2498_v45 }
 0x375   :  { %2928 = vmatprep.mubr.bf16.mxu0 %v4631_v27 }
 0x37c   :  { %4067 = vmatmul.mubr.msk.bf16.vlgmr.msra.gmra.mrb[24].mxu0 %vm2883_vm2, %v5909_v25 }
 0x37d   :  { %2938 = vmatprep.mubr.bf16.mxu0 %v4631_v27  ;;  %4202 = vmatpush3.bf16.msra.mxu0 %v4539_v2  ;;  %v5992_v2 = vsel %vm5985_vm15, 1, %v4631_v27 }
 0x37e   :  { %4203 = vmatprep.subr.bf16.mxu0 %v4540_v41  ;;  %3401 = vrot.lane.b32.xlu1 %v5992_v2, %s4632_s12 }
 0x381   :  { %4204 = vmatpush3.bf16.msra.mxu0 %v4540_v41  ;;  %v2834_v41 = vld [vmem:[#allocation2 + $0x438] sm:$0x44] }
 0x382   :  { %4205 = vmatprep.subr.bf16.mxu0 %v4541_v9  ;;  %v2836_v32 = vunpack.c.l.bf16 %v2834_v41 }
 0x384   :  { %4068 = vmatmul.mubr.msk.bf16.gmra.mrb[28].mxu0 %vm2883_vm2, %v5920_v29 }
 0x385   :  { %2948 = vmatprep.mubr.bf16.mxu0 %v4631_v27  ;;  %4206 = vmatpush3.bf16.msra.mxu0 %v4541_v9  ;;  %v5996_v9 = vld [vmem:[#allocation2 + $0x438] sm:$0x22] }
 0x386   :  { %4207 = vmatprep.subr.bf16.mxu0 %v4542_v24  ;;  %v2663_v30 = vunpack.c.l.bf16 %v5996_v9 }
 0x389   :  { %4208 = vmatpush3.bf16.msra.mxu0 %v4542_v24 }
 0x38a   :  { %4209 = vmatprep.subr.bf16.mxu0 %v4543_v39 }
 0x38c   :  { %4069 = vmatmul.mubr.msk.bf16.gmra.mrb[32].mxu0 %vm2883_vm2, %v47_v48 }
 0x38d   :  { %2958 = vmatprep.mubr.bf16.mxu0 %v4631_v27  ;;  %4210 = vmatpush3.bf16.msra.mxu0 %v4543_v39 }
 0x38e   :  { %4211 = vmatprep.subr.bf16.mxu0 %v4544_v43 }
 0x391   :  { %4212 = vmatpush3.bf16.msra.mxu0 %v4544_v43 }
 0x392   :  { %4213 = vmatprep.subr.bf16.mxu0 %v4545_v26 }
 0x394   :  { %4070 = vmatmul.mubr.msk.bf16.gmra.mrb[36].mxu0 %vm2883_vm2, %v48_v7 }
 0x395   :  { %4214 = vmatpush3.bf16.msra.mxu0 %v4545_v26 }
 0x396   :  { %4215 = vmatprep.subr.bf16.mxu0 %v4546_v54 }
 0x399   :  { %4216 = vmatpush3.bf16.msra.mxu0 %v4546_v54 }
 0x436   :  { %v4183_v51 = vpop.f32.mrb[16].mxu0 }
 0x437   :  { %v2612_v42 = vadd.f32 %v4183_v51, %v2520_v34  ;;  %v2603_v15 = vpop.f32.mrb[17].mxu0  ;;  %v2837_v51 = vunpack.c.h.bf16 %v2834_v41 }
 0x438   :  { %v2604_v33 = vadd.f32 %v2603_v15, %v2520_v34  ;;  %v4184_v1 = vpop.f32.mrb[18].mxu0 }
 0x439   :  { %v2615_v28 = vadd.f32 %v4184_v1, %v2520_v34  ;;  %v2606_v50 = vpop.f32.mrb[19].mxu0  ;;  %v2636_v44 = vmax.f32 %v2612_v42, 0.0  ;;  %v2842_v42 = vrot.slane %v2836_v32, %v5999_v5 }
 0x43a   :  { %v2607_v38 = vadd.f32 %v2606_v50, %v2520_v34  ;;  %v2634_v52 = vmax.f32 %v2604_v33, 0.0  ;;  %v6009_v33 = vrot.slane %v2837_v51, %v5999_v5 }
 0x43b   :  { %v2637_v17 = vmax.f32 %v2615_v28, 0.0 }
 0x43c   :  { %v2635_v36 = vmax.f32 %v2607_v38, 0.0 }
 0x43d   :  { %v2643_v47 = vpack.c.bf16 %v2637_v17, %v2636_v44 }
 0x43e   :  { %v2642_v59 = vpack.c.bf16 %v2635_v36, %v2634_v52 }
 0x440   :  { %2786 = vmatmul.mubr.bf16.vlgmr.msra.gmra.mrb[8].mxu1 %v2642_v59 }
 0x441   :  { %4190 = vmatpush3.bf16.msra.mxu1 %v4537_v58  ;;  %2795 = vmatprep.mubr.bf16.mxu1 %v4631_v27 }
 0x442   :  { %4191 = vmatprep.subr.bf16.mxu1 %v4538_v21 }
 0x445   :  { %4192 = vmatpush3.bf16.msra.mxu1 %v4538_v21 }
 0x447   :  { %v4187_v11 = vpop.f32.mrb[20].mxu0 }
 0x448   :  { %v2628_v8 = vadd.f32 %v4187_v11, %v2520_v34  ;;  %v2619_v63 = vpop.f32.mrb[21].mxu0  ;;  %2796 = vmatmul.mubr.bf16.gmra.mrb[12].mxu1 %v2643_v47 }
 0x449   :  { %v2620_v6 = vadd.f32 %v2619_v63, %v2520_v34  ;;  %v4188_v40 = vpop.f32.mrb[22].mxu0  ;;  %2805 = vmatprep.mubr.bf16.mxu1 %v4631_v27 }
 0x44a   :  { %v2631_v18 = vadd.f32 %v4188_v40, %v2520_v34  ;;  %v2622_v31 = vpop.f32.mrb[23].mxu0  ;;  %v2640_v10 = vmax.f32 %v2628_v8, 0.0 }
 0x44b   :  { %v2623_v16 = vadd.f32 %v2622_v31, %v2520_v34  ;;  %v2638_v22 = vmax.f32 %v2620_v6, 0.0  ;;  %v2667_v34 = vsub.s32 3, %v5866_v20 }
 0x44c   :  { %v2641_v46 = vmax.f32 %v2631_v18, 0.0 }
 0x44d   :  { %v2639_v13 = vmax.f32 %v2623_v16, 0.0  ;;  %v6006_v15 = vrot.slane %v2663_v30, %v2667_v34 }
 0x44e   :  { %v2645_v4 = vpack.c.bf16 %v2641_v46, %v2640_v10 }
 0x44f   :  { %v2644_v3 = vpack.c.bf16 %v2639_v13, %v2638_v22  ;;  %v2930_v56 = vpop.f32.mrb[24].mxu0 }
 0x450   :  { %v2932_v12 = vpop.f32.mrb[25].mxu0  ;;  %v2931_v1 = vadd.f32 %v2930_v56, %v2842_v42 }
 0x451   :  { %2806 = vmatmul.mubr.bf16.gmra.mrb[16].mxu1 %v2644_v3  ;;  %v2934_v45 = vpop.f32.mrb[26].mxu0  ;;  %v2933_v44 = vadd.f32 %v2932_v12, %v6009_v33 }
 0x452   :  { %2815 = vmatprep.mubr.bf16.mxu1 %v4631_v27  ;;  %v2936_v57 = vpop.f32.mrb[27].mxu0  ;;  %v2935_v17 = vadd.f32 %v2934_v45, %v2842_v42 }
 0x453   :  { %v2937_v21 = vadd.f32 %v2936_v57, %v6009_v33 }
 0x457   :  { %v2940_v19 = vpop.f32.mrb[28].mxu0 }
 0x458   :  { %v2942_v23 = vpop.f32.mrb[29].mxu0  ;;  %v2941_v6 = vadd.f32 %v2940_v19, %v2842_v42 }
 0x459   :  { %2816 = vmatmul.mubr.bf16.gmra.mrb[20].mxu1 %v2645_v4  ;;  %v2944_v55 = vpop.f32.mrb[30].mxu0  ;;  %v2943_v18 = vadd.f32 %v2942_v23, %v6009_v33 }
 0x45a   :  { %4193 = vmatprep.mubr.msk.bf16.mxu1 %vm2883_vm2, %v5909_v25  ;;  %v5950_v60 = vpop.f32.mrb[31].mxu0  ;;  %v2945_v22 = vadd.f32 %v2944_v55, %v2842_v42 }
 0x45b   :  { %v2947_v56 = vadd.f32 %v5950_v60, %v6009_v33 }
 0x45f   :  { %v5952_v61 = vpop.f32.mrb[32].mxu0 }
 0x460   :  { %v5954_v35 = vpop.f32.mrb[33].mxu0  ;;  %v2951_v43 = vadd.f32 %v5952_v61, %v2842_v42 }
 0x461   :  { %4194 = vmatmul.mubr.msk.bf16.vlgmr.msra.gmra.mrb[24].mxu1 %vm2883_vm2, %v5920_v29  ;;  %v5956_v58 = vpop.f32.mrb[34].mxu0  ;;  %v2953_v23 = vadd.f32 %v5954_v35, %v6009_v33 }
 0x462   :  { %4197 = vmatprep.mubr.msk.bf16.mxu1 %vm2883_vm2, %v47_v48  ;;  %v5958_v25 = vpop.f32.mrb[35].mxu0  ;;  %v2955_v62 = vadd.f32 %v5956_v58, %v2842_v42 }
 0x463   :  { %v2957_v61 = vadd.f32 %v5958_v25, %v6009_v33 }
 0x467   :  { %v5960_v14 = vpop.f32.mrb[36].mxu0 }
 0x468   :  { %v5962_v37 = vpop.f32.mrb[37].mxu0 }
 0x469   :  { %4198 = vmatmul.mubr.msk.bf16.gmra.mrb[28].mxu1 %vm2883_vm2, %v48_v7  ;;  %v5964_v29 = vpop.f32.mrb[38].mxu0  ;;  %v2963_v58 = vadd.f32 %v5962_v37, %v6009_v33 }
 0x46a   :  { %v5966_v53 = vpop.f32.mrb[39].mxu0 }
 0x513   :  { %v2787_v28 = vpop.f32.mrb[8].mxu1 }
 0x514   :  { %v2788_v50 = vadd.f32 %v2787_v28, %v6006_v15  ;;  %v6012_v38 = vpop.f32.mrb[9].mxu1  ;;  %v2835_v28 = vld [vmem:[#allocation2 + $0x440] sm:$0x4] }
 0x515   :  { %v2791_v52 = vpop.f32.mrb[10].mxu1  ;;  %v2838_v25 = vunpack.c.l.bf16 %v2835_v28 }
 0x516   :  { %v3034_v36 = vmul.f32 %v2931_v1, %v2788_v50  ;;  %v2792_v47 = vadd.f32 %v2791_v52, %v6006_v15  ;;  %v6016_v59 = vpop.f32.mrb[11].mxu1  ;;  %v2965_v52 = vadd.f32 %v5964_v29, %v2842_v42 }
 0x517   :  { %v2850_v29 = vrot.slane %v2838_v25, %v5999_v5  ;;  %v4548_v25 = vld [vmem:[#allocation2 + $0x3f0] ss:$12 sps:$4 sm:$0xff]  }
 0x518   :  { %v3042_v11 = vadd.f32 %v3034_v36, %v2933_v44  ;;  %v3035_v8 = vmul.f32 %v2935_v17, %v2792_v47  ;;  %v2961_v44 = vadd.f32 %v5960_v14, %v2842_v42  ;;  %v2967_v14 = vadd.f32 %v5966_v53, %v6009_v33 }
 0x51a   :  { %v3043_v63 = vadd.f32 %v3035_v8, %v2937_v21  ;;  %v3050_v31 = vmax.f32 %v3042_v11, 0.0 }
 0x51b   :  { %v2797_v40 = vpop.f32.mrb[12].mxu1 }
 0x51c   :  { %v3051_v16 = vmax.f32 %v3043_v63, 0.0  ;;  %v2798_v10 = vadd.f32 %v2797_v40, %v6006_v15  ;;  %v6021_v46 = vpop.f32.mrb[13].mxu1 }
 0x51d   :  { %v2801_v13 = vpop.f32.mrb[14].mxu1 }
 0x51e   :  { %v3036_v4 = vmul.f32 %v2941_v6, %v2798_v10  ;;  %v2802_v3 = vadd.f32 %v2801_v13, %v6006_v15  ;;  %v6024_v24 = vpop.f32.mrb[15].mxu1  ;;  %v3058_v12 = vpack.c.bf16 %v3051_v16, %v3050_v31 }
 0x520   :  { %v3044_v45 = vadd.f32 %v3036_v4, %v2943_v18  ;;  %v3037_v39 = vmul.f32 %v2945_v22, %v2802_v3  ;;  %4217 = vmatprep.mubr.bf16.mxu0 %v3058_v12 }
 0x522   :  { %v3045_v57 = vadd.f32 %v3037_v39, %v2947_v56  ;;  %v3052_v55 = vmax.f32 %v3044_v45, 0.0 }
 0x524   :  { %v2807_v19 = vpop.f32.mrb[16].mxu1  ;;  %v3053_v26 = vmax.f32 %v3045_v57, 0.0 }
 0x525   :  { %v2808_v54 = vadd.f32 %v2807_v19, %v6006_v15  ;;  %v6032_v49 = vpop.f32.mrb[17].mxu1 }
 0x526   :  { %v2811_v60 = vpop.f32.mrb[18].mxu1  ;;  %v3059_v41 = vpack.c.bf16 %v3053_v26, %v3052_v55  ;;  %v4586_v55 = vld [vmem:[%s6742_s0 + $0x18] sm:$0xff] }
 0x527   :  { %v3038_v32 = vmul.f32 %v2951_v43, %v2808_v54  ;;  %v2812_v30 = vadd.f32 %v2811_v60, %v6006_v15  ;;  %v6036_v51 = vpop.f32.mrb[19].mxu1  ;;  %v4585_v43 = vld [vmem:[%s6742_s0 + $0x10] sm:$0xff]  ;;  %vm3370_vm0 = vcmp.ge.f32.partialorder %v4586_v55, -1.0  ;;  %vm3378_vm5 = vcmp.le.f32.partialorder %v4586_v55, 1.0 }
 0x528   :  { %4218 = vmatmul.mubr.bf16.vlgmr.msra.gmra.mrb[40].mxu0 %v3059_v41  ;;  %vm3369_vm3 = vcmp.ge.f32.partialorder %v4585_v43, -1.0  ;;  %vm3377_vm4 = vcmp.le.f32.partialorder %v4585_v43, 1.0  ;;  %vm6096_vm1 = vmand %vm3370_vm0, %vm3378_vm5 }
 0x529   :  { %v3046_v1 = vadd.f32 %v3038_v32, %v2953_v23  ;;  %v3039_v35 = vmul.f32 %v2955_v62, %v2812_v30  ;;  %vm6085_vm6 = vmand %vm3369_vm3, %vm3377_vm4  ;;  %v4587_v62 = vld [vmem:[%s6742_s0 + $0x20] sm:$0xff]  ;;  %v4588_v30 = vld [vmem:[%s6742_s0 + $0x28] sm:$0xff] }
 0x52a   :  { %vm3371_vm7 = vcmp.ge.f32.partialorder %v4587_v62, -1.0  ;;  %vm3379_vm8 = vcmp.le.f32.partialorder %v4587_v62, 1.0  ;;  %v3393_v32 = vsel %vm6085_vm6, 1, %v4631_v27  ;;  %vm3372_vm2 = vcmp.ge.f32.partialorder %v4588_v30, -1.0 }
 0x52b   :  { %v3047_v50 = vadd.f32 %v3039_v35, %v2957_v61  ;;  %v3054_v36 = vmax.f32 %v3046_v1, 0.0  ;;  %vm3380_vm9 = vcmp.le.f32.partialorder %v4588_v30, 1.0  ;;  %vm6108_vm10 = vmand %vm3371_vm7, %vm3379_vm8  ;;  %v3394_v1 = vsel %vm6096_vm1, 1, %v4631_v27  ;;  %v4589_v35 = vld [vmem:[%s6742_s0 + $0x30] sm:$0xff] }
 0x52c   :  { %v2817_v17 = vpop.f32.mrb[20].mxu1  ;;  %vm3373_vm12 = vcmp.ge.f32.partialorder %v4589_v35, -1.0  ;;  %vm3381_vm13 = vcmp.le.f32.partialorder %v4589_v35, 1.0  ;;  %vm6119_vm3 = vmand %vm3372_vm2, %vm3380_vm9 }
 0x52d   :  { %v3055_v47 = vmax.f32 %v3047_v50, 0.0  ;;  %v2818_v21 = vadd.f32 %v2817_v17, %v6006_v15  ;;  %v6045_v11 = vpop.f32.mrb[21].mxu1  ;;  %v3395_v50 = vsel %vm6108_vm10, 1, %v4631_v27  ;;  %vm6130_vm5 = vmand %vm3373_vm12, %vm3381_vm13  ;;  %v6821_v17 = vmov 0 }
 0x52e   :  { %v2821_v8 = vpop.f32.mrb[22].mxu1  ;;  %v6822_v17 = vsel %vm6130_vm5, 4294967295, %v6821_v17 }
 0x52f   :  { %v3040_v63 = vmul.f32 %v2961_v44, %v2818_v21  ;;  %v2822_v6 = vadd.f32 %v2821_v8, %v6006_v15  ;;  %v6048_v40 = vpop.f32.mrb[23].mxu1  ;;  %v3060_v18 = vpack.c.bf16 %v3055_v47, %v3054_v36  ;;  %v4590_v44 = vld [vmem:[%s6742_s0 + $0x38] sm:$0xff]  ;;  %v3397_v36 = vsel %vm6130_vm5, 1, %v4631_v27  ;;  %s4634_s0 = smov 126   ;;  %v3400_v8 = vpop.permute.xlu0 %3399 }
 0x530   :  { %vm3374_vm4 = vcmp.ge.f32.partialorder %v4590_v44, -1.0  ;;  %vm3382_vm0 = vcmp.le.f32.partialorder %v4590_v44, 1.0  ;;  %v4547_v21 = vld [vmem:[#allocation2 + $0x3d8] ss:$12 sps:$4 sm:$0xff]   ;;  %vm3415_vm8 = vcmp.ne.s32.totalorder %v3400_v8, 0 }
 0x531   :  { %v3048_v37 = vadd.f32 %v3040_v63, %v2963_v58  ;;  %v3041_v31 = vmul.f32 %v2965_v52, %v2822_v6  ;;  %4221 = vmatprep.mubr.bf16.mxu0 %v3060_v18  ;;  %v3396_v58 = vsel %vm6119_vm3, 1, %v4631_v27  ;;  %vm6138_vm7 = vmand %vm3374_vm4, %vm3382_vm0  ;;  %v6823_v52 = vmov 0  ;;  %4225 = vmatprep.subr.bf16.mxu1 %v4547_v21  ;;  %v3402_v63 = vpop.permute.xlu1 %3401 }
 0x532   :  { %v6824_v52 = vsel %vm6138_vm7, 4294967295, %v6823_v52  ;;  %v3398_v47 = vsel %vm6138_vm7, 1, %v4631_v27  ;;  %4226 = vmatpush3.bf16.msra.mxu1 %v4547_v21  ;;  %vm3416_vm2 = vcmp.ne.s32.totalorder %v3402_v63, 0  ;;  %vm3423_vm9 = vmand %vm5971_vm11, %vm3415_vm8 }
 0x533   :  { %v3049_v42 = vadd.f32 %v3041_v31, %v2967_v14  ;;  %v3056_v10 = vmax.f32 %v3048_v37, 0.0  ;;  %4227 = vmatprep.subr.bf16.mxu1 %v4548_v25  ;;  %vm3424_vm0 = vmand %vm5985_vm15, %vm3416_vm2 }
 0x534   :  { %v4195_v16 = vpop.f32.mrb[24].mxu1 }
 0x535   :  { %v3057_v22 = vmax.f32 %v3049_v42, 0.0  ;;  %v6053_v13 = vadd.f32 %v4195_v16, %v2850_v29  ;;  %v3003_v4 = vpop.f32.mrb[25].mxu1 }
 0x536   :  { %v4196_v3 = vpop.f32.mrb[26].mxu1  ;;  %v6059_v56 = vadd.f32 %v3003_v4, %v2850_v29  ;;  %4228 = vmatpush3.bf16.msra.mxu1 %v4548_v25  ;;  %v2664_v25 = vunpack.c.h.bf16 %v5996_v9  ;;  %v4637_v9 = vmov 6  }
 0x537   :  { %v6055_v15 = vadd.f32 %v4196_v3, %v2850_v29  ;;  %3211 = vrot.lane.b32.xlu0 %v6053_v13, %s4633_s13  ;;  %v3006_v53 = vpop.f32.mrb[27].mxu1  ;;  %v3061_v33 = vpack.c.bf16 %v3057_v22, %v3056_v10 }
 0x538   :  { %v6063_v5 = vadd.f32 %v3006_v53, %v2850_v29 }
 0x539   :  { %3213 = vrot.lane.b32.xlu1 %v6055_v15, %s4633_s13  ;;  %4222 = vmatmul.mubr.bf16.gmra.mrb[44].mxu0 %v3061_v33 }
 0x53b   :  { %3207 = vrot.lane.b32.xlu0 %v6059_v56, %s4633_s13 }
 0x53c   :  { %v4199_v12 = vpop.f32.mrb[28].mxu1 }
 0x53d   :  { %v6067_v45 = vadd.f32 %v4199_v12, %v2850_v29  ;;  %v3019_v39 = vpop.f32.mrb[29].mxu1  ;;  %3209 = vrot.lane.b32.xlu1 %v6063_v5, %s4633_s13 }
 0x53e   :  { %v4200_v57 = vpop.f32.mrb[30].mxu1  ;;  %v6081_v26 = vadd.f32 %v3019_v39, %v2850_v29 }
 0x53f   :  { %v6074_v19 = vadd.f32 %v4200_v57, %v2850_v29  ;;  %v3022_v23 = vpop.f32.mrb[31].mxu1  ;;  %3219 = vrot.lane.b32.xlu0 %v6067_v45, %s4633_s13 }
 0x540   :  { %v6092_v60 = vadd.f32 %v3022_v23, %v2850_v29 }
 0x541   :  { %3221 = vrot.lane.b32.xlu1 %v6074_v19, %s4633_s13 }
 0x543   :  { %3215 = vrot.lane.b32.xlu0 %v6081_v26, %s4633_s13 }
 0x545   :  { %3217 = vrot.lane.b32.xlu1 %v6092_v60, %s4633_s13 }
 0x547   :  { %3403 = vrot.lane.b32.xlu0 %v3393_v32, %s4632_s12 }
 0x549   :  { %3405 = vrot.lane.b32.xlu1 %v3394_v1, %s4632_s12 }
 0x54b   :  { %3407 = vrot.lane.b32.xlu0 %v3395_v50, %s4632_s12 }
 0x54d   :  { %3409 = vrot.lane.b32.xlu1 %v3396_v58, %s4632_s12 }
 0x54f   :  { %3411 = vrot.lane.b32.xlu0 %v3397_v36, %s4632_s12 }
 0x551   :  { %3413 = vrot.lane.b32.xlu1 %v3398_v47, %s4632_s12 }
 0x553   :  { %3431 = vrot.lane.b32.xlu0 %v5978_v0, %s4634_s0  ;;  %v4549_v0 = vld [vmem:[#allocation2 + $0x408] ss:$12 sps:$4 sm:$0xff]  }
 0x554   :  { %4229 = vmatprep.subr.bf16.mxu1 %v4549_v0 }
 0x555   :  { %3433 = vrot.lane.b32.xlu1 %v5992_v2, %s4634_s0  ;;  %4230 = vmatpush3.bf16.msra.mxu1 %v4549_v0  ;;  %v4550_v2 = vld [vmem:[#allocation2 + $0x420] ss:$12 sps:$4 sm:$0xff]  }
 0x556   :  { %4231 = vmatprep.subr.bf16.mxu1 %v4550_v2 }
 0x557   :  { %3435 = vrot.lane.b32.xlu0 %v3393_v32, %s4634_s0 }
 0x559   :  { %3437 = vrot.lane.b32.xlu1 %v3394_v1, %s4634_s0  ;;  %4232 = vmatpush3.bf16.msra.mxu1 %v4550_v2 }
 0x55b   :  { %3439 = vrot.lane.b32.xlu0 %v3395_v50, %s4634_s0 }
 0x55d   :  { %3441 = vrot.lane.b32.xlu1 %v3396_v58, %s4634_s0  ;;  %v6838_v58 = vmov 0 }
 0x55f   :  { %3443 = vrot.lane.b32.xlu0 %v3397_v36, %s4634_s0 }
 0x561   :  { %3445 = vrot.lane.b32.xlu1 %v3398_v47, %s4634_s0 }
 0x5a9   :  { %v6161_v6 = vpop.permute.xlu0 %3211 }
 0x5ab   :  { %v6163_v14 = vpop.permute.xlu1 %3213 }
 0x5ad   :  { %v6165_v18 = vpop.permute.xlu0 %3207 }
 0x5af   :  { %v6167_v37 = vpop.permute.xlu1 %3209 }
 0x5b1   :  { %v6169_v31 = vpop.permute.xlu0 %3219 }
 0x5b3   :  { %v6171_v29 = vpop.permute.xlu1 %3221 }
 0x5b5   :  { %v6173_v42 = vpop.permute.xlu0 %3215 }
 0x5b7   :  { %v6175_v16 = vpop.permute.xlu1 %3217 }
 0x5b9   :  { %v3404_v10 = vpop.permute.xlu0 %3403 }
 0x5ba   :  { %vm3417_vm13 = vcmp.ne.s32.totalorder %v3404_v10, 0 }
 0x5bb   :  { %v3406_v22 = vpop.permute.xlu1 %3405  ;;  %vm3425_vm11 = vmand %vm6085_vm6, %vm3417_vm13 }
 0x5bc   :  { %vm3418_vm7 = vcmp.ne.s32.totalorder %v3406_v22, 0 }
 0x5bd   :  { %v3408_v4 = vpop.permute.xlu0 %3407 }
 0x5be   :  { %vm3419_vm15 = vcmp.ne.s32.totalorder %v3408_v4, 0 }
 0x5bf   :  { %v3410_v3 = vpop.permute.xlu1 %3409  ;;  %vm3427_vm13 = vmand %vm6108_vm10, %vm3419_vm15 }
 0x5c1   :  { %v3412_v53 = vpop.permute.xlu0 %3411 }
 0x5c3   :  { %v3414_v33 = vpop.permute.xlu1 %3413 }
 0x5c5   :  { %v3432_v12 = vpop.permute.xlu0 %3431 }
 0x5c6   :  { %vm3447_vm12 = vcmp.ne.s32.totalorder %v3432_v12, 0 }
 0x5c7   :  { %vm6179_vm4 = vmand %vm3423_vm9, %vm3447_vm12  ;;  %v3434_v57 = vpop.permute.xlu1 %3433  ;;  %vm3420_vm12 = vcmp.ne.s32.totalorder %v3410_v3, 0 }
 0x5c8   :  { %vm3448_vm14 = vcmp.ne.s32.totalorder %v3434_v57, 0  ;;  %v6188_v43 = vsel %vm6179_vm4, 1, %v4631_v27  ;;  %vm3428_vm10 = vmand %vm6119_vm3, %vm3420_vm12  ;;  %vm6840_vm12 = vnez %v6824_v52  ;;  %v4635_v52 = vmov 3  }
 0x5c9   :  { %vm6190_vm5 = vmand %vm3424_vm0, %vm3448_vm14  ;;  %3472 = vperm.xlu0 %4462, %v6188_v43   ;;  %v3436_v23 = vpop.permute.xlu0 %3435 }
 0x5ca   :  { %vm3449_vm8 = vcmp.ne.s32.totalorder %v3436_v23, 0  ;;  %v6200_v7 = vsel %vm6190_vm5, 1, %v4631_v27  ;;  %vm3426_vm14 = vmand %vm6096_vm1, %vm3418_vm7  ;;  %vm3421_vm1 = vcmp.ne.s32.totalorder %v3412_v53, 0 }
 0x5cb   :  { %vm6202_vm2 = vmand %vm3425_vm11, %vm3449_vm8  ;;  %3475 = vperm.xlu1 %4463, %v6200_v7   ;;  %v3438_v62 = vpop.permute.xlu1 %3437  ;;  %vm3422_vm8 = vcmp.ne.s32.totalorder %v3414_v33, 0 }
 0x5cc   :  { %vm3450_vm9 = vcmp.ne.s32.totalorder %v3438_v62, 0  ;;  %v6223_v41 = vsel %vm6202_vm2, 1, %v4631_v27 }
 0x5cd   :  { %vm6209_vm6 = vmand %vm3426_vm14, %vm3450_vm9  ;;  %v3440_v32 = vpop.permute.xlu0 %3439  ;;  %vm6837_vm14 = vnez %v6822_v17  ;;  %v6841_v17 = vmov 0 }
 0x5ce   :  { %vm3451_vm0 = vcmp.ne.s32.totalorder %v3440_v32, 0  ;;  %v6218_v30 = vsel %vm6209_vm6, 1, %v4631_v27  ;;  %vm3429_vm9 = vmand %vm6837_vm14, %vm3421_vm1 }
 0x5cf   :  { %vm6225_vm7 = vmand %vm3427_vm13, %vm3451_vm0  ;;  %v3442_v35 = vpop.permute.xlu1 %3441  ;;  %3481 = vperm.xlu0 %4462, %v6218_v30   ;;  %3478 = vperm.xlu1 %4463, %v6223_v41  }
 0x5d0   :  { %vm3452_vm11 = vcmp.ne.s32.totalorder %v3442_v35, 0  ;;  %v6247_v28 = vsel %vm6225_vm7, 1, %v4631_v27  ;;  %vm3430_vm0 = vmand %vm6840_vm12, %vm3422_vm8  ;;  %vm3743_vm8 = vcmask 31744  }
 0x5d1   :  { %vm6233_vm15 = vmand %vm3428_vm10, %vm3452_vm11  ;;  %v3444_v50 = vpop.permute.xlu0 %3443  ;;  %vm3289_vm11 = vcmask 523264  }
 0x5d2   :  { %vm3453_vm13 = vcmp.ne.s32.totalorder %v3444_v50, 0  ;;  %v6242_v44 = vsel %vm6233_vm15, 1, %v4631_v27 }
 0x5d3   :  { %vm6249_vm3 = vmand %vm3429_vm9, %vm3453_vm13  ;;  %v3446_v36 = vpop.permute.xlu1 %3445  ;;  %3487 = vperm.xlu0 %4462, %v6242_v44   ;;  %3484 = vperm.xlu1 %4463, %v6247_v28  }
 0x5d4   :  { %v6839_v58 = vsel %vm6249_vm3, 4294967295, %v6838_v58  ;;  %vm3454_vm1 = vcmp.ne.s32.totalorder %v3446_v36, 0  ;;  %v6269_v21 = vsel %vm6249_vm3, 1, %v4631_v27 }
 0x5d5   :  { %vm6257_vm10 = vmand %vm3430_vm0, %vm3454_vm1 }
 0x5d6   :  { %v6842_v17 = vsel %vm6257_vm10, 4294967295, %v6841_v17  ;;  %v6264_v47 = vsel %vm6257_vm10, 1, %v4631_v27  ;;  %v2672_v27 = vrot.slane %v2664_v25, %v2667_v34 }
 0x5d7   :  { %3493 = vperm.xlu0 %4462, %v6264_v47   ;;  %3490 = vperm.xlu1 %4463, %v6269_v21  }
 0x5d8   :  { %v6283_v0 = vadd.f32 %v6012_v38, %v2672_v27  ;;  %v6288_v2 = vadd.f32 %v6021_v46, %v2672_v27  ;;  %v6293_v34 = vadd.f32 %v6016_v59, %v2672_v27  ;;  %v6296_v38 = vadd.f32 %v6032_v49, %v2672_v27 }
 0x5d9   :  { %v6301_v8 = vadd.f32 %v6024_v24, %v2672_v27  ;;  %v6304_v46 = vadd.f32 %v6045_v11, %v2672_v27  ;;  %v6309_v59 = vadd.f32 %v6036_v51, %v2672_v27  ;;  %v6315_v49 = vadd.f32 %v6048_v40, %v2672_v27 }
 0x5db   :  { %4465 = vset.pattern.permute.xlu0 %v4635_v52  ;;  %4464 = vset.pattern.permute.xlu1 %v4635_v52 }
 0x5dc   :  { %3523 = vperm.xlu0 %4465, %v6200_v7   ;;  %3520 = vperm.xlu1 %4464, %v6188_v43  }
 0x5e0   :  { %3532 = vperm.xlu0 %4465, %v6247_v28   ;;  %3526 = vperm.xlu1 %4464, %v6223_v41  }
 0x5e4   :  { %3538 = vperm.xlu0 %4465, %v6269_v21   ;;  %3529 = vperm.xlu1 %4464, %v6218_v30  }
 0x5e8   :  { %3567 = vrot.lane.b32.xlu0 %v6283_v0, %s4636_s26  ;;  %3535 = vperm.xlu1 %4464, %v6242_v44  }
 0x5e9   :  { %4466 = vset.pattern.permute.xlu0 %v4637_v9 }
 0x5ec   :  { %3571 = vrot.lane.b32.xlu0 %v6288_v2, %s4636_s26  ;;  %3541 = vperm.xlu1 %4464, %v6264_v47  }
 0x5f0   :  { %3569 = vrot.lane.b32.xlu1 %v6293_v34, %s4636_s26  ;;  %3575 = vrot.lane.b32.xlu0 %v6296_v38, %s4636_s26 }
 0x5f1   :  { %4467 = vset.pattern.permute.xlu1 %v4637_v9 }
 0x5f4   :  { %3573 = vrot.lane.b32.xlu1 %v6301_v8, %s4636_s26  ;;  %3579 = vrot.lane.b32.xlu0 %v6304_v46, %s4636_s26 }
 0x5f8   :  { %3577 = vrot.lane.b32.xlu1 %v6309_v59, %s4636_s26  ;;  %3639 = vrot.lane.b32.xlu0 %v6283_v0, %s4638_s27 }
 0x5fb   :  { %v4219_v24 = vpop.f32.mrb[40].mxu0 }
 0x5fc   :  { %3581 = vrot.lane.b32.xlu1 %v6315_v49, %s4636_s26  ;;  %3643 = vrot.lane.b32.xlu0 %v6288_v2, %s4638_s27  ;;  %v3193_v11 = vmul.f32 %v4219_v24, %v6053_v13  ;;  %v3160_v63 = vpop.f32.mrb[41].mxu0 }
 0x5fd   :  { %v3191_v51 = vmul.f32 %v3160_v63, %v6059_v56  ;;  %v4220_v10 = vpop.f32.mrb[42].mxu0 }
 0x5fe   :  { %v3233_v22 = vadd.f32 %v6161_v6, %v3193_v11  ;;  %v3194_v4 = vmul.f32 %v4220_v10, %v6055_v15  ;;  %v3163_v3 = vpop.f32.mrb[43].mxu0 }
 0x5ff   :  { %v3231_v40 = vadd.f32 %v6165_v18, %v3191_v51  ;;  %v3192_v53 = vmul.f32 %v3163_v3, %v6063_v5 }
 0x600   :  { %3641 = vrot.lane.b32.xlu1 %v6293_v34, %s4638_s27  ;;  %3647 = vrot.lane.b32.xlu0 %v6296_v38, %s4638_s27  ;;  %v3234_v13 = vadd.f32 %v6163_v14, %v3194_v4  ;;  %v3241_v33 = vmax.f32 %v3233_v22, 0.0 }
 0x601   :  { %v3232_v56 = vadd.f32 %v6167_v37, %v3192_v53  ;;  %v3239_v6 = vmax.f32 %v3231_v40, 0.0 }
 0x602   :  { %v3242_v12 = vmax.f32 %v3234_v13, 0.0 }
 0x603   :  { %v3240_v57 = vmax.f32 %v3232_v56, 0.0 }
 0x604   :  { %3645 = vrot.lane.b32.xlu1 %v6301_v8, %s4638_s27  ;;  %3651 = vrot.lane.b32.xlu0 %v6304_v46, %s4638_s27  ;;  %v3248_v15 = vpack.c.bf16 %v3242_v12, %v3241_v33 }
 0x605   :  { %v3247_v5 = vpack.c.bf16 %v3240_v57, %v3239_v6 }
 0x607   :  { %4233 = vmatprep.mubr.msk.bf16.mxu1 %vm3289_vm11, %v3247_v5 }
 0x608   :  { %3649 = vrot.lane.b32.xlu1 %v6309_v59, %s4638_s27  ;;  %3711 = vrot.lane.b32.xlu0 %v6283_v0, %s4639_s28 }
 0x609   :  { %4234 = vmatmul.mubr.msk.bf16.vlgmr.msra.gmra.mrb[32].mxu1 %vm3289_vm11, %v3248_v15 }
 0x60c   :  { %3653 = vrot.lane.b32.xlu1 %v6315_v49, %s4638_s27  ;;  %v4223_v14 = vpop.f32.mrb[44].mxu0  ;;  %3715 = vrot.lane.b32.xlu0 %v6288_v2, %s4639_s28 }
 0x60d   :  { %v3197_v18 = vmul.f32 %v4223_v14, %v6067_v45  ;;  %v3176_v37 = vpop.f32.mrb[45].mxu0 }
 0x60e   :  { %v3195_v23 = vmul.f32 %v3176_v37, %v6081_v26  ;;  %v4224_v62 = vpop.f32.mrb[46].mxu0 }
 0x60f   :  { %v3237_v32 = vadd.f32 %v6169_v31, %v3197_v18  ;;  %v3198_v35 = vmul.f32 %v4224_v62, %v6074_v19  ;;  %v3179_v50 = vpop.f32.mrb[47].mxu0 }
 0x610   :  { %v3235_v36 = vadd.f32 %v6173_v42, %v3195_v23  ;;  %v3196_v52 = vmul.f32 %v3179_v50, %v6092_v60  ;;  %3713 = vrot.lane.b32.xlu1 %v6293_v34, %s4639_s28  ;;  %3719 = vrot.lane.b32.xlu0 %v6296_v38, %s4639_s28 }
 0x611   :  { %v3238_v25 = vadd.f32 %v6171_v29, %v3198_v35  ;;  %v3245_v26 = vmax.f32 %v3237_v32, 0.0 }
 0x612   :  { %v3236_v45 = vadd.f32 %v6175_v16, %v3196_v52  ;;  %v3243_v31 = vmax.f32 %v3235_v36, 0.0 }
 0x613   :  { %v3246_v27 = vmax.f32 %v3238_v25, 0.0 }
 0x614   :  { %v3244_v9 = vmax.f32 %v3236_v45, 0.0  ;;  %3717 = vrot.lane.b32.xlu1 %v6301_v8, %s4639_s28  ;;  %3723 = vrot.lane.b32.xlu0 %v6304_v46, %s4639_s28 }
 0x615   :  { %v3250_v19 = vpack.c.bf16 %v3246_v27, %v3245_v26 }
 0x616   :  { %v3249_v60 = vpack.c.bf16 %v3244_v9, %v3243_v31 }
 0x618   :  { %3721 = vrot.lane.b32.xlu1 %v6309_v59, %s4639_s28  ;;  %4237 = vmatprep.mubr.msk.bf16.mxu1 %vm3289_vm11, %v3249_v60 }
 0x619   :  { %3600 = vperm.xlu0 %4466, %v6188_v43   ;;  %4238 = vmatmul.mubr.msk.bf16.gmra.mrb[36].mxu1 %vm3289_vm11, %v3250_v19 }
 0x61c   :  { %3725 = vrot.lane.b32.xlu1 %v6315_v49, %s4639_s28 }
 0x620   :  { %3603 = vperm.xlu1 %4467, %v6200_v7  }
 0x624   :  { %3606 = vperm.xlu1 %4467, %v6223_v41  }
 0x648   :  { %v6371_v29 = vpop.permute.xlu0 %3472 }
 0x649   :  { %vm6844_vm14 = vcmp.eq.s32.totalorder %v6371_v29, 1 }
 0x64a   :  { %v6373_v42 = vpop.permute.xlu1 %3475 }
 0x64e   :  { %v6375_v16 = vpop.permute.xlu1 %3478  ;;  %v6377_v24 = vpop.permute.xlu0 %3481 }
 0x64f   :  { %vm6843_vm13 = vcmp.eq.s32.totalorder %v6375_v16, 1 }
 0x652   :  { %v6379_v11 = vpop.permute.xlu1 %3484  ;;  %v6381_v63 = vpop.permute.xlu0 %3487 }
 0x656   :  { %v6383_v51 = vpop.permute.xlu1 %3490  ;;  %v6385_v10 = vpop.permute.xlu0 %3493 }
 0x65b   :  { %v6387_v22 = vpop.permute.xlu1 %3520  ;;  %v6389_v4 = vpop.permute.xlu0 %3523 }
 0x65c   :  { %vm3543_vm12 = vcmp.eq.s32.totalorder %v6387_v22, 1  ;;  %vm3544_vm0 = vcmp.eq.s32.totalorder %v6389_v4, 1 }
 0x65f   :  { %v6391_v3 = vpop.permute.xlu1 %3526  ;;  %v6393_v40 = vpop.permute.xlu0 %3532 }
 0x660   :  { %vm3545_vm1 = vcmp.eq.s32.totalorder %v6391_v3, 1 }
 0x663   :  { %v6395_v53 = vpop.permute.xlu1 %3529  ;;  %v6397_v13 = vpop.permute.xlu0 %3538 }
 0x664   :  { %vm3546_vm11 = vcmp.eq.s32.totalorder %v6395_v53, 1 }
 0x667   :  { %v6399_v56 = vpop.permute.xlu1 %3535  ;;  %v3568_v33 = vpop.permute.xlu0 %3567 }
 0x668   :  { %v3591_v12 = vsel %vm6179_vm4, %v3568_v33, -10.0 }
 0x669   :  { %3786 = vrot.lane.b32.xlu0 %v3591_v12, %s4634_s0 }
 0x66b   :  { %v6404_v6 = vpop.permute.xlu1 %3541  ;;  %v3572_v57 = vpop.permute.xlu0 %3571 }
 0x66c   :  { %v3593_v60 = vsel %vm6202_vm2, %v3572_v57, -10.0 }
 0x66f   :  { %v3570_v15 = vpop.permute.xlu1 %3569  ;;  %v3576_v5 = vpop.permute.xlu0 %3575 }
 0x670   :  { %v3592_v14 = vsel %vm6190_vm5, %v3570_v15, -10.0 }
 0x671   :  { %3788 = vrot.lane.b32.xlu1 %v3592_v14, %s4634_s0 }
 0x673   :  { %v3574_v18 = vpop.permute.xlu1 %3573  ;;  %v3580_v37 = vpop.permute.xlu0 %3579 }
 0x677   :  { %v3578_v23 = vpop.permute.xlu1 %3577  ;;  %v3640_v62 = vpop.permute.xlu0 %3639 }
 0x678   :  { %v3663_v32 = vsel %vm6179_vm4, %v3640_v62, -10.0  ;;  %v3594_v62 = vsel %vm6209_vm6, %v3574_v18, -10.0 }
 0x679   :  { %3818 = vrot.lane.b32.xlu0 %v3663_v32, %s4640_s29  ;;  %v3595_v32 = vsel %vm6225_vm7, %v3576_v5, -10.0  ;;  %v3596_v5 = vsel %vm6233_vm15, %v3578_v23, -10.0 }
 0x67b   :  { %v3582_v35 = vpop.permute.xlu1 %3581  ;;  %v3644_v50 = vpop.permute.xlu0 %3643 }
 0x67c   :  { %v3665_v12 = vsel %vm6202_vm2, %v3644_v50, -10.0 }
 0x67f   :  { %v3642_v36 = vpop.permute.xlu1 %3641  ;;  %v3648_v52 = vpop.permute.xlu0 %3647 }
 0x680   :  { %v3664_v25 = vsel %vm6190_vm5, %v3642_v36, -10.0  ;;  %v3667_v18 = vsel %vm6225_vm7, %v3648_v52, -10.0  ;;  %v3597_v52 = vsel %vm6249_vm3, %v3580_v37, -10.0  ;;  %v3598_v37 = vsel %vm6257_vm10, %v3582_v35, -10.0 }
 0x681   :  { %3820 = vrot.lane.b32.xlu1 %v3664_v25, %s4640_s29  ;;  %v4642_v35 = vmov 9  }
 0x683   :  { %v3646_v45 = vpop.permute.xlu1 %3645  ;;  %v3652_v26 = vpop.permute.xlu0 %3651 }
 0x684   :  { %v3666_v50 = vsel %vm6209_vm6, %v3646_v45, -10.0  ;;  %v3669_v23 = vsel %vm6249_vm3, %v3652_v26, -10.0 }
 0x687   :  { %v3650_v27 = vpop.permute.xlu1 %3649  ;;  %v3712_v31 = vpop.permute.xlu0 %3711 }
 0x688   :  { %v3735_v9 = vsel %vm6179_vm4, %v3712_v31, -10.0 }
 0x689   :  { %3850 = vrot.lane.b32.xlu0 %v3735_v9, %s4641_s30  ;;  %v3668_v9 = vsel %vm6233_vm15, %v3650_v27, -10.0 }
 0x68b   :  { %v3654_v19 = vpop.permute.xlu1 %3653  ;;  %v3716_v14 = vpop.permute.xlu0 %3715 }
 0x68c   :  { %v3737_v57 = vsel %vm6202_vm2, %v3716_v14, -10.0  ;;  %v3670_v26 = vsel %vm6257_vm10, %v3654_v19, -10.0  ;;  %v3259_v19 = vld [vmem:[#allocation2 + $0x438] sm:$0x4] }
 0x68d   :  { %3790 = vrot.lane.b32.xlu0 %v3593_v60, %s4634_s0 }
 0x68f   :  { %v3714_v33 = vpop.permute.xlu1 %3713  ;;  %v3720_v31 = vpop.permute.xlu0 %3719 }
 0x690   :  { %v3736_v15 = vsel %vm6190_vm5, %v3714_v33, -10.0  ;;  %v3739_v45 = vsel %vm6225_vm7, %v3720_v31, -10.0 }
 0x691   :  { %3852 = vrot.lane.b32.xlu1 %v3736_v15, %s4641_s30  ;;  %3822 = vrot.lane.b32.xlu0 %v3665_v12, %s4640_s29 }
 0x693   :  { %v3718_v36 = vpop.permute.xlu1 %3717  ;;  %v3724_v12 = vpop.permute.xlu0 %3723 }
 0x694   :  { %v3738_v25 = vsel %vm6209_vm6, %v3718_v36, -10.0  ;;  %v3741_v27 = vsel %vm6249_vm3, %v3724_v12, -10.0 }
 0x695   :  { %3792 = vrot.lane.b32.xlu1 %v3594_v62, %s4634_s0  ;;  %3854 = vrot.lane.b32.xlu0 %v3737_v57, %s4641_s30  ;;  %v3260_v57 = vunpack.c.l.bf16 %v3259_v19 }
 0x697   :  { %v3722_v60 = vpop.permute.xlu1 %3721 }
 0x698   :  { %v3740_v33 = vsel %vm6233_vm15, %v3722_v60, -10.0 }
 0x699   :  { %3824 = vrot.lane.b32.xlu1 %v3666_v50, %s4640_s29  ;;  %3794 = vrot.lane.b32.xlu0 %v3595_v32, %s4634_s0 }
 0x69b   :  { %v3726_v15 = vpop.permute.xlu1 %3725 }
 0x69c   :  { %v3742_v14 = vsel %vm6257_vm10, %v3726_v15, -10.0 }
 0x69d   :  { %3856 = vrot.lane.b32.xlu1 %v3738_v25, %s4641_s30  ;;  %3826 = vrot.lane.b32.xlu0 %v3667_v18, %s4640_s29 }
 0x69f   :  { %v3604_v62 = vpop.permute.xlu1 %3603 }
 0x6a0   :  { %vm3624_vm9 = vcmp.eq.s32.totalorder %v3604_v62, 1 }
 0x6a1   :  { %3796 = vrot.lane.b32.xlu1 %v3596_v5, %s4634_s0  ;;  %3858 = vrot.lane.b32.xlu0 %v3739_v45, %s4641_s30 }
 0x6a5   :  { %3828 = vrot.lane.b32.xlu1 %v3668_v9, %s4640_s29  ;;  %3798 = vrot.lane.b32.xlu0 %v3597_v52, %s4634_s0 }
 0x6a9   :  { %3860 = vrot.lane.b32.xlu1 %v3740_v33, %s4641_s30  ;;  %3830 = vrot.lane.b32.xlu0 %v3669_v23, %s4640_s29 }
 0x6ad   :  { %3800 = vrot.lane.b32.xlu1 %v3598_v37, %s4634_s0  ;;  %3862 = vrot.lane.b32.xlu0 %v3741_v27, %s4641_s30 }
 0x6b1   :  { %3832 = vrot.lane.b32.xlu1 %v3670_v26, %s4640_s29  ;;  %3609 = vperm.xlu0 %4466, %v6218_v30  }
 0x6b5   :  { %3864 = vrot.lane.b32.xlu1 %v3742_v14, %s4641_s30  ;;  %3615 = vperm.xlu0 %4466, %v6242_v44  }
 0x6b9   :  { %3612 = vperm.xlu1 %4467, %v6247_v28   ;;  %3621 = vperm.xlu0 %4466, %v6264_v47  }
 0x6bd   :  { %3618 = vperm.xlu1 %4467, %v6269_v21   ;;  %4469 = vset.pattern.permute.xlu0 %v4642_v35 }
 0x6be   :  { %3675 = vperm.xlu0 %4469, %v6200_v7   ;;  %v3263_v7 = vsub.s32 5, %v5866_v20 }
 0x6c0   :  { %v3264_v32 = vrot.slane %v3260_v57, %v3263_v7 }
 0x6c1   :  { %4468 = vset.pattern.permute.xlu1 %v4642_v35 }
 0x6c2   :  { %3672 = vperm.xlu1 %4468, %v6188_v43   ;;  %3684 = vperm.xlu0 %4469, %v6247_v28   ;;  %v3601_v43 = vpop.permute.xlu0 %3600 }
 0x6c3   :  { %vm3623_vm10 = vcmp.eq.s32.totalorder %v3601_v43, 1 }
 0x6c6   :  { %3678 = vperm.xlu1 %4468, %v6223_v41   ;;  %3690 = vperm.xlu0 %4469, %v6269_v21   ;;  %v3607_v41 = vpop.permute.xlu1 %3606 }
 0x6c7   :  { %vm3625_vm3 = vcmp.eq.s32.totalorder %v3607_v41, 1 }
 0x6ca   :  { %3681 = vperm.xlu1 %4468, %v6218_v30  }
 0x6ce   :  { %3687 = vperm.xlu1 %4468, %v6242_v44  }
 0x6d2   :  { %3693 = vperm.xlu1 %4468, %v6264_v47  }
 0x6dc   :  { %v4235_v30 = vpop.f32.mrb[32].mxu1 }
 0x6dd   :  { %v6497_v20 = vadd.f32 %v4235_v30, %v3264_v32  ;;  %v3336_v44 = vpop.f32.mrb[33].mxu1  ;;  %v3787_v30 = vpop.permute.xlu0 %3786 }
 0x6de   :  { %v6499_v28 = vadd.f32 %v3336_v44, %v3264_v32  ;;  %v4236_v47 = vpop.f32.mrb[34].mxu1 }
 0x6df   :  { %v3505_v21 = vsel %vm6843_vm13, %v6497_v20, 0.0  ;;  %v3553_v3 = vsel %vm3545_vm1, %v6497_v20, 0.0  ;;  %v6505_v50 = vadd.f32 %v4236_v47, %v3264_v32  ;;  %v3339_v36 = vpop.f32.mrb[35].mxu1  ;;  %v3633_v18 = vsel %vm3625_vm3, %v6497_v20, 0.0 }
 0x6e0   :  { %v3503_v25 = vsel %vm6844_vm14, %v6499_v28, 0.0  ;;  %v3551_v31 = vsel %vm3543_vm12, %v6499_v28, 0.0  ;;  %v6514_v5 = vadd.f32 %v3339_v36, %v3264_v32  ;;  %v3631_v16 = vsel %vm3623_vm10, %v6499_v28, 0.0 }
 0x6e1   :  { %vm6845_vm13 = vcmp.eq.s32.totalorder %v6377_v24, 1  ;;  %v3554_v52 = vsel %vm3546_vm11, %v6505_v50, 0.0  ;;  %v3744_v9 = vsel %vm3743_vm8, %v3503_v25, %v3551_v31  ;;  %v3746_v29 = vsel %vm3743_vm8, %v3505_v21, %v3553_v3 }
 0x6e2   :  { %v3506_v45 = vsel %vm6845_vm13, %v6505_v50, 0.0  ;;  %vm6846_vm3 = vcmp.eq.s32.totalorder %v6373_v42, 1  ;;  %v3552_v60 = vsel %vm3544_vm0, %v6514_v5, 0.0  ;;  %v3632_v24 = vsel %vm3624_vm9, %v6514_v5, 0.0 }
 0x6e3   :  { %v3504_v22 = vsel %vm6846_vm3, %v6514_v5, 0.0  ;;  %v6532_v23 = vsel %vm3743_vm8, %v3506_v45, %v3554_v52  ;;  %vm6847_vm10 = vcmask 64512   ;;  %vm3499_vm0 = vcmp.eq.s32.totalorder %v6379_v11, 1  ;;  %v3789_v47 = vpop.permute.xlu1 %3788 }
 0x6e4   :  { %v3745_v53 = vsel %vm3743_vm8, %v3504_v22, %v3552_v60  ;;  %v6538_v33 = vsel %vm6847_vm10, %v3744_v9, %v3631_v16  ;;  %vm6848_vm14 = vmmov %vm6847_vm10  ;;  %vm3500_vm1 = vcmp.eq.s32.totalorder %v6381_v63, 1  ;;  %vm3501_vm11 = vcmp.eq.s32.totalorder %v6383_v51, 1 }
 0x6e5   :  { %v6541_v12 = vsel %vm6848_vm14, %v3746_v29, %v3633_v18  ;;  %vm6849_vm12 = vmmov %vm6847_vm10  ;;  %vm3502_vm9 = vcmp.eq.s32.totalorder %v6385_v10, 1  ;;  %vm3547_vm13 = vcmp.eq.s32.totalorder %v6393_v40, 1  ;;  %vm3549_vm3 = vcmp.eq.s32.totalorder %v6397_v13, 1 }
 0x6e6   :  { %v6544_v42 = vsel %vm6849_vm12, %v3745_v53, %v3632_v24  ;;  %vm3550_vm10 = vcmp.eq.s32.totalorder %v6404_v6, 1  ;;  %vm3548_vm14 = vcmp.eq.s32.totalorder %v6399_v56, 1  ;;  %vm3874_vm12 = vcmask 7168  }
 0x6e7   :  { %v3511_v10 = vsel %vm6179_vm4, %v6283_v0, -10.0  ;;  %v3512_v31 = vsel %vm6190_vm5, %v6293_v34, -10.0  ;;  %v3513_v9 = vsel %vm6202_vm2, %v6288_v2, -10.0  ;;  %vm6850_vm5 = vnez %v6839_v58 }
 0x6e8   :  { %v3875_v63 = vsel %vm3874_vm12, %v3511_v10, %v3787_v30  ;;  %v3876_v39 = vsel %vm3874_vm12, %v3512_v31, %v3789_v47  ;;  %v3517_v10 = vsel %vm6850_vm5, %v6304_v46, -10.0  ;;  %vm6851_vm4 = vnez %v6842_v17 }
 0x6eb   :  { %v3819_v44 = vpop.permute.xlu0 %3818 }
 0x6ec   :  { %v4239_v37 = vpop.f32.mrb[36].mxu1 }
 0x6ed   :  { %v6549_v4 = vadd.f32 %v4239_v37, %v3264_v32  ;;  %v3352_v27 = vpop.f32.mrb[37].mxu1  ;;  %v3514_v37 = vsel %vm6209_vm6, %v6301_v8, -10.0  ;;  %vm6852_vm6 = vcmask 64512  }
 0x6ee   :  { %v6554_v26 = vadd.f32 %v3352_v27, %v3264_v32  ;;  %v4240_v15 = vpop.f32.mrb[38].mxu1 }
 0x6ef   :  { %v6557_v14 = vadd.f32 %v4240_v15, %v3264_v32  ;;  %v3355_v35 = vpop.f32.mrb[39].mxu1  ;;  %v3509_v19 = vsel %vm3501_vm11, %v6549_v4, 0.0  ;;  %v3557_v51 = vsel %vm3549_vm3, %v6549_v4, 0.0  ;;  %vm3892_vm11 = vcmask 23552  }
 0x6f0   :  { %v6561_v62 = vadd.f32 %v3355_v35, %v3264_v32  ;;  %v3507_v40 = vsel %vm3499_vm0, %v6554_v26, 0.0  ;;  %v3555_v13 = vsel %vm3547_vm13, %v6554_v26, 0.0  ;;  %v6568_v57 = vsel %vm3743_vm8, %v3509_v19, %v3557_v51  ;;  %vm6855_vm13 = vmmov %vm6852_vm6 }
 0x6f1   :  { %v6572_v6 = vsel %vm3743_vm8, %v3507_v40, %v3555_v13  ;;  %v3510_v7 = vsel %vm3502_vm9, %v6557_v14, 0.0  ;;  %v3558_v32 = vsel %vm3550_vm10, %v6557_v14, 0.0  ;;  %vm3883_vm0 = vcmask 15360   ;;  %vm6854_vm9 = vmmov %vm6852_vm6 }
 0x6f2   :  { %v3508_v11 = vsel %vm3500_vm1, %v6561_v62, 0.0  ;;  %v3556_v43 = vsel %vm3548_vm14, %v6561_v62, 0.0  ;;  %v6583_v41 = vsel %vm3743_vm8, %v3510_v7, %v3558_v32  ;;  %v3884_v21 = vsel %vm3883_vm0, %v3875_v63, %v3819_v44 }
 0x6f3   :  { %v6586_v56 = vsel %vm3743_vm8, %v3508_v11, %v3556_v43  ;;  %v3821_v18 = vpop.permute.xlu1 %3820  ;;  %v3515_v19 = vsel %vm6225_vm7, %v6296_v38, -10.0  ;;  %v3516_v11 = vsel %vm6233_vm15, %v6309_v59, -10.0  ;;  %vm6853_vm15 = vmmov %vm6852_vm6  ;;  %vm3769_vm10 = vcmask 130048  }
 0x6f4   :  { %v3885_v0 = vsel %vm3883_vm0, %v3876_v39, %v3821_v18 }
 0x6fb   :  { %v3851_v3 = vpop.permute.xlu0 %3850 }
 0x6fc   :  { %v3893_v36 = vsel %vm3892_vm11, %v3884_v21, %v3851_v3 }
 0x6fd   :  { %3909 = vrot.lane.b32.xlu0 %v3893_v36, %s4643_s4  ;;  %v3518_v36 = vsel %vm6851_vm4, %v6315_v49, -10.0 }
 0x6ff   :  { %v3791_v25 = vpop.permute.xlu0 %3790 }
 0x700   :  { %v3877_v29 = vsel %vm3874_vm12, %v3513_v9, %v3791_v25 }
 0x703   :  { %v3853_v16 = vpop.permute.xlu1 %3852  ;;  %v3823_v45 = vpop.permute.xlu0 %3822 }
 0x704   :  { %v3894_v52 = vsel %vm3892_vm11, %v3885_v0, %v3853_v16  ;;  %v3886_v22 = vsel %vm3883_vm0, %v3877_v29, %v3823_v45 }
 0x705   :  { %3911 = vrot.lane.b32.xlu1 %v3894_v52, %s4643_s4 }
 0x707   :  { %v3793_v48 = vpop.permute.xlu1 %3792  ;;  %v3855_v34 = vpop.permute.xlu0 %3854 }
 0x708   :  { %v3895_v60 = vsel %vm3892_vm11, %v3886_v22, %v3855_v34  ;;  %v3878_v55 = vsel %vm3874_vm12, %v3514_v37, %v3793_v48 }
 0x709   :  { %3913 = vrot.lane.b32.xlu0 %v3895_v60, %s4643_s4 }
 0x70b   :  { %v3825_v24 = vpop.permute.xlu1 %3824  ;;  %v3795_v53 = vpop.permute.xlu0 %3794 }
 0x70c   :  { %v3887_v2 = vsel %vm3883_vm0, %v3878_v55, %v3825_v24  ;;  %v3879_v51 = vsel %vm3874_vm12, %v3515_v19, %v3795_v53 }
 0x70f   :  { %v3857_v27 = vpop.permute.xlu1 %3856  ;;  %v3827_v15 = vpop.permute.xlu0 %3826 }
 0x710   :  { %v3896_v35 = vsel %vm3892_vm11, %v3887_v2, %v3857_v27  ;;  %v3888_v40 = vsel %vm3883_vm0, %v3879_v51, %v3827_v15 }
 0x711   :  { %3915 = vrot.lane.b32.xlu1 %v3896_v35, %s4643_s4 }
 0x713   :  { %v3797_v54 = vpop.permute.xlu1 %3796  ;;  %v3859_v8 = vpop.permute.xlu0 %3858 }
 0x714   :  { %v3897_v13 = vsel %vm3892_vm11, %v3888_v40, %v3859_v8  ;;  %v3880_v1 = vsel %vm3874_vm12, %v3516_v11, %v3797_v54 }
 0x715   :  { %3917 = vrot.lane.b32.xlu0 %v3897_v13, %s4643_s4 }
 0x717   :  { %v3829_v7 = vpop.permute.xlu1 %3828  ;;  %v3799_v32 = vpop.permute.xlu0 %3798 }
 0x718   :  { %v3889_v38 = vsel %vm3883_vm0, %v3880_v1, %v3829_v7  ;;  %v3881_v63 = vsel %vm3874_vm12, %v3517_v10, %v3799_v32 }
 0x71b   :  { %v3861_v43 = vpop.permute.xlu1 %3860  ;;  %v3831_v30 = vpop.permute.xlu0 %3830 }
 0x71c   :  { %v3898_v44 = vsel %vm3892_vm11, %v3889_v38, %v3861_v43  ;;  %v3890_v47 = vsel %vm3883_vm0, %v3881_v63, %v3831_v30 }
 0x71d   :  { %3919 = vrot.lane.b32.xlu1 %v3898_v44, %s4643_s4 }
 0x71f   :  { %v3801_v61 = vpop.permute.xlu1 %3800  ;;  %v3863_v59 = vpop.permute.xlu0 %3862 }
 0x720   :  { %v3899_v21 = vsel %vm3892_vm11, %v3890_v47, %v3863_v59  ;;  %v3882_v58 = vsel %vm3874_vm12, %v3518_v36, %v3801_v61  ;;  %vm6856_vm12 = vmmov %vm6852_vm6 }
 0x721   :  { %3921 = vrot.lane.b32.xlu0 %v3899_v21, %s4643_s4 }
 0x723   :  { %v3833_v3 = vpop.permute.xlu1 %3832 }
 0x724   :  { %v3891_v46 = vsel %vm3883_vm0, %v3882_v58, %v3833_v3  ;;  %vm6857_vm0 = vcmask 97280  }
 0x725   :  { %vm6858_vm4 = vmmov %vm6857_vm0 }
 0x727   :  { %v3865_v18 = vpop.permute.xlu1 %3864 }
 0x728   :  { %v3900_v25 = vsel %vm3892_vm11, %v3891_v46, %v3865_v18 }
 0x729   :  { %3923 = vrot.lane.b32.xlu1 %v3900_v25, %s4643_s4 }
 0x730   :  { %v3610_v31 = vpop.permute.xlu0 %3609 }
 0x731   :  { %vm3626_vm2 = vcmp.eq.s32.totalorder %v3610_v31, 1 }
 0x732   :  { %v3634_v39 = vsel %vm3626_vm2, %v6505_v50, 0.0  ;;  %vm6859_vm2 = vmmov %vm6857_vm0 }
 0x733   :  { %v3756_v0 = vsel %vm6852_vm6, %v6532_v23, %v3634_v39 }
 0x734   :  { %v3616_v16 = vpop.permute.xlu0 %3615 }
 0x735   :  { %vm3628_vm7 = vcmp.eq.s32.totalorder %v3616_v16, 1 }
 0x736   :  { %v3636_v17 = vsel %vm3628_vm7, %v6561_v62, 0.0 }
 0x737   :  { %v3758_v49 = vsel %vm6853_vm15, %v6586_v56, %v3636_v17  ;;  %vm6860_vm15 = vmmov %vm6857_vm0 }
 0x738   :  { %v3613_v45 = vpop.permute.xlu1 %3612  ;;  %v3622_v52 = vpop.permute.xlu0 %3621 }
 0x739   :  { %vm3627_vm8 = vcmp.eq.s32.totalorder %v3613_v45, 1  ;;  %vm3630_vm1 = vcmp.eq.s32.totalorder %v3622_v52, 1 }
 0x73a   :  { %v3635_v9 = vsel %vm3627_vm8, %v6554_v26, 0.0  ;;  %v3638_v29 = vsel %vm3630_vm1, %v6557_v14, 0.0  ;;  %vm6861_vm8 = vmmov %vm6857_vm0 }
 0x73b   :  { %v3757_v22 = vsel %vm6854_vm9, %v6572_v6, %v3635_v9  ;;  %v3760_v23 = vsel %vm6855_vm13, %v6583_v41, %v3638_v29  ;;  %vm6862_vm9 = vmmov %vm6857_vm0 }
 0x73c   :  { %v3619_v48 = vpop.permute.xlu1 %3618 }
 0x73d   :  { %vm3629_vm3 = vcmp.eq.s32.totalorder %v3619_v48, 1  ;;  %v3676_v34 = vpop.permute.xlu0 %3675 }
 0x73e   :  { %v3637_v60 = vsel %vm3629_vm3, %v6549_v4, 0.0  ;;  %vm3696_vm14 = vcmp.eq.s32.totalorder %v3676_v34, 1  ;;  %vm6863_vm3 = vmmov %vm6857_vm0 }
 0x73f   :  { %v3759_v56 = vsel %vm6856_vm12, %v6568_v57, %v3637_v60  ;;  %v3704_v24 = vsel %vm3696_vm14, %v6514_v5, 0.0  ;;  %vm6864_vm12 = vmmov %vm6857_vm0 }
 0x740   :  { %v3762_v53 = vsel %vm6857_vm0, %v6544_v42, %v3704_v24  ;;  %vm3933_vm0 = vcmask 162944  }
 0x741   :  { %3771 = vst.msk [vmem:[%s6745_s3 + $0x8] sm:$0xff] %vm3769_vm10, %v3762_v53  ;;  %v3673_v6 = vpop.permute.xlu1 %3672  ;;  %v3685_v41 = vpop.permute.xlu0 %3684 }
 0x742   :  { %vm3695_vm11 = vcmp.eq.s32.totalorder %v3673_v6, 1  ;;  %vm3699_vm5 = vcmp.eq.s32.totalorder %v3685_v41, 1 }
 0x743   :  { %v3703_v37 = vsel %vm3695_vm11, %v6499_v28, 0.0  ;;  %v3707_v55 = vsel %vm3699_vm5, %v6554_v26, 0.0 }
 0x744   :  { %v3761_v57 = vsel %vm6858_vm4, %v6538_v33, %v3703_v37  ;;  %v3765_v5 = vsel %vm6859_vm2, %v3757_v22, %v3707_v55 }
 0x745   :  { %3770 = vst.msk [vmem:[%s6745_s3] sm:$0xff] %vm3769_vm10, %v3761_v57  ;;  %3774 = vst.msk [vmem:[%s6745_s3 + $0x20] sm:$0xff] %vm3769_vm10, %v3765_v5  ;;  %v3679_v42 = vpop.permute.xlu1 %3678  ;;  %v3691_v2 = vpop.permute.xlu0 %3690 }
 0x746   :  { %vm3697_vm6 = vcmp.eq.s32.totalorder %v3679_v42, 1  ;;  %vm3701_vm7 = vcmp.eq.s32.totalorder %v3691_v2, 1 }
 0x747   :  { %v3705_v28 = vsel %vm3697_vm6, %v6497_v20, 0.0  ;;  %v3709_v33 = vsel %vm3701_vm7, %v6549_v4, 0.0 }
 0x748   :  { %v3763_v26 = vsel %vm6860_vm15, %v6541_v12, %v3705_v28  ;;  %v3767_v27 = vsel %vm6861_vm8, %v3759_v56, %v3709_v33 }
 0x749   :  { %3772 = vst.msk [vmem:[%s6745_s3 + $0x10] sm:$0xff] %vm3769_vm10, %v3763_v26  ;;  %3776 = vst.msk [vmem:[%s6745_s3 + $0x30] sm:$0xff] %vm3769_vm10, %v3767_v27  ;;  %v3682_v15 = vpop.permute.xlu1 %3681 }
 0x74a   :  { %vm3698_vm1 = vcmp.eq.s32.totalorder %v3682_v15, 1 }
 0x74b   :  { %v3706_v20 = vsel %vm3698_vm1, %v6505_v50, 0.0 }
 0x74c   :  { %v3764_v4 = vsel %vm6862_vm9, %v3756_v0, %v3706_v20 }
 0x74d   :  { %3773 = vst.msk [vmem:[%s6745_s3 + $0x18] sm:$0xff] %vm3769_vm10, %v3764_v4  ;;  %v3688_v12 = vpop.permute.xlu1 %3687 }
 0x74e   :  { %vm3700_vm13 = vcmp.eq.s32.totalorder %v3688_v12, 1 }
 0x74f   :  { %v3708_v35 = vsel %vm3700_vm13, %v6561_v62, 0.0 }
 0x750   :  { %v3766_v19 = vsel %vm6863_vm3, %v3758_v49, %v3708_v35 }
 0x751   :  { %3775 = vst.msk [vmem:[%s6745_s3 + $0x28] sm:$0xff] %vm3769_vm10, %v3766_v19  ;;  %v3694_v51 = vpop.permute.xlu1 %3693 }
 0x752   :  { %vm3702_vm14 = vcmp.eq.s32.totalorder %v3694_v51, 1 }
 0x753   :  { %v3710_v50 = vsel %vm3702_vm14, %v6557_v14, 0.0 }
 0x754   :  { %v3768_v40 = vsel %vm6864_vm12, %v3760_v23, %v3710_v50 }
 0x755   :  { %3777 = vst.msk [vmem:[%s6745_s3 + $0x38] sm:$0xff] %vm3769_vm10, %v3768_v40 }
 0x76f   :  { %v3910_v62 = vpop.permute.xlu0 %3909 }
 0x770   :  { %3934 = vst.msk [vmem:[%s6745_s3] sm:$0xff] %vm3933_vm0, %v3910_v62 }
 0x777   :  { %v3912_v54 = vpop.permute.xlu1 %3911 }
 0x778   :  { %3935 = vst.msk [vmem:[%s6745_s3 + $0x8] sm:$0xff] %vm3933_vm0, %v3912_v54 }
 0x77b   :  { %v3914_v14 = vpop.permute.xlu0 %3913 }
 0x77c   :  { %3936 = vst.msk [vmem:[%s6745_s3 + $0x10] sm:$0xff] %vm3933_vm0, %v3914_v14 }
 0x783   :  { %v3916_v8 = vpop.permute.xlu1 %3915 }
 0x784   :  { %3937 = vst.msk [vmem:[%s6745_s3 + $0x18] sm:$0xff] %vm3933_vm0, %v3916_v8 }
 0x787   :  { %v3918_v13 = vpop.permute.xlu0 %3917 }
 0x788   :  { %3938 = vst.msk [vmem:[%s6745_s3 + $0x20] sm:$0xff] %vm3933_vm0, %v3918_v13 }
 0x78f   :  { %v3920_v7 = vpop.permute.xlu1 %3919 }
 0x790   :  { %3939 = vst.msk [vmem:[%s6745_s3 + $0x28] sm:$0xff] %vm3933_vm0, %v3920_v7 }
 0x793   :  { %v3922_v32 = vpop.permute.xlu0 %3921 }
 0x794   :  { %3940 = vst.msk [vmem:[%s6745_s3 + $0x30] sm:$0xff] %vm3933_vm0, %v3922_v32 }
 0x79b   :  { %v3924_v11 = vpop.permute.xlu1 %3923 }
 0x79c   :  { %3941 = vst.msk [vmem:[%s6745_s3 + $0x38] sm:$0xff] %vm3933_vm0, %v3924_v11 }
 0x79d   :  { %3946 = vsyncpa [#allocation3], 1 }

</bundles_post_ra>
